<compile_context>
chip_gen: v5e
topology: v5e:2x2
jax: 0.10.0
libtpu: 0.0.40
codegen_flags: <defaults>
</compile_context>

<pallas_src>
import functools

import jax
import jax.numpy as jnp
import numpy as np
from jax.experimental import pallas as pl
from jax.experimental.pallas import tpu as pltpu

C_IN = 4     # input_channels
HID = 32     # hidden_channels
C_OUT = 4    # output_channels
SEQ = 8      # number of knots in t_interval
BATCH = 4

# The single-vreg lane scheme (c-major blocks of HID, two-roll fold) requires
# exactly 128 lanes.
assert C_IN * HID == 128, "kernel lane layout requires C_IN * HID == 128"


def ncde_encoder_kernel(ts, ctm_ref,
                        w_init_ref, b_init_ref,
                        w1_ref, b1_ref,
                        w2_ref, b2_ref,
                        w_ro_ref, b_ro_ref, invdt_ref,
                        pred_ref, newc_ref,
                        dxb_scr, z_scr):
    C, H, O, L = C_IN, HID, C_OUT, SEQ
    CH = C * H
    R = 4                                   # rk4 evaluation points per interval
    Bb = ctm_ref.shape[1]
    nI = (L - 1) * Bb

    # --- hoisted constants ---------------------------------------------------
    w1a = w1_ref[0:1, :]                    # (1,CH): w1[:,0] in lanes 0..H-1, 0 elsewhere
    w1b = w1_ref[1:2, :]
    b1_0 = b1_ref[:, 0:1]
    b1_1 = b1_ref[:, 1:2]
    w2a = w2_ref[0:1, :]                    # (1,CH) c-major blocks of H
    w2b = w2_ref[1:2, :]
    b2 = b2_ref[...]                        # (1,CH) c-major

    # --- prologue: everything that does not depend on z ----------------------
    ctm = ctm_ref[...]                      # (L-1, Bb, 4*C) time-major

    def expand_c(x):   # (L-1, Bb, C) -> (L-1, Bb, C*H): lane c*H+h <- channel c
        return jnp.concatenate(
            [jnp.broadcast_to(x[:, :, c:c + 1], (L - 1, Bb, H)) for c in range(C)],
            axis=-1)

    b_e = expand_c(ctm[:, :, 1 * C:2 * C])
    c_e = expand_c(ctm[:, :, 2 * C:3 * C])
    d_e = expand_c(ctm[:, :, 3 * C:4 * C])

    # dX/dt at all 4 rk4 evaluation points of every interval, written once to a
    # time-major VMEM slab.  All of this (and the stores) is off the serial
    # RK dependency chain.
    for i in range(L - 1):
        dti = ts[i + 1] - ts[i]
        be, ce, de = b_e[i], c_e[i], d_e[i]            # (Bb, CH) each
        for r, f in enumerate((0.0, dti / 3.0, 2.0 * dti / 3.0, dti)):
            row0 = (i * R + r) * Bb
            dxb_scr[row0:row0 + Bb, :] = be if r == 0 else be + (ce + de * f) * f

    # X0 = X.evaluate(t0) == 'a' coefficients of interval 0; initial linear as
    # outer products, directly in the replicated 128-lane layout.
    a0 = ctm[0, :, 0:C]                                # (Bb, C)
    z = b_init_ref[...] + a0[:, 0:1] * w_init_ref[0:1, :]
    for c in range(1, C):
        z = z + a0[:, c:c + 1] * w_init_ref[c:c + 1, :]
    # dropout(p=0) is the identity.
    z_scr[0:Bb, :] = z

    # --- f_theta(z) . dX/dt, everything stays 128 lanes wide -----------------
    def vector_field(z, dxb):
        # linear1 (K=32, N=2): two masked full-lane reductions (weights are
        # zero outside lanes 0..H-1, so the replicated lanes of z are harmless).
        h0 = jnp.maximum(jnp.sum(z * w1a, axis=-1, keepdims=True) + b1_0, 0.0)
        h1 = jnp.maximum(jnp.sum(z * w1b, axis=-1, keepdims=True) + b1_1, 0.0)
        # linear2 (K=2, N=128): outer-product broadcast accumulation.
        g = jnp.tanh(h0 * w2a + h1 * w2b + b2)         # (Bb, CH)
        # input-channel contraction: one multiply + two XLU lane-group folds;
        # after the folds every H-lane group holds the full sum (no slice).
        t = g * dxb
        t = t + pltpu.roll(t, 2 * H, 1)
        t = t + pltpu.roll(t, H, 1)
        return t                                       # (Bb, CH)

    # cdeint: torchcde default fixed-step 'rk4' (torchdiffeq 3/8-rule variant),
    # step_size = min(t diffs) == one step per knot interval here.
    for i in range(L - 1):
        dt = ts[i + 1] - ts[i]
        base = i * R * Bb
        dxb0 = dxb_scr[base + 0 * Bb:base + 1 * Bb, :]
        dxb1 = dxb_scr[base + 1 * Bb:base + 2 * Bb, :]
        dxb2 = dxb_scr[base + 2 * Bb:base + 3 * Bb, :]
        dxb3 = dxb_scr[base + 3 * Bb:base + 4 * Bb, :]
        k1 = vector_field(z, dxb0)
        k2 = vector_field(z + (dt / 3.0) * k1, dxb1)
        k3 = vector_field(z + dt * (k2 - (1.0 / 3.0) * k1), dxb2)
        k4 = vector_field(z + dt * (k1 - k2 + k3), dxb3)
        z = z + (k1 + 3.0 * (k2 + k3) + k4) * (dt * 0.125)
        z_scr[(i + 1) * Bb:(i + 2) * Bb, :] = z        # off-chain vst

    # --- epilogue: readout + Hermite re-coefficienting, fully batched --------
    zall = z_scr[...]                                  # (L*Bb, CH), time-major
    pall = jnp.dot(jnp.tanh(zall), w_ro_ref[...],
                   preferred_element_type=jnp.float32) + b_ro_ref[...]   # (L*Bb, O)
    pred_ref[...] = pall                               # single bulk store

    # hermite_cubic_coefficients_with_backward_differences(pred_y, t)
    invdt = invdt_ref[...]                             # (nI, O): 1/dt per row
    x_prev = pall[0:nI, :]
    x_next = pall[Bb:L * Bb, :]
    derivs = (x_next - x_prev) * invdt                 # = d_next
    d_prev = jnp.concatenate([derivs[0:Bb, :], derivs[0:nI - Bb, :]], axis=0)
    slope_err = derivs - d_prev
    dd = derivs - d_prev
    two_c = (3.0 * slope_err - dd) * (2.0 * invdt)
    three_d = (dd - 2.0 * slope_err) * (3.0 * invdt * invdt)
    newc_ref[...] = jnp.concatenate([x_prev, d_prev, two_c, three_d], axis=-1)


def ncde_encoder_forward(coeffs, t, params):
    w_init, b_init, w1, b1, w2, b2, w_ro, b_ro = params
    B = coeffs.shape[0]
    C, H, O, L = C_IN, HID, C_OUT, SEQ
    CH = C * H
    f32 = jnp.float32

    # --- wrapper-side layout plumbing (not compute) ---------------------------
    # linear2's flattened (hidden, input) output (h-major in torch's .view) is
    # permuted into c-major blocks of HID so the kernel never reshapes.
    w2p = w2.reshape(2, H, C).transpose(0, 2, 1).reshape(2, CH)
    b2p = b2.reshape(H, C).T.reshape(1, CH)
    # linear1 rows, zero-padded to 128 lanes (replicated-z layout safe).
    w1pad = jnp.concatenate([w1.T, jnp.zeros((2, CH - H), f32)], axis=1)
    # initial linear, tiled across the 4 lane groups (replicated-128 output).
    w_init_rep = jnp.tile(w_init, (1, C))                       # (C, CH)
    b_init_rep = jnp.tile(b_init.reshape(1, H), (1, C))         # (1, CH)
    # readout, contraction dim zero-padded to 128.
    w_ro_pad = jnp.concatenate([w_ro, jnp.zeros((CH - H, O), f32)], axis=0)
    # spline coefficients, time-major.
    coeffs_tm = jnp.transpose(coeffs, (1, 0, 2))                # (L-1, B, 4C)

    # static time grid -> scalar constants + per-row 1/dt table for the epilogue
    t_np = np.asarray(t, dtype=np.float64)
    ts = tuple(float(v) for v in t_np)
    inv_rows = np.repeat(1.0 / np.diff(t_np), B)                # ((L-1)*B,)
    invdt = jnp.asarray(np.tile(inv_rows[:, None], (1, O)).astype(np.float32))

    kernel = functools.partial(ncde_encoder_kernel, ts)

    # Per perf review: splitting the tiny batch across TensorCores (v7x) only
    # duplicates the serial per-vreg RK chain; keep a single grid step.
    grid = (1,)

    def full(shape):
        return pl.BlockSpec(shape, lambda i, _s=shape: (0,) * len(_s))

    in_specs = [
        full((L - 1, B, 4 * C)),     # coeffs, time-major
        full((C, CH)), full((1, CH)),          # initial linear (tiled)
        full((2, CH)), full((1, 2)),           # func.linear1 (padded rows)
        full((2, CH)), full((1, CH)),          # func.linear2 (c-major)
        full((CH, O)), full((1, O)),           # readout (padded K)
        full(((L - 1) * B, O)),                # 1/dt per row
    ]
    out_specs = [
        full((L * B, O)),                      # pred, time-major flat slab
        full(((L - 1) * B, 4 * O)),            # new coeffs, time-major flat slab
    ]
    out_shape = (
        jax.ShapeDtypeStruct((L * B, O), f32),
        jax.ShapeDtypeStruct(((L - 1) * B, 4 * O), f32),
    )
    scratch_shapes = [
        pltpu.VMEM(((L - 1) * 4 * B, CH), f32),   # dX/dt slab (all rk points)
        pltpu.VMEM((L * B, CH), f32),             # z trajectory slab
    ]

    pred_tm, newc_tm = pl.pallas_call(
        kernel,
        grid=grid,
        in_specs=in_specs,
        out_specs=out_specs,
        out_shape=out_shape,
        scratch_shapes=scratch_shapes,
        compiler_params=pltpu.CompilerParams(dimension_semantics=("arbitrary",)),
    )(coeffs_tm,
      w_init_rep, b_init_rep,
      w1pad, b1.reshape(1, -1),
      w2p, b2p,
      w_ro_pad, b_ro.reshape(1, -1),
      invdt)

    pred = pred_tm.reshape(L, B, O).transpose(1, 0, 2)
    newc = newc_tm.reshape(L - 1, B, 4 * O).transpose(1, 0, 2)
    return pred, newc


def ref_forward(coeffs, t, params):
    """Pure-JAX reference of the same semantics (for verification)."""
    w_init, b_init, w1, b1, w2, b2, w_ro, b_ro = params
    C, H, L = C_IN, HID, SEQ
    a = coeffs[:, :, 0 * C:1 * C]
    b = coeffs[:, :, 1 * C:2 * C]
    tc = coeffs[:, :, 2 * C:3 * C]
    td = coeffs[:, :, 3 * C:4 * C]
    ts = np.asarray(t, dtype=np.float64)

    def x_deriv(i, frac):
        return b[:, i, :] + (tc[:, i, :] + td[:, i, :] * frac) * frac

    def func(z):
        h = jax.nn.relu(z @ w1 + b1)
        g = jnp.tanh(h @ w2 + b2)
        return g.reshape(g.shape[0], H, C)

    def vf(z, i, frac):
        return jnp.einsum('bhc,bc->bh', func(z), x_deriv(i, frac))

    z = a[:, 0, :] @ w_init + b_init
    zs = [z]
    for i in range(L - 1):
        dt = float(ts[i + 1] - ts[i])
        k1 = vf(z, i, 0.0)
        k2 = vf(z + dt * k1 / 3.0, i, dt / 3.0)
        k3 = vf(z + dt * (k2 - k1 / 3.0), i, 2.0 * dt / 3.0)
        k4 = vf(z + dt * (k1 - k2 + k3), i, dt)
        z = z + (k1 + 3.0 * (k2 + k3) + k4) * dt * 0.125
        zs.append(z)
    z_t = jnp.stack(zs, axis=1)
    pred = jnp.tanh(z_t) @ w_ro + b_ro

    t_arr = jnp.asarray(ts, dtype=jnp.float32)
    dt_col = (t_arr[1:] - t_arr[:-1])[None, :, None]
    derivs = (pred[:, 1:] - pred[:, :-1]) / dt_col
    d_prev = jnp.concatenate([derivs[:, :1], derivs[:, :-1]], axis=1)
    d_next = derivs
    x_prev = pred[:, :-1]
    x_diff = pred[:, 1:] - pred[:, :-1]
    slope_err = x_diff / dt_col - d_prev
    dd = d_next - d_prev
    two_c = 2.0 * (3.0 * slope_err - dd) / dt_col
    three_d = 3.0 * (dd - 2.0 * slope_err) / dt_col ** 2
    newc = jnp.concatenate([x_prev, d_prev, two_c, three_d], axis=-1)
    return pred, newc


if __name__ == "__main__":
    key = jax.random.PRNGKey(0)
    keys = jax.random.split(key, 9)

    def linear_init(kw, kb, fan_in, fan_out):
        bound = 1.0 / np.sqrt(fan_in)
        w = jax.random.uniform(kw, (fan_in, fan_out), jnp.float32, -bound, bound)
        bb = jax.random.uniform(kb, (fan_out,), jnp.float32, -bound, bound)
        return w, bb

    w_init, b_init = linear_init(keys[0], keys[1], C_IN, HID)          # initial
    w1, b1 = linear_init(keys[2], keys[3], HID, 2)                     # func.linear1
    w2, b2 = linear_init(keys[4], keys[5], 2, HID * C_IN)              # func.linear2
    w_ro, b_ro = linear_init(keys[6], keys[7], HID, C_OUT)             # readout
    params = (w_init, b_init, w1, b1, w2, b2, w_ro, b_ro)

    # coeffs = cubic-spline coefficients [a|b|two_c|three_d], (B, L-1, 4*C_in)
    coeffs = 0.1 * jax.random.normal(keys[8], (BATCH, SEQ - 1, 4 * C_IN),
                                     jnp.float32)
    t_interval = np.arange(SEQ, dtype=np.float32)

    pred_y, new_coeffs = ncde_encoder_forward(coeffs, t_interval, params)
    jax.block_until_ready((pred_y, new_coeffs))

    pred_ref, newc_ref = ref_forward(coeffs, t_interval, params)
    np.testing.assert_allclose(np.asarray(pred_y), np.asarray(pred_ref),
                               rtol=1e-4, atol=1e-4)
    np.testing.assert_allclose(np.asarray(new_coeffs), np.asarray(newc_ref),
                               rtol=1e-4, atol=1e-4)
    print("KERNEL_OK")
</pallas_src>

<mosaic_0001>
module attributes {stable_mosaic.version = 11 : i64} {
  func.func @ncde_encoder_kernel(%arg0: i32, %arg1: memref<7x4x16xf32, #tpu.memory_space<vmem>>, %arg2: memref<4x128xf32, #tpu.memory_space<vmem>>, %arg3: memref<1x128xf32, #tpu.memory_space<vmem>>, %arg4: memref<2x128xf32, #tpu.memory_space<vmem>>, %arg5: memref<1x2xf32, #tpu.memory_space<vmem>>, %arg6: memref<2x128xf32, #tpu.memory_space<vmem>>, %arg7: memref<1x128xf32, #tpu.memory_space<vmem>>, %arg8: memref<128x4xf32, #tpu.memory_space<vmem>>, %arg9: memref<1x4xf32, #tpu.memory_space<vmem>>, %arg10: memref<28x4xf32, #tpu.memory_space<vmem>>, %arg11: memref<32x4xf32, #tpu.memory_space<vmem>>, %arg12: memref<28x16xf32, #tpu.memory_space<vmem>>, %arg13: memref<112x128xf32, #tpu.memory_space<vmem>>, %arg14: memref<32x128xf32, #tpu.memory_space<vmem>>) attributes {dimension_semantics = [#tpu.dimension_semantics<arbitrary>], iteration_bounds = array<i64: 1>, scalar_prefetch = 0 : i64, scratch_operands = 2 : i64, tpu.core_type = #tpu.core_type<tc>, window_params = [{pipeline_mode = #tpu.pipeline_mode<synchronous>, transform_indices = @transform_0, window_bounds = array<i64: 7, 4, 16>}, {pipeline_mode = #tpu.pipeline_mode<synchronous>, transform_indices = @transform_1, window_bounds = array<i64: 4, 128>}, {pipeline_mode = #tpu.pipeline_mode<synchronous>, transform_indices = @transform_2, window_bounds = array<i64: 1, 128>}, {pipeline_mode = #tpu.pipeline_mode<synchronous>, transform_indices = @transform_3, window_bounds = array<i64: 2, 128>}, {pipeline_mode = #tpu.pipeline_mode<synchronous>, transform_indices = @transform_4, window_bounds = array<i64: 1, 2>}, {pipeline_mode = #tpu.pipeline_mode<synchronous>, transform_indices = @transform_5, window_bounds = array<i64: 2, 128>}, {pipeline_mode = #tpu.pipeline_mode<synchronous>, transform_indices = @transform_6, window_bounds = array<i64: 1, 128>}, {pipeline_mode = #tpu.pipeline_mode<synchronous>, transform_indices = @transform_7, window_bounds = array<i64: 128, 4>}, {pipeline_mode = #tpu.pipeline_mode<synchronous>, transform_indices = @transform_8, window_bounds = array<i64: 1, 4>}, {pipeline_mode = #tpu.pipeline_mode<synchronous>, transform_indices = @transform_9, window_bounds = array<i64: 28, 4>}, {pipeline_mode = #tpu.pipeline_mode<synchronous>, transform_indices = @transform_10, window_bounds = array<i64: 32, 4>}, {pipeline_mode = #tpu.pipeline_mode<synchronous>, transform_indices = @transform_11, window_bounds = array<i64: 28, 16>}]} {
    %c0 = arith.constant 0 : index
    %c0_0 = arith.constant 0 : index
    %0 = vector.load %arg4[%c0, %c0_0] : memref<2x128xf32, #tpu.memory_space<vmem>>, vector<1x128xf32>
    %c1 = arith.constant 1 : index
    %c0_1 = arith.constant 0 : index
    %1 = vector.load %arg4[%c1, %c0_1] : memref<2x128xf32, #tpu.memory_space<vmem>>, vector<1x128xf32>
    %c0_2 = arith.constant 0 : index
    %c0_3 = arith.constant 0 : index
    %2 = vector.load %arg5[%c0_2, %c0_3] : memref<1x2xf32, #tpu.memory_space<vmem>>, vector<1x1xf32>
    %c0_4 = arith.constant 0 : index
    %c1_5 = arith.constant 1 : index
    %3 = vector.load %arg5[%c0_4, %c1_5] : memref<1x2xf32, #tpu.memory_space<vmem>>, vector<1x1xf32>
    %c0_6 = arith.constant 0 : index
    %c0_7 = arith.constant 0 : index
    %4 = vector.load %arg6[%c0_6, %c0_7] : memref<2x128xf32, #tpu.memory_space<vmem>>, vector<1x128xf32>
    %c1_8 = arith.constant 1 : index
    %c0_9 = arith.constant 0 : index
    %5 = vector.load %arg6[%c1_8, %c0_9] : memref<2x128xf32, #tpu.memory_space<vmem>>, vector<1x128xf32>
    %c0_10 = arith.constant 0 : index
    %c0_11 = arith.constant 0 : index
    %6 = vector.load %arg7[%c0_10, %c0_11] : memref<1x128xf32, #tpu.memory_space<vmem>>, vector<1x128xf32>
    %c0_12 = arith.constant 0 : index
    %c0_13 = arith.constant 0 : index
    %c0_14 = arith.constant 0 : index
    %7 = vector.load %arg1[%c0_12, %c0_13, %c0_14] : memref<7x4x16xf32, #tpu.memory_space<vmem>>, vector<7x4x16xf32>
    %8 = vector.extract_strided_slice %7 {offsets = [0, 0, 4], sizes = [7, 4, 4], strides = [1, 1, 1]} : vector<7x4x16xf32> to vector<7x4x4xf32>
    %9 = vector.extract_strided_slice %8 {offsets = [0, 0, 0], sizes = [7, 4, 1], strides = [1, 1, 1]} : vector<7x4x4xf32> to vector<7x4x1xf32>
    %10 = vector.shape_cast %9 : vector<7x4x1xf32> to vector<7x4x1xf32>
    %11 = vector.broadcast %10 : vector<7x4x1xf32> to vector<7x4x32xf32>
    %12 = vector.extract_strided_slice %8 {offsets = [0, 0, 1], sizes = [7, 4, 1], strides = [1, 1, 1]} : vector<7x4x4xf32> to vector<7x4x1xf32>
    %13 = vector.shape_cast %12 : vector<7x4x1xf32> to vector<7x4x1xf32>
    %14 = vector.broadcast %13 : vector<7x4x1xf32> to vector<7x4x32xf32>
    %15 = vector.extract_strided_slice %8 {offsets = [0, 0, 2], sizes = [7, 4, 1], strides = [1, 1, 1]} : vector<7x4x4xf32> to vector<7x4x1xf32>
    %16 = vector.shape_cast %15 : vector<7x4x1xf32> to vector<7x4x1xf32>
    %17 = vector.broadcast %16 : vector<7x4x1xf32> to vector<7x4x32xf32>
    %18 = vector.extract_strided_slice %8 {offsets = [0, 0, 3], sizes = [7, 4, 1], strides = [1, 1, 1]} : vector<7x4x4xf32> to vector<7x4x1xf32>
    %19 = vector.shape_cast %18 : vector<7x4x1xf32> to vector<7x4x1xf32>
    %20 = vector.broadcast %19 : vector<7x4x1xf32> to vector<7x4x32xf32>
    %21 = tpu.concatenate %11, %14, %17, %20 in 2 : vector<7x4x32xf32>, vector<7x4x32xf32>, vector<7x4x32xf32>, vector<7x4x32xf32> -> vector<7x4x128xf32>
    %22 = vector.extract_strided_slice %7 {offsets = [0, 0, 8], sizes = [7, 4, 4], strides = [1, 1, 1]} : vector<7x4x16xf32> to vector<7x4x4xf32>
    %23 = vector.extract_strided_slice %22 {offsets = [0, 0, 0], sizes = [7, 4, 1], strides = [1, 1, 1]} : vector<7x4x4xf32> to vector<7x4x1xf32>
    %24 = vector.shape_cast %23 : vector<7x4x1xf32> to vector<7x4x1xf32>
    %25 = vector.broadcast %24 : vector<7x4x1xf32> to vector<7x4x32xf32>
    %26 = vector.extract_strided_slice %22 {offsets = [0, 0, 1], sizes = [7, 4, 1], strides = [1, 1, 1]} : vector<7x4x4xf32> to vector<7x4x1xf32>
    %27 = vector.shape_cast %26 : vector<7x4x1xf32> to vector<7x4x1xf32>
    %28 = vector.broadcast %27 : vector<7x4x1xf32> to vector<7x4x32xf32>
    %29 = vector.extract_strided_slice %22 {offsets = [0, 0, 2], sizes = [7, 4, 1], strides = [1, 1, 1]} : vector<7x4x4xf32> to vector<7x4x1xf32>
    %30 = vector.shape_cast %29 : vector<7x4x1xf32> to vector<7x4x1xf32>
    %31 = vector.broadcast %30 : vector<7x4x1xf32> to vector<7x4x32xf32>
    %32 = vector.extract_strided_slice %22 {offsets = [0, 0, 3], sizes = [7, 4, 1], strides = [1, 1, 1]} : vector<7x4x4xf32> to vector<7x4x1xf32>
    %33 = vector.shape_cast %32 : vector<7x4x1xf32> to vector<7x4x1xf32>
    %34 = vector.broadcast %33 : vector<7x4x1xf32> to vector<7x4x32xf32>
    %35 = tpu.concatenate %25, %28, %31, %34 in 2 : vector<7x4x32xf32>, vector<7x4x32xf32>, vector<7x4x32xf32>, vector<7x4x32xf32> -> vector<7x4x128xf32>
    %36 = vector.extract_strided_slice %7 {offsets = [0, 0, 12], sizes = [7, 4, 4], strides = [1, 1, 1]} : vector<7x4x16xf32> to vector<7x4x4xf32>
    %37 = vector.extract_strided_slice %36 {offsets = [0, 0, 0], sizes = [7, 4, 1], strides = [1, 1, 1]} : vector<7x4x4xf32> to vector<7x4x1xf32>
    %38 = vector.shape_cast %37 : vector<7x4x1xf32> to vector<7x4x1xf32>
    %39 = vector.broadcast %38 : vector<7x4x1xf32> to vector<7x4x32xf32>
    %40 = vector.extract_strided_slice %36 {offsets = [0, 0, 1], sizes = [7, 4, 1], strides = [1, 1, 1]} : vector<7x4x4xf32> to vector<7x4x1xf32>
    %41 = vector.shape_cast %40 : vector<7x4x1xf32> to vector<7x4x1xf32>
    %42 = vector.broadcast %41 : vector<7x4x1xf32> to vector<7x4x32xf32>
    %43 = vector.extract_strided_slice %36 {offsets = [0, 0, 2], sizes = [7, 4, 1], strides = [1, 1, 1]} : vector<7x4x4xf32> to vector<7x4x1xf32>
    %44 = vector.shape_cast %43 : vector<7x4x1xf32> to vector<7x4x1xf32>
    %45 = vector.broadcast %44 : vector<7x4x1xf32> to vector<7x4x32xf32>
    %46 = vector.extract_strided_slice %36 {offsets = [0, 0, 3], sizes = [7, 4, 1], strides = [1, 1, 1]} : vector<7x4x4xf32> to vector<7x4x1xf32>
    %47 = vector.shape_cast %46 : vector<7x4x1xf32> to vector<7x4x1xf32>
    %48 = vector.broadcast %47 : vector<7x4x1xf32> to vector<7x4x32xf32>
    %49 = tpu.concatenate %39, %42, %45, %48 in 2 : vector<7x4x32xf32>, vector<7x4x32xf32>, vector<7x4x32xf32>, vector<7x4x32xf32> -> vector<7x4x128xf32>
    %50 = vector.extract_strided_slice %21 {offsets = [0, 0, 0], sizes = [1, 4, 128], strides = [1, 1, 1]} : vector<7x4x128xf32> to vector<1x4x128xf32>
    %51 = vector.shape_cast %50 : vector<1x4x128xf32> to vector<4x128xf32>
    %52 = vector.extract_strided_slice %35 {offsets = [0, 0, 0], sizes = [1, 4, 128], strides = [1, 1, 1]} : vector<7x4x128xf32> to vector<1x4x128xf32>
    %53 = vector.shape_cast %52 : vector<1x4x128xf32> to vector<4x128xf32>
    %54 = vector.extract_strided_slice %49 {offsets = [0, 0, 0], sizes = [1, 4, 128], strides = [1, 1, 1]} : vector<7x4x128xf32> to vector<1x4x128xf32>
    %55 = vector.shape_cast %54 : vector<1x4x128xf32> to vector<4x128xf32>
    %c0_15 = arith.constant 0 : index
    %c0_16 = arith.constant 0 : index
    %56 = vector.load %arg13[%c0_15, %c0_16] : memref<112x128xf32, #tpu.memory_space<vmem>>, vector<4x128xf32>
    tpu.vector_store %arg13[%c0_15, %c0_16], %51 {strides = array<i32>} : memref<112x128xf32, #tpu.memory_space<vmem>>, vector<4x128xf32>,
    %cst = arith.constant 0.333333343 : f32
    %57 = vector.broadcast %cst : f32 to vector<4x128xf32>
    %58 = arith.mulf %55, %57 : vector<4x128xf32>
    %59 = arith.addf %53, %58 : vector<4x128xf32>
    %cst_17 = arith.constant 0.333333343 : f32
    %60 = vector.broadcast %cst_17 : f32 to vector<4x128xf32>
    %61 = arith.mulf %59, %60 : vector<4x128xf32>
    %62 = arith.addf %51, %61 : vector<4x128xf32>
    %c4 = arith.constant 4 : index
    %c0_18 = arith.constant 0 : index
    %63 = vector.load %arg13[%c4, %c0_18] : memref<112x128xf32, #tpu.memory_space<vmem>>, vector<4x128xf32>
    tpu.vector_store %arg13[%c4, %c0_18], %62 {strides = array<i32>} : memref<112x128xf32, #tpu.memory_space<vmem>>, vector<4x128xf32>,
    %cst_19 = arith.constant 0.666666686 : f32
    %64 = vector.broadcast %cst_19 : f32 to vector<4x128xf32>
    %65 = arith.mulf %55, %64 : vector<4x128xf32>
    %66 = arith.addf %53, %65 : vector<4x128xf32>
    %cst_20 = arith.constant 0.666666686 : f32
    %67 = vector.broadcast %cst_20 : f32 to vector<4x128xf32>
    %68 = arith.mulf %66, %67 : vector<4x128xf32>
    %69 = arith.addf %51, %68 : vector<4x128xf32>
    %c8 = arith.constant 8 : index
    %c0_21 = arith.constant 0 : index
    %70 = vector.load %arg13[%c8, %c0_21] : memref<112x128xf32, #tpu.memory_space<vmem>>, vector<4x128xf32>
    tpu.vector_store %arg13[%c8, %c0_21], %69 {strides = array<i32>} : memref<112x128xf32, #tpu.memory_space<vmem>>, vector<4x128xf32>,
    %cst_22 = arith.constant 1.000000e+00 : f32
    %71 = vector.broadcast %cst_22 : f32 to vector<4x128xf32>
    %72 = arith.mulf %55, %71 : vector<4x128xf32>
    %73 = arith.addf %53, %72 : vector<4x128xf32>
    %cst_23 = arith.constant 1.000000e+00 : f32
    %74 = vector.broadcast %cst_23 : f32 to vector<4x128xf32>
    %75 = arith.mulf %73, %74 : vector<4x128xf32>
    %76 = arith.addf %51, %75 : vector<4x128xf32>
    %c12 = arith.constant 12 : index
    %c0_24 = arith.constant 0 : index
    %77 = vector.load %arg13[%c12, %c0_24] : memref<112x128xf32, #tpu.memory_space<vmem>>, vector<4x128xf32>
    tpu.vector_store %arg13[%c12, %c0_24], %76 {strides = array<i32>} : memref<112x128xf32, #tpu.memory_space<vmem>>, vector<4x128xf32>,
    %78 = vector.extract_strided_slice %21 {offsets = [1, 0, 0], sizes = [1, 4, 128], strides = [1, 1, 1]} : vector<7x4x128xf32> to vector<1x4x128xf32>
    %79 = vector.shape_cast %78 : vector<1x4x128xf32> to vector<4x128xf32>
    %80 = vector.extract_strided_slice %35 {offsets = [1, 0, 0], sizes = [1, 4, 128], strides = [1, 1, 1]} : vector<7x4x128xf32> to vector<1x4x128xf32>
    %81 = vector.shape_cast %80 : vector<1x4x128xf32> to vector<4x128xf32>
    %82 = vector.extract_strided_slice %49 {offsets = [1, 0, 0], sizes = [1, 4, 128], strides = [1, 1, 1]} : vector<7x4x128xf32> to vector<1x4x128xf32>
    %83 = vector.shape_cast %82 : vector<1x4x128xf32> to vector<4x128xf32>
    %c16 = arith.constant 16 : index
    %c0_25 = arith.constant 0 : index
    %84 = vector.load %arg13[%c16, %c0_25] : memref<112x128xf32, #tpu.memory_space<vmem>>, vector<4x128xf32>
    tpu.vector_store %arg13[%c16, %c0_25], %79 {strides = array<i32>} : memref<112x128xf32, #tpu.memory_space<vmem>>, vector<4x128xf32>,
    %cst_26 = arith.constant 0.333333343 : f32
    %85 = vector.broadcast %cst_26 : f32 to vector<4x128xf32>
    %86 = arith.mulf %83, %85 : vector<4x128xf32>
    %87 = arith.addf %81, %86 : vector<4x128xf32>
    %cst_27 = arith.constant 0.333333343 : f32
    %88 = vector.broadcast %cst_27 : f32 to vector<4x128xf32>
    %89 = arith.mulf %87, %88 : vector<4x128xf32>
    %90 = arith.addf %79, %89 : vector<4x128xf32>
    %c20 = arith.constant 20 : index
    %c0_28 = arith.constant 0 : index
    %91 = vector.load %arg13[%c20, %c0_28] : memref<112x128xf32, #tpu.memory_space<vmem>>, vector<4x128xf32>
    tpu.vector_store %arg13[%c20, %c0_28], %90 {strides = array<i32>} : memref<112x128xf32, #tpu.memory_space<vmem>>, vector<4x128xf32>,
    %cst_29 = arith.constant 0.666666686 : f32
    %92 = vector.broadcast %cst_29 : f32 to vector<4x128xf32>
    %93 = arith.mulf %83, %92 : vector<4x128xf32>
    %94 = arith.addf %81, %93 : vector<4x128xf32>
    %cst_30 = arith.constant 0.666666686 : f32
    %95 = vector.broadcast %cst_30 : f32 to vector<4x128xf32>
    %96 = arith.mulf %94, %95 : vector<4x128xf32>
    %97 = arith.addf %79, %96 : vector<4x128xf32>
    %c24 = arith.constant 24 : index
    %c0_31 = arith.constant 0 : index
    %98 = vector.load %arg13[%c24, %c0_31] : memref<112x128xf32, #tpu.memory_space<vmem>>, vector<4x128xf32>
    tpu.vector_store %arg13[%c24, %c0_31], %97 {strides = array<i32>} : memref<112x128xf32, #tpu.memory_space<vmem>>, vector<4x128xf32>,
    %cst_32 = arith.constant 1.000000e+00 : f32
    %99 = vector.broadcast %cst_32 : f32 to vector<4x128xf32>
    %100 = arith.mulf %83, %99 : vector<4x128xf32>
    %101 = arith.addf %81, %100 : vector<4x128xf32>
    %cst_33 = arith.constant 1.000000e+00 : f32
    %102 = vector.broadcast %cst_33 : f32 to vector<4x128xf32>
    %103 = arith.mulf %101, %102 : vector<4x128xf32>
    %104 = arith.addf %79, %103 : vector<4x128xf32>
    %c28 = arith.constant 28 : index
    %c0_34 = arith.constant 0 : index
    %105 = vector.load %arg13[%c28, %c0_34] : memref<112x128xf32, #tpu.memory_space<vmem>>, vector<4x128xf32>
    tpu.vector_store %arg13[%c28, %c0_34], %104 {strides = array<i32>} : memref<112x128xf32, #tpu.memory_space<vmem>>, vector<4x128xf32>,
    %106 = vector.extract_strided_slice %21 {offsets = [2, 0, 0], sizes = [1, 4, 128], strides = [1, 1, 1]} : vector<7x4x128xf32> to vector<1x4x128xf32>
    %107 = vector.shape_cast %106 : vector<1x4x128xf32> to vector<4x128xf32>
    %108 = vector.extract_strided_slice %35 {offsets = [2, 0, 0], sizes = [1, 4, 128], strides = [1, 1, 1]} : vector<7x4x128xf32> to vector<1x4x128xf32>
    %109 = vector.shape_cast %108 : vector<1x4x128xf32> to vector<4x128xf32>
    %110 = vector.extract_strided_slice %49 {offsets = [2, 0, 0], sizes = [1, 4, 128], strides = [1, 1, 1]} : vector<7x4x128xf32> to vector<1x4x128xf32>
    %111 = vector.shape_cast %110 : vector<1x4x128xf32> to vector<4x128xf32>
    %c32 = arith.constant 32 : index
    %c0_35 = arith.constant 0 : index
    %112 = vector.load %arg13[%c32, %c0_35] : memref<112x128xf32, #tpu.memory_space<vmem>>, vector<4x128xf32>
    tpu.vector_store %arg13[%c32, %c0_35], %107 {strides = array<i32>} : memref<112x128xf32, #tpu.memory_space<vmem>>, vector<4x128xf32>,
    %cst_36 = arith.constant 0.333333343 : f32
    %113 = vector.broadcast %cst_36 : f32 to vector<4x128xf32>
    %114 = arith.mulf %111, %113 : vector<4x128xf32>
    %115 = arith.addf %109, %114 : vector<4x128xf32>
    %cst_37 = arith.constant 0.333333343 : f32
    %116 = vector.broadcast %cst_37 : f32 to vector<4x128xf32>
    %117 = arith.mulf %115, %116 : vector<4x128xf32>
    %118 = arith.addf %107, %117 : vector<4x128xf32>
    %c36 = arith.constant 36 : index
    %c0_38 = arith.constant 0 : index
    %119 = vector.load %arg13[%c36, %c0_38] : memref<112x128xf32, #tpu.memory_space<vmem>>, vector<4x128xf32>
    tpu.vector_store %arg13[%c36, %c0_38], %118 {strides = array<i32>} : memref<112x128xf32, #tpu.memory_space<vmem>>, vector<4x128xf32>,
    %cst_39 = arith.constant 0.666666686 : f32
    %120 = vector.broadcast %cst_39 : f32 to vector<4x128xf32>
    %121 = arith.mulf %111, %120 : vector<4x128xf32>
    %122 = arith.addf %109, %121 : vector<4x128xf32>
    %cst_40 = arith.constant 0.666666686 : f32
    %123 = vector.broadcast %cst_40 : f32 to vector<4x128xf32>
    %124 = arith.mulf %122, %123 : vector<4x128xf32>
    %125 = arith.addf %107, %124 : vector<4x128xf32>
    %c40 = arith.constant 40 : index
    %c0_41 = arith.constant 0 : index
    %126 = vector.load %arg13[%c40, %c0_41] : memref<112x128xf32, #tpu.memory_space<vmem>>, vector<4x128xf32>
    tpu.vector_store %arg13[%c40, %c0_41], %125 {strides = array<i32>} : memref<112x128xf32, #tpu.memory_space<vmem>>, vector<4x128xf32>,
    %cst_42 = arith.constant 1.000000e+00 : f32
    %127 = vector.broadcast %cst_42 : f32 to vector<4x128xf32>
    %128 = arith.mulf %111, %127 : vector<4x128xf32>
    %129 = arith.addf %109, %128 : vector<4x128xf32>
    %cst_43 = arith.constant 1.000000e+00 : f32
    %130 = vector.broadcast %cst_43 : f32 to vector<4x128xf32>
    %131 = arith.mulf %129, %130 : vector<4x128xf32>
    %132 = arith.addf %107, %131 : vector<4x128xf32>
    %c44 = arith.constant 44 : index
    %c0_44 = arith.constant 0 : index
    %133 = vector.load %arg13[%c44, %c0_44] : memref<112x128xf32, #tpu.memory_space<vmem>>, vector<4x128xf32>
    tpu.vector_store %arg13[%c44, %c0_44], %132 {strides = array<i32>} : memref<112x128xf32, #tpu.memory_space<vmem>>, vector<4x128xf32>,
    %134 = vector.extract_strided_slice %21 {offsets = [3, 0, 0], sizes = [1, 4, 128], strides = [1, 1, 1]} : vector<7x4x128xf32> to vector<1x4x128xf32>
    %135 = vector.shape_cast %134 : vector<1x4x128xf32> to vector<4x128xf32>
    %136 = vector.extract_strided_slice %35 {offsets = [3, 0, 0], sizes = [1, 4, 128], strides = [1, 1, 1]} : vector<7x4x128xf32> to vector<1x4x128xf32>
    %137 = vector.shape_cast %136 : vector<1x4x128xf32> to vector<4x128xf32>
    %138 = vector.extract_strided_slice %49 {offsets = [3, 0, 0], sizes = [1, 4, 128], strides = [1, 1, 1]} : vector<7x4x128xf32> to vector<1x4x128xf32>
    %139 = vector.shape_cast %138 : vector<1x4x128xf32> to vector<4x128xf32>
    %c48 = arith.constant 48 : index
    %c0_45 = arith.constant 0 : index
    %140 = vector.load %arg13[%c48, %c0_45] : memref<112x128xf32, #tpu.memory_space<vmem>>, vector<4x128xf32>
    tpu.vector_store %arg13[%c48, %c0_45], %135 {strides = array<i32>} : memref<112x128xf32, #tpu.memory_space<vmem>>, vector<4x128xf32>,
    %cst_46 = arith.constant 0.333333343 : f32
    %141 = vector.broadcast %cst_46 : f32 to vector<4x128xf32>
    %142 = arith.mulf %139, %141 : vector<4x128xf32>
    %143 = arith.addf %137, %142 : vector<4x128xf32>
    %cst_47 = arith.constant 0.333333343 : f32
    %144 = vector.broadcast %cst_47 : f32 to vector<4x128xf32>
    %145 = arith.mulf %143, %144 : vector<4x128xf32>
    %146 = arith.addf %135, %145 : vector<4x128xf32>
    %c52 = arith.constant 52 : index
    %c0_48 = arith.constant 0 : index
    %147 = vector.load %arg13[%c52, %c0_48] : memref<112x128xf32, #tpu.memory_space<vmem>>, vector<4x128xf32>
    tpu.vector_store %arg13[%c52, %c0_48], %146 {strides = array<i32>} : memref<112x128xf32, #tpu.memory_space<vmem>>, vector<4x128xf32>,
    %cst_49 = arith.constant 0.666666686 : f32
    %148 = vector.broadcast %cst_49 : f32 to vector<4x128xf32>
    %149 = arith.mulf %139, %148 : vector<4x128xf32>
    %150 = arith.addf %137, %149 : vector<4x128xf32>
    %cst_50 = arith.constant 0.666666686 : f32
    %151 = vector.broadcast %cst_50 : f32 to vector<4x128xf32>
    %152 = arith.mulf %150, %151 : vector<4x128xf32>
    %153 = arith.addf %135, %152 : vector<4x128xf32>
    %c56 = arith.constant 56 : index
    %c0_51 = arith.constant 0 : index
    %154 = vector.load %arg13[%c56, %c0_51] : memref<112x128xf32, #tpu.memory_space<vmem>>, vector<4x128xf32>
    tpu.vector_store %arg13[%c56, %c0_51], %153 {strides = array<i32>} : memref<112x128xf32, #tpu.memory_space<vmem>>, vector<4x128xf32>,
    %cst_52 = arith.constant 1.000000e+00 : f32
    %155 = vector.broadcast %cst_52 : f32 to vector<4x128xf32>
    %156 = arith.mulf %139, %155 : vector<4x128xf32>
    %157 = arith.addf %137, %156 : vector<4x128xf32>
    %cst_53 = arith.constant 1.000000e+00 : f32
    %158 = vector.broadcast %cst_53 : f32 to vector<4x128xf32>
    %159 = arith.mulf %157, %158 : vector<4x128xf32>
    %160 = arith.addf %135, %159 : vector<4x128xf32>
    %c60 = arith.constant 60 : index
    %c0_54 = arith.constant 0 : index
    %161 = vector.load %arg13[%c60, %c0_54] : memref<112x128xf32, #tpu.memory_space<vmem>>, vector<4x128xf32>
    tpu.vector_store %arg13[%c60, %c0_54], %160 {strides = array<i32>} : memref<112x128xf32, #tpu.memory_space<vmem>>, vector<4x128xf32>,
    %162 = vector.extract_strided_slice %21 {offsets = [4, 0, 0], sizes = [1, 4, 128], strides = [1, 1, 1]} : vector<7x4x128xf32> to vector<1x4x128xf32>
    %163 = vector.shape_cast %162 : vector<1x4x128xf32> to vector<4x128xf32>
    %164 = vector.extract_strided_slice %35 {offsets = [4, 0, 0], sizes = [1, 4, 128], strides = [1, 1, 1]} : vector<7x4x128xf32> to vector<1x4x128xf32>
    %165 = vector.shape_cast %164 : vector<1x4x128xf32> to vector<4x128xf32>
    %166 = vector.extract_strided_slice %49 {offsets = [4, 0, 0], sizes = [1, 4, 128], strides = [1, 1, 1]} : vector<7x4x128xf32> to vector<1x4x128xf32>
    %167 = vector.shape_cast %166 : vector<1x4x128xf32> to vector<4x128xf32>
    %c64 = arith.constant 64 : index
    %c0_55 = arith.constant 0 : index
    %168 = vector.load %arg13[%c64, %c0_55] : memref<112x128xf32, #tpu.memory_space<vmem>>, vector<4x128xf32>
    tpu.vector_store %arg13[%c64, %c0_55], %163 {strides = array<i32>} : memref<112x128xf32, #tpu.memory_space<vmem>>, vector<4x128xf32>,
    %cst_56 = arith.constant 0.333333343 : f32
    %169 = vector.broadcast %cst_56 : f32 to vector<4x128xf32>
    %170 = arith.mulf %167, %169 : vector<4x128xf32>
    %171 = arith.addf %165, %170 : vector<4x128xf32>
    %cst_57 = arith.constant 0.333333343 : f32
    %172 = vector.broadcast %cst_57 : f32 to vector<4x128xf32>
    %173 = arith.mulf %171, %172 : vector<4x128xf32>
    %174 = arith.addf %163, %173 : vector<4x128xf32>
    %c68 = arith.constant 68 : index
    %c0_58 = arith.constant 0 : index
    %175 = vector.load %arg13[%c68, %c0_58] : memref<112x128xf32, #tpu.memory_space<vmem>>, vector<4x128xf32>
    tpu.vector_store %arg13[%c68, %c0_58], %174 {strides = array<i32>} : memref<112x128xf32, #tpu.memory_space<vmem>>, vector<4x128xf32>,
    %cst_59 = arith.constant 0.666666686 : f32
    %176 = vector.broadcast %cst_59 : f32 to vector<4x128xf32>
    %177 = arith.mulf %167, %176 : vector<4x128xf32>
    %178 = arith.addf %165, %177 : vector<4x128xf32>
    %cst_60 = arith.constant 0.666666686 : f32
    %179 = vector.broadcast %cst_60 : f32 to vector<4x128xf32>
    %180 = arith.mulf %178, %179 : vector<4x128xf32>
    %181 = arith.addf %163, %180 : vector<4x128xf32>
    %c72 = arith.constant 72 : index
    %c0_61 = arith.constant 0 : index
    %182 = vector.load %arg13[%c72, %c0_61] : memref<112x128xf32, #tpu.memory_space<vmem>>, vector<4x128xf32>
    tpu.vector_store %arg13[%c72, %c0_61], %181 {strides = array<i32>} : memref<112x128xf32, #tpu.memory_space<vmem>>, vector<4x128xf32>,
    %cst_62 = arith.constant 1.000000e+00 : f32
    %183 = vector.broadcast %cst_62 : f32 to vector<4x128xf32>
    %184 = arith.mulf %167, %183 : vector<4x128xf32>
    %185 = arith.addf %165, %184 : vector<4x128xf32>
    %cst_63 = arith.constant 1.000000e+00 : f32
    %186 = vector.broadcast %cst_63 : f32 to vector<4x128xf32>
    %187 = arith.mulf %185, %186 : vector<4x128xf32>
    %188 = arith.addf %163, %187 : vector<4x128xf32>
    %c76 = arith.constant 76 : index
    %c0_64 = arith.constant 0 : index
    %189 = vector.load %arg13[%c76, %c0_64] : memref<112x128xf32, #tpu.memory_space<vmem>>, vector<4x128xf32>
    tpu.vector_store %arg13[%c76, %c0_64], %188 {strides = array<i32>} : memref<112x128xf32, #tpu.memory_space<vmem>>, vector<4x128xf32>,
    %190 = vector.extract_strided_slice %21 {offsets = [5, 0, 0], sizes = [1, 4, 128], strides = [1, 1, 1]} : vector<7x4x128xf32> to vector<1x4x128xf32>
    %191 = vector.shape_cast %190 : vector<1x4x128xf32> to vector<4x128xf32>
    %192 = vector.extract_strided_slice %35 {offsets = [5, 0, 0], sizes = [1, 4, 128], strides = [1, 1, 1]} : vector<7x4x128xf32> to vector<1x4x128xf32>
    %193 = vector.shape_cast %192 : vector<1x4x128xf32> to vector<4x128xf32>
    %194 = vector.extract_strided_slice %49 {offsets = [5, 0, 0], sizes = [1, 4, 128], strides = [1, 1, 1]} : vector<7x4x128xf32> to vector<1x4x128xf32>
    %195 = vector.shape_cast %194 : vector<1x4x128xf32> to vector<4x128xf32>
    %c80 = arith.constant 80 : index
    %c0_65 = arith.constant 0 : index
    %196 = vector.load %arg13[%c80, %c0_65] : memref<112x128xf32, #tpu.memory_space<vmem>>, vector<4x128xf32>
    tpu.vector_store %arg13[%c80, %c0_65], %191 {strides = array<i32>} : memref<112x128xf32, #tpu.memory_space<vmem>>, vector<4x128xf32>,
    %cst_66 = arith.constant 0.333333343 : f32
    %197 = vector.broadcast %cst_66 : f32 to vector<4x128xf32>
    %198 = arith.mulf %195, %197 : vector<4x128xf32>
    %199 = arith.addf %193, %198 : vector<4x128xf32>
    %cst_67 = arith.constant 0.333333343 : f32
    %200 = vector.broadcast %cst_67 : f32 to vector<4x128xf32>
    %201 = arith.mulf %199, %200 : vector<4x128xf32>
    %202 = arith.addf %191, %201 : vector<4x128xf32>
    %c84 = arith.constant 84 : index
    %c0_68 = arith.constant 0 : index
    %203 = vector.load %arg13[%c84, %c0_68] : memref<112x128xf32, #tpu.memory_space<vmem>>, vector<4x128xf32>
    tpu.vector_store %arg13[%c84, %c0_68], %202 {strides = array<i32>} : memref<112x128xf32, #tpu.memory_space<vmem>>, vector<4x128xf32>,
    %cst_69 = arith.constant 0.666666686 : f32
    %204 = vector.broadcast %cst_69 : f32 to vector<4x128xf32>
    %205 = arith.mulf %195, %204 : vector<4x128xf32>
    %206 = arith.addf %193, %205 : vector<4x128xf32>
    %cst_70 = arith.constant 0.666666686 : f32
    %207 = vector.broadcast %cst_70 : f32 to vector<4x128xf32>
    %208 = arith.mulf %206, %207 : vector<4x128xf32>
    %209 = arith.addf %191, %208 : vector<4x128xf32>
    %c88 = arith.constant 88 : index
    %c0_71 = arith.constant 0 : index
    %210 = vector.load %arg13[%c88, %c0_71] : memref<112x128xf32, #tpu.memory_space<vmem>>, vector<4x128xf32>
    tpu.vector_store %arg13[%c88, %c0_71], %209 {strides = array<i32>} : memref<112x128xf32, #tpu.memory_space<vmem>>, vector<4x128xf32>,
    %cst_72 = arith.constant 1.000000e+00 : f32
    %211 = vector.broadcast %cst_72 : f32 to vector<4x128xf32>
    %212 = arith.mulf %195, %211 : vector<4x128xf32>
    %213 = arith.addf %193, %212 : vector<4x128xf32>
    %cst_73 = arith.constant 1.000000e+00 : f32
    %214 = vector.broadcast %cst_73 : f32 to vector<4x128xf32>
    %215 = arith.mulf %213, %214 : vector<4x128xf32>
    %216 = arith.addf %191, %215 : vector<4x128xf32>
    %c92 = arith.constant 92 : index
    %c0_74 = arith.constant 0 : index
    %217 = vector.load %arg13[%c92, %c0_74] : memref<112x128xf32, #tpu.memory_space<vmem>>, vector<4x128xf32>
    tpu.vector_store %arg13[%c92, %c0_74], %216 {strides = array<i32>} : memref<112x128xf32, #tpu.memory_space<vmem>>, vector<4x128xf32>,
    %218 = vector.extract_strided_slice %21 {offsets = [6, 0, 0], sizes = [1, 4, 128], strides = [1, 1, 1]} : vector<7x4x128xf32> to vector<1x4x128xf32>
    %219 = vector.shape_cast %218 : vector<1x4x128xf32> to vector<4x128xf32>
    %220 = vector.extract_strided_slice %35 {offsets = [6, 0, 0], sizes = [1, 4, 128], strides = [1, 1, 1]} : vector<7x4x128xf32> to vector<1x4x128xf32>
    %221 = vector.shape_cast %220 : vector<1x4x128xf32> to vector<4x128xf32>
    %222 = vector.extract_strided_slice %49 {offsets = [6, 0, 0], sizes = [1, 4, 128], strides = [1, 1, 1]} : vector<7x4x128xf32> to vector<1x4x128xf32>
    %223 = vector.shape_cast %222 : vector<1x4x128xf32> to vector<4x128xf32>
    %c96 = arith.constant 96 : index
    %c0_75 = arith.constant 0 : index
    %224 = vector.load %arg13[%c96, %c0_75] : memref<112x128xf32, #tpu.memory_space<vmem>>, vector<4x128xf32>
    tpu.vector_store %arg13[%c96, %c0_75], %219 {strides = array<i32>} : memref<112x128xf32, #tpu.memory_space<vmem>>, vector<4x128xf32>,
    %cst_76 = arith.constant 0.333333343 : f32
    %225 = vector.broadcast %cst_76 : f32 to vector<4x128xf32>
    %226 = arith.mulf %223, %225 : vector<4x128xf32>
    %227 = arith.addf %221, %226 : vector<4x128xf32>
    %cst_77 = arith.constant 0.333333343 : f32
    %228 = vector.broadcast %cst_77 : f32 to vector<4x128xf32>
    %229 = arith.mulf %227, %228 : vector<4x128xf32>
    %230 = arith.addf %219, %229 : vector<4x128xf32>
    %c100 = arith.constant 100 : index
    %c0_78 = arith.constant 0 : index
    %231 = vector.load %arg13[%c100, %c0_78] : memref<112x128xf32, #tpu.memory_space<vmem>>, vector<4x128xf32>
    tpu.vector_store %arg13[%c100, %c0_78], %230 {strides = array<i32>} : memref<112x128xf32, #tpu.memory_space<vmem>>, vector<4x128xf32>,
    %cst_79 = arith.constant 0.666666686 : f32
    %232 = vector.broadcast %cst_79 : f32 to vector<4x128xf32>
    %233 = arith.mulf %223, %232 : vector<4x128xf32>
    %234 = arith.addf %221, %233 : vector<4x128xf32>
    %cst_80 = arith.constant 0.666666686 : f32
    %235 = vector.broadcast %cst_80 : f32 to vector<4x128xf32>
    %236 = arith.mulf %234, %235 : vector<4x128xf32>
    %237 = arith.addf %219, %236 : vector<4x128xf32>
    %c104 = arith.constant 104 : index
    %c0_81 = arith.constant 0 : index
    %238 = vector.load %arg13[%c104, %c0_81] : memref<112x128xf32, #tpu.memory_space<vmem>>, vector<4x128xf32>
    tpu.vector_store %arg13[%c104, %c0_81], %237 {strides = array<i32>} : memref<112x128xf32, #tpu.memory_space<vmem>>, vector<4x128xf32>,
    %cst_82 = arith.constant 1.000000e+00 : f32
    %239 = vector.broadcast %cst_82 : f32 to vector<4x128xf32>
    %240 = arith.mulf %223, %239 : vector<4x128xf32>
    %241 = arith.addf %221, %240 : vector<4x128xf32>
    %cst_83 = arith.constant 1.000000e+00 : f32
    %242 = vector.broadcast %cst_83 : f32 to vector<4x128xf32>
    %243 = arith.mulf %241, %242 : vector<4x128xf32>
    %244 = arith.addf %219, %243 : vector<4x128xf32>
    %c108 = arith.constant 108 : index
    %c0_84 = arith.constant 0 : index
    %245 = vector.load %arg13[%c108, %c0_84] : memref<112x128xf32, #tpu.memory_space<vmem>>, vector<4x128xf32>
    tpu.vector_store %arg13[%c108, %c0_84], %244 {strides = array<i32>} : memref<112x128xf32, #tpu.memory_space<vmem>>, vector<4x128xf32>,
    %246 = vector.extract_strided_slice %7 {offsets = [0, 0, 0], sizes = [1, 4, 4], strides = [1, 1, 1]} : vector<7x4x16xf32> to vector<1x4x4xf32>
    %247 = vector.shape_cast %246 : vector<1x4x4xf32> to vector<4x4xf32>
    %c0_85 = arith.constant 0 : index
    %c0_86 = arith.constant 0 : index
    %248 = vector.load %arg3[%c0_85, %c0_86] : memref<1x128xf32, #tpu.memory_space<vmem>>, vector<1x128xf32>
    %249 = vector.extract_strided_slice %247 {offsets = [0, 0], sizes = [4, 1], strides = [1, 1]} : vector<4x4xf32> to vector<4x1xf32>
    %c0_87 = arith.constant 0 : index
    %c0_88 = arith.constant 0 : index
    %250 = vector.load %arg2[%c0_87, %c0_88] : memref<4x128xf32, #tpu.memory_space<vmem>>, vector<1x128xf32>
    %251 = vector.broadcast %249 : vector<4x1xf32> to vector<4x128xf32>
    %252 = vector.broadcast %250 : vector<1x128xf32> to vector<4x128xf32>
    %253 = arith.mulf %251, %252 : vector<4x128xf32>
    %254 = vector.broadcast %248 : vector<1x128xf32> to vector<4x128xf32>
    %255 = arith.addf %254, %253 : vector<4x128xf32>
    %256 = vector.extract_strided_slice %247 {offsets = [0, 1], sizes = [4, 1], strides = [1, 1]} : vector<4x4xf32> to vector<4x1xf32>
    %c1_89 = arith.constant 1 : index
    %c0_90 = arith.constant 0 : index
    %257 = vector.load %arg2[%c1_89, %c0_90] : memref<4x128xf32, #tpu.memory_space<vmem>>, vector<1x128xf32>
    %258 = vector.broadcast %256 : vector<4x1xf32> to vector<4x128xf32>
    %259 = vector.broadcast %257 : vector<1x128xf32> to vector<4x128xf32>
    %260 = arith.mulf %258, %259 : vector<4x128xf32>
    %261 = arith.addf %255, %260 : vector<4x128xf32>
    %262 = vector.extract_strided_slice %247 {offsets = [0, 2], sizes = [4, 1], strides = [1, 1]} : vector<4x4xf32> to vector<4x1xf32>
    %c2 = arith.constant 2 : index
    %c0_91 = arith.constant 0 : index
    %263 = vector.load %arg2[%c2, %c0_91] : memref<4x128xf32, #tpu.memory_space<vmem>>, vector<1x128xf32>
    %264 = vector.broadcast %262 : vector<4x1xf32> to vector<4x128xf32>
    %265 = vector.broadcast %263 : vector<1x128xf32> to vector<4x128xf32>
    %266 = arith.mulf %264, %265 : vector<4x128xf32>
    %267 = arith.addf %261, %266 : vector<4x128xf32>
    %268 = vector.extract_strided_slice %247 {offsets = [0, 3], sizes = [4, 1], strides = [1, 1]} : vector<4x4xf32> to vector<4x1xf32>
    %c3 = arith.constant 3 : index
    %c0_92 = arith.constant 0 : index
    %269 = vector.load %arg2[%c3, %c0_92] : memref<4x128xf32, #tpu.memory_space<vmem>>, vector<1x128xf32>
    %270 = vector.broadcast %268 : vector<4x1xf32> to vector<4x128xf32>
    %271 = vector.broadcast %269 : vector<1x128xf32> to vector<4x128xf32>
    %272 = arith.mulf %270, %271 : vector<4x128xf32>
    %273 = arith.addf %267, %272 : vector<4x128xf32>
    %c0_93 = arith.constant 0 : index
    %c0_94 = arith.constant 0 : index
    %274 = vector.load %arg14[%c0_93, %c0_94] : memref<32x128xf32, #tpu.memory_space<vmem>>, vector<4x128xf32>
    tpu.vector_store %arg14[%c0_93, %c0_94], %273 {strides = array<i32>} : memref<32x128xf32, #tpu.memory_space<vmem>>, vector<4x128xf32>,
    %c0_95 = arith.constant 0 : index
    %c0_96 = arith.constant 0 : index
    %275 = vector.load %arg13[%c0_95, %c0_96] : memref<112x128xf32, #tpu.memory_space<vmem>>, vector<4x128xf32>
    %c4_97 = arith.constant 4 : index
    %c0_98 = arith.constant 0 : index
    %276 = vector.load %arg13[%c4_97, %c0_98] : memref<112x128xf32, #tpu.memory_space<vmem>>, vector<4x128xf32>
    %c8_99 = arith.constant 8 : index
    %c0_100 = arith.constant 0 : index
    %277 = vector.load %arg13[%c8_99, %c0_100] : memref<112x128xf32, #tpu.memory_space<vmem>>, vector<4x128xf32>
    %c12_101 = arith.constant 12 : index
    %c0_102 = arith.constant 0 : index
    %278 = vector.load %arg13[%c12_101, %c0_102] : memref<112x128xf32, #tpu.memory_space<vmem>>, vector<4x128xf32>
    %279 = vector.broadcast %0 : vector<1x128xf32> to vector<4x128xf32>
    %280 = arith.mulf %273, %279 : vector<4x128xf32>
    %cst_103 = arith.constant dense<0.000000e+00> : vector<4xf32>
    %281 = vector.multi_reduction <add>, %280, %cst_103 [1] : vector<4x128xf32> to vector<4xf32>
    %282 = vector.shape_cast %281 : vector<4xf32> to vector<4x1xf32>
    %283 = vector.broadcast %2 : vector<1x1xf32> to vector<4x1xf32>
    %284 = arith.addf %282, %283 : vector<4x1xf32>
    %cst_104 = arith.constant 0.000000e+00 : f32
    %285 = vector.broadcast %cst_104 : f32 to vector<4x1xf32>
    %286 = arith.maximumf %284, %285 : vector<4x1xf32>
    %287 = vector.broadcast %1 : vector<1x128xf32> to vector<4x128xf32>
    %288 = arith.mulf %273, %287 : vector<4x128xf32>
    %cst_105 = arith.constant dense<0.000000e+00> : vector<4xf32>
    %289 = vector.multi_reduction <add>, %288, %cst_105 [1] : vector<4x128xf32> to vector<4xf32>
    %290 = vector.shape_cast %289 : vector<4xf32> to vector<4x1xf32>
    %291 = vector.broadcast %3 : vector<1x1xf32> to vector<4x1xf32>
    %292 = arith.addf %290, %291 : vector<4x1xf32>
    %cst_106 = arith.constant 0.000000e+00 : f32
    %293 = vector.broadcast %cst_106 : f32 to vector<4x1xf32>
    %294 = arith.maximumf %292, %293 : vector<4x1xf32>
    %295 = vector.broadcast %286 : vector<4x1xf32> to vector<4x128xf32>
    %296 = vector.broadcast %4 : vector<1x128xf32> to vector<4x128xf32>
    %297 = arith.mulf %295, %296 : vector<4x128xf32>
    %298 = vector.broadcast %294 : vector<4x1xf32> to vector<4x128xf32>
    %299 = vector.broadcast %5 : vector<1x128xf32> to vector<4x128xf32>
    %300 = arith.mulf %298, %299 : vector<4x128xf32>
    %301 = arith.addf %297, %300 : vector<4x128xf32>
    %302 = vector.broadcast %6 : vector<1x128xf32> to vector<4x128xf32>
    %303 = arith.addf %301, %302 : vector<4x128xf32>
    %304 = math.tanh %303 : vector<4x128xf32>
    %305 = arith.mulf %304, %275 : vector<4x128xf32>
    %c64_i32 = arith.constant 64 : i32
    %306 = tpu.dynamic_rotate %305 by %c64_i32 dim 1 : vector<4x128xf32>, i32 -> vector<4x128xf32>
    %307 = arith.addf %305, %306 : vector<4x128xf32>
    %c32_i32 = arith.constant 32 : i32
    %308 = tpu.dynamic_rotate %307 by %c32_i32 dim 1 : vector<4x128xf32>, i32 -> vector<4x128xf32>
    %309 = arith.addf %307, %308 : vector<4x128xf32>
    %cst_107 = arith.constant 0.333333343 : f32
    %310 = vector.broadcast %cst_107 : f32 to vector<4x128xf32>
    %311 = arith.mulf %310, %309 : vector<4x128xf32>
    %312 = arith.addf %273, %311 : vector<4x128xf32>
    %313 = vector.broadcast %0 : vector<1x128xf32> to vector<4x128xf32>
    %314 = arith.mulf %312, %313 : vector<4x128xf32>
    %cst_108 = arith.constant dense<0.000000e+00> : vector<4xf32>
    %315 = vector.multi_reduction <add>, %314, %cst_108 [1] : vector<4x128xf32> to vector<4xf32>
    %316 = vector.shape_cast %315 : vector<4xf32> to vector<4x1xf32>
    %317 = vector.broadcast %2 : vector<1x1xf32> to vector<4x1xf32>
    %318 = arith.addf %316, %317 : vector<4x1xf32>
    %cst_109 = arith.constant 0.000000e+00 : f32
    %319 = vector.broadcast %cst_109 : f32 to vector<4x1xf32>
    %320 = arith.maximumf %318, %319 : vector<4x1xf32>
    %321 = vector.broadcast %1 : vector<1x128xf32> to vector<4x128xf32>
    %322 = arith.mulf %312, %321 : vector<4x128xf32>
    %cst_110 = arith.constant dense<0.000000e+00> : vector<4xf32>
    %323 = vector.multi_reduction <add>, %322, %cst_110 [1] : vector<4x128xf32> to vector<4xf32>
    %324 = vector.shape_cast %323 : vector<4xf32> to vector<4x1xf32>
    %325 = vector.broadcast %3 : vector<1x1xf32> to vector<4x1xf32>
    %326 = arith.addf %324, %325 : vector<4x1xf32>
    %cst_111 = arith.constant 0.000000e+00 : f32
    %327 = vector.broadcast %cst_111 : f32 to vector<4x1xf32>
    %328 = arith.maximumf %326, %327 : vector<4x1xf32>
    %329 = vector.broadcast %320 : vector<4x1xf32> to vector<4x128xf32>
    %330 = vector.broadcast %4 : vector<1x128xf32> to vector<4x128xf32>
    %331 = arith.mulf %329, %330 : vector<4x128xf32>
    %332 = vector.broadcast %328 : vector<4x1xf32> to vector<4x128xf32>
    %333 = vector.broadcast %5 : vector<1x128xf32> to vector<4x128xf32>
    %334 = arith.mulf %332, %333 : vector<4x128xf32>
    %335 = arith.addf %331, %334 : vector<4x128xf32>
    %336 = vector.broadcast %6 : vector<1x128xf32> to vector<4x128xf32>
    %337 = arith.addf %335, %336 : vector<4x128xf32>
    %338 = math.tanh %337 : vector<4x128xf32>
    %339 = arith.mulf %338, %276 : vector<4x128xf32>
    %c64_i32_112 = arith.constant 64 : i32
    %340 = tpu.dynamic_rotate %339 by %c64_i32_112 dim 1 : vector<4x128xf32>, i32 -> vector<4x128xf32>
    %341 = arith.addf %339, %340 : vector<4x128xf32>
    %c32_i32_113 = arith.constant 32 : i32
    %342 = tpu.dynamic_rotate %341 by %c32_i32_113 dim 1 : vector<4x128xf32>, i32 -> vector<4x128xf32>
    %343 = arith.addf %341, %342 : vector<4x128xf32>
    %cst_114 = arith.constant 0.333333343 : f32
    %344 = vector.broadcast %cst_114 : f32 to vector<4x128xf32>
    %345 = arith.mulf %344, %309 : vector<4x128xf32>
    %346 = arith.subf %343, %345 : vector<4x128xf32>
    %cst_115 = arith.constant 1.000000e+00 : f32
    %347 = vector.broadcast %cst_115 : f32 to vector<4x128xf32>
    %348 = arith.mulf %347, %346 : vector<4x128xf32>
    %349 = arith.addf %273, %348 : vector<4x128xf32>
    %350 = vector.broadcast %0 : vector<1x128xf32> to vector<4x128xf32>
    %351 = arith.mulf %349, %350 : vector<4x128xf32>
    %cst_116 = arith.constant dense<0.000000e+00> : vector<4xf32>
    %352 = vector.multi_reduction <add>, %351, %cst_116 [1] : vector<4x128xf32> to vector<4xf32>
    %353 = vector.shape_cast %352 : vector<4xf32> to vector<4x1xf32>
    %354 = vector.broadcast %2 : vector<1x1xf32> to vector<4x1xf32>
    %355 = arith.addf %353, %354 : vector<4x1xf32>
    %cst_117 = arith.constant 0.000000e+00 : f32
    %356 = vector.broadcast %cst_117 : f32 to vector<4x1xf32>
    %357 = arith.maximumf %355, %356 : vector<4x1xf32>
    %358 = vector.broadcast %1 : vector<1x128xf32> to vector<4x128xf32>
    %359 = arith.mulf %349, %358 : vector<4x128xf32>
    %cst_118 = arith.constant dense<0.000000e+00> : vector<4xf32>
    %360 = vector.multi_reduction <add>, %359, %cst_118 [1] : vector<4x128xf32> to vector<4xf32>
    %361 = vector.shape_cast %360 : vector<4xf32> to vector<4x1xf32>
    %362 = vector.broadcast %3 : vector<1x1xf32> to vector<4x1xf32>
    %363 = arith.addf %361, %362 : vector<4x1xf32>
    %cst_119 = arith.constant 0.000000e+00 : f32
    %364 = vector.broadcast %cst_119 : f32 to vector<4x1xf32>
    %365 = arith.maximumf %363, %364 : vector<4x1xf32>
    %366 = vector.broadcast %357 : vector<4x1xf32> to vector<4x128xf32>
    %367 = vector.broadcast %4 : vector<1x128xf32> to vector<4x128xf32>
    %368 = arith.mulf %366, %367 : vector<4x128xf32>
    %369 = vector.broadcast %365 : vector<4x1xf32> to vector<4x128xf32>
    %370 = vector.broadcast %5 : vector<1x128xf32> to vector<4x128xf32>
    %371 = arith.mulf %369, %370 : vector<4x128xf32>
    %372 = arith.addf %368, %371 : vector<4x128xf32>
    %373 = vector.broadcast %6 : vector<1x128xf32> to vector<4x128xf32>
    %374 = arith.addf %372, %373 : vector<4x128xf32>
    %375 = math.tanh %374 : vector<4x128xf32>
    %376 = arith.mulf %375, %277 : vector<4x128xf32>
    %c64_i32_120 = arith.constant 64 : i32
    %377 = tpu.dynamic_rotate %376 by %c64_i32_120 dim 1 : vector<4x128xf32>, i32 -> vector<4x128xf32>
    %378 = arith.addf %376, %377 : vector<4x128xf32>
    %c32_i32_121 = arith.constant 32 : i32
    %379 = tpu.dynamic_rotate %378 by %c32_i32_121 dim 1 : vector<4x128xf32>, i32 -> vector<4x128xf32>
    %380 = arith.addf %378, %379 : vector<4x128xf32>
    %381 = arith.subf %309, %343 : vector<4x128xf32>
    %382 = arith.addf %381, %380 : vector<4x128xf32>
    %cst_122 = arith.constant 1.000000e+00 : f32
    %383 = vector.broadcast %cst_122 : f32 to vector<4x128xf32>
    %384 = arith.mulf %383, %382 : vector<4x128xf32>
    %385 = arith.addf %273, %384 : vector<4x128xf32>
    %386 = vector.broadcast %0 : vector<1x128xf32> to vector<4x128xf32>
    %387 = arith.mulf %385, %386 : vector<4x128xf32>
    %cst_123 = arith.constant dense<0.000000e+00> : vector<4xf32>
    %388 = vector.multi_reduction <add>, %387, %cst_123 [1] : vector<4x128xf32> to vector<4xf32>
    %389 = vector.shape_cast %388 : vector<4xf32> to vector<4x1xf32>
    %390 = vector.broadcast %2 : vector<1x1xf32> to vector<4x1xf32>
    %391 = arith.addf %389, %390 : vector<4x1xf32>
    %cst_124 = arith.constant 0.000000e+00 : f32
    %392 = vector.broadcast %cst_124 : f32 to vector<4x1xf32>
    %393 = arith.maximumf %391, %392 : vector<4x1xf32>
    %394 = vector.broadcast %1 : vector<1x128xf32> to vector<4x128xf32>
    %395 = arith.mulf %385, %394 : vector<4x128xf32>
    %cst_125 = arith.constant dense<0.000000e+00> : vector<4xf32>
    %396 = vector.multi_reduction <add>, %395, %cst_125 [1] : vector<4x128xf32> to vector<4xf32>
    %397 = vector.shape_cast %396 : vector<4xf32> to vector<4x1xf32>
    %398 = vector.broadcast %3 : vector<1x1xf32> to vector<4x1xf32>
    %399 = arith.addf %397, %398 : vector<4x1xf32>
    %cst_126 = arith.constant 0.000000e+00 : f32
    %400 = vector.broadcast %cst_126 : f32 to vector<4x1xf32>
    %401 = arith.maximumf %399, %400 : vector<4x1xf32>
    %402 = vector.broadcast %393 : vector<4x1xf32> to vector<4x128xf32>
    %403 = vector.broadcast %4 : vector<1x128xf32> to vector<4x128xf32>
    %404 = arith.mulf %402, %403 : vector<4x128xf32>
    %405 = vector.broadcast %401 : vector<4x1xf32> to vector<4x128xf32>
    %406 = vector.broadcast %5 : vector<1x128xf32> to vector<4x128xf32>
    %407 = arith.mulf %405, %406 : vector<4x128xf32>
    %408 = arith.addf %404, %407 : vector<4x128xf32>
    %409 = vector.broadcast %6 : vector<1x128xf32> to vector<4x128xf32>
    %410 = arith.addf %408, %409 : vector<4x128xf32>
    %411 = math.tanh %410 : vector<4x128xf32>
    %412 = arith.mulf %411, %278 : vector<4x128xf32>
    %c64_i32_127 = arith.constant 64 : i32
    %413 = tpu.dynamic_rotate %412 by %c64_i32_127 dim 1 : vector<4x128xf32>, i32 -> vector<4x128xf32>
    %414 = arith.addf %412, %413 : vector<4x128xf32>
    %c32_i32_128 = arith.constant 32 : i32
    %415 = tpu.dynamic_rotate %414 by %c32_i32_128 dim 1 : vector<4x128xf32>, i32 -> vector<4x128xf32>
    %416 = arith.addf %414, %415 : vector<4x128xf32>
    %417 = arith.addf %343, %380 : vector<4x128xf32>
    %cst_129 = arith.constant 3.000000e+00 : f32
    %418 = vector.broadcast %cst_129 : f32 to vector<4x128xf32>
    %419 = arith.mulf %418, %417 : vector<4x128xf32>
    %420 = arith.addf %309, %419 : vector<4x128xf32>
    %421 = arith.addf %420, %416 : vector<4x128xf32>
    %cst_130 = arith.constant 1.250000e-01 : f32
    %422 = vector.broadcast %cst_130 : f32 to vector<4x128xf32>
    %423 = arith.mulf %421, %422 : vector<4x128xf32>
    %424 = arith.addf %273, %423 : vector<4x128xf32>
    %c4_131 = arith.constant 4 : index
    %c0_132 = arith.constant 0 : index
    %425 = vector.load %arg14[%c4_131, %c0_132] : memref<32x128xf32, #tpu.memory_space<vmem>>, vector<4x128xf32>
    tpu.vector_store %arg14[%c4_131, %c0_132], %424 {strides = array<i32>} : memref<32x128xf32, #tpu.memory_space<vmem>>, vector<4x128xf32>,
    %c16_133 = arith.constant 16 : index
    %c0_134 = arith.constant 0 : index
    %426 = vector.load %arg13[%c16_133, %c0_134] : memref<112x128xf32, #tpu.memory_space<vmem>>, vector<4x128xf32>
    %c20_135 = arith.constant 20 : index
    %c0_136 = arith.constant 0 : index
    %427 = vector.load %arg13[%c20_135, %c0_136] : memref<112x128xf32, #tpu.memory_space<vmem>>, vector<4x128xf32>
    %c24_137 = arith.constant 24 : index
    %c0_138 = arith.constant 0 : index
    %428 = vector.load %arg13[%c24_137, %c0_138] : memref<112x128xf32, #tpu.memory_space<vmem>>, vector<4x128xf32>
    %c28_139 = arith.constant 28 : index
    %c0_140 = arith.constant 0 : index
    %429 = vector.load %arg13[%c28_139, %c0_140] : memref<112x128xf32, #tpu.memory_space<vmem>>, vector<4x128xf32>
    %430 = vector.broadcast %0 : vector<1x128xf32> to vector<4x128xf32>
    %431 = arith.mulf %424, %430 : vector<4x128xf32>
    %cst_141 = arith.constant dense<0.000000e+00> : vector<4xf32>
    %432 = vector.multi_reduction <add>, %431, %cst_141 [1] : vector<4x128xf32> to vector<4xf32>
    %433 = vector.shape_cast %432 : vector<4xf32> to vector<4x1xf32>
    %434 = vector.broadcast %2 : vector<1x1xf32> to vector<4x1xf32>
    %435 = arith.addf %433, %434 : vector<4x1xf32>
    %cst_142 = arith.constant 0.000000e+00 : f32
    %436 = vector.broadcast %cst_142 : f32 to vector<4x1xf32>
    %437 = arith.maximumf %435, %436 : vector<4x1xf32>
    %438 = vector.broadcast %1 : vector<1x128xf32> to vector<4x128xf32>
    %439 = arith.mulf %424, %438 : vector<4x128xf32>
    %cst_143 = arith.constant dense<0.000000e+00> : vector<4xf32>
    %440 = vector.multi_reduction <add>, %439, %cst_143 [1] : vector<4x128xf32> to vector<4xf32>
    %441 = vector.shape_cast %440 : vector<4xf32> to vector<4x1xf32>
    %442 = vector.broadcast %3 : vector<1x1xf32> to vector<4x1xf32>
    %443 = arith.addf %441, %442 : vector<4x1xf32>
    %cst_144 = arith.constant 0.000000e+00 : f32
    %444 = vector.broadcast %cst_144 : f32 to vector<4x1xf32>
    %445 = arith.maximumf %443, %444 : vector<4x1xf32>
    %446 = vector.broadcast %437 : vector<4x1xf32> to vector<4x128xf32>
    %447 = vector.broadcast %4 : vector<1x128xf32> to vector<4x128xf32>
    %448 = arith.mulf %446, %447 : vector<4x128xf32>
    %449 = vector.broadcast %445 : vector<4x1xf32> to vector<4x128xf32>
    %450 = vector.broadcast %5 : vector<1x128xf32> to vector<4x128xf32>
    %451 = arith.mulf %449, %450 : vector<4x128xf32>
    %452 = arith.addf %448, %451 : vector<4x128xf32>
    %453 = vector.broadcast %6 : vector<1x128xf32> to vector<4x128xf32>
    %454 = arith.addf %452, %453 : vector<4x128xf32>
    %455 = math.tanh %454 : vector<4x128xf32>
    %456 = arith.mulf %455, %426 : vector<4x128xf32>
    %c64_i32_145 = arith.constant 64 : i32
    %457 = tpu.dynamic_rotate %456 by %c64_i32_145 dim 1 : vector<4x128xf32>, i32 -> vector<4x128xf32>
    %458 = arith.addf %456, %457 : vector<4x128xf32>
    %c32_i32_146 = arith.constant 32 : i32
    %459 = tpu.dynamic_rotate %458 by %c32_i32_146 dim 1 : vector<4x128xf32>, i32 -> vector<4x128xf32>
    %460 = arith.addf %458, %459 : vector<4x128xf32>
    %cst_147 = arith.constant 0.333333343 : f32
    %461 = vector.broadcast %cst_147 : f32 to vector<4x128xf32>
    %462 = arith.mulf %461, %460 : vector<4x128xf32>
    %463 = arith.addf %424, %462 : vector<4x128xf32>
    %464 = vector.broadcast %0 : vector<1x128xf32> to vector<4x128xf32>
    %465 = arith.mulf %463, %464 : vector<4x128xf32>
    %cst_148 = arith.constant dense<0.000000e+00> : vector<4xf32>
    %466 = vector.multi_reduction <add>, %465, %cst_148 [1] : vector<4x128xf32> to vector<4xf32>
    %467 = vector.shape_cast %466 : vector<4xf32> to vector<4x1xf32>
    %468 = vector.broadcast %2 : vector<1x1xf32> to vector<4x1xf32>
    %469 = arith.addf %467, %468 : vector<4x1xf32>
    %cst_149 = arith.constant 0.000000e+00 : f32
    %470 = vector.broadcast %cst_149 : f32 to vector<4x1xf32>
    %471 = arith.maximumf %469, %470 : vector<4x1xf32>
    %472 = vector.broadcast %1 : vector<1x128xf32> to vector<4x128xf32>
    %473 = arith.mulf %463, %472 : vector<4x128xf32>
    %cst_150 = arith.constant dense<0.000000e+00> : vector<4xf32>
    %474 = vector.multi_reduction <add>, %473, %cst_150 [1] : vector<4x128xf32> to vector<4xf32>
    %475 = vector.shape_cast %474 : vector<4xf32> to vector<4x1xf32>
    %476 = vector.broadcast %3 : vector<1x1xf32> to vector<4x1xf32>
    %477 = arith.addf %475, %476 : vector<4x1xf32>
    %cst_151 = arith.constant 0.000000e+00 : f32
    %478 = vector.broadcast %cst_151 : f32 to vector<4x1xf32>
    %479 = arith.maximumf %477, %478 : vector<4x1xf32>
    %480 = vector.broadcast %471 : vector<4x1xf32> to vector<4x128xf32>
    %481 = vector.broadcast %4 : vector<1x128xf32> to vector<4x128xf32>
    %482 = arith.mulf %480, %481 : vector<4x128xf32>
    %483 = vector.broadcast %479 : vector<4x1xf32> to vector<4x128xf32>
    %484 = vector.broadcast %5 : vector<1x128xf32> to vector<4x128xf32>
    %485 = arith.mulf %483, %484 : vector<4x128xf32>
    %486 = arith.addf %482, %485 : vector<4x128xf32>
    %487 = vector.broadcast %6 : vector<1x128xf32> to vector<4x128xf32>
    %488 = arith.addf %486, %487 : vector<4x128xf32>
    %489 = math.tanh %488 : vector<4x128xf32>
    %490 = arith.mulf %489, %427 : vector<4x128xf32>
    %c64_i32_152 = arith.constant 64 : i32
    %491 = tpu.dynamic_rotate %490 by %c64_i32_152 dim 1 : vector<4x128xf32>, i32 -> vector<4x128xf32>
    %492 = arith.addf %490, %491 : vector<4x128xf32>
    %c32_i32_153 = arith.constant 32 : i32
    %493 = tpu.dynamic_rotate %492 by %c32_i32_153 dim 1 : vector<4x128xf32>, i32 -> vector<4x128xf32>
    %494 = arith.addf %492, %493 : vector<4x128xf32>
    %cst_154 = arith.constant 0.333333343 : f32
    %495 = vector.broadcast %cst_154 : f32 to vector<4x128xf32>
    %496 = arith.mulf %495, %460 : vector<4x128xf32>
    %497 = arith.subf %494, %496 : vector<4x128xf32>
    %cst_155 = arith.constant 1.000000e+00 : f32
    %498 = vector.broadcast %cst_155 : f32 to vector<4x128xf32>
    %499 = arith.mulf %498, %497 : vector<4x128xf32>
    %500 = arith.addf %424, %499 : vector<4x128xf32>
    %501 = vector.broadcast %0 : vector<1x128xf32> to vector<4x128xf32>
    %502 = arith.mulf %500, %501 : vector<4x128xf32>
    %cst_156 = arith.constant dense<0.000000e+00> : vector<4xf32>
    %503 = vector.multi_reduction <add>, %502, %cst_156 [1] : vector<4x128xf32> to vector<4xf32>
    %504 = vector.shape_cast %503 : vector<4xf32> to vector<4x1xf32>
    %505 = vector.broadcast %2 : vector<1x1xf32> to vector<4x1xf32>
    %506 = arith.addf %504, %505 : vector<4x1xf32>
    %cst_157 = arith.constant 0.000000e+00 : f32
    %507 = vector.broadcast %cst_157 : f32 to vector<4x1xf32>
    %508 = arith.maximumf %506, %507 : vector<4x1xf32>
    %509 = vector.broadcast %1 : vector<1x128xf32> to vector<4x128xf32>
    %510 = arith.mulf %500, %509 : vector<4x128xf32>
    %cst_158 = arith.constant dense<0.000000e+00> : vector<4xf32>
    %511 = vector.multi_reduction <add>, %510, %cst_158 [1] : vector<4x128xf32> to vector<4xf32>
    %512 = vector.shape_cast %511 : vector<4xf32> to vector<4x1xf32>
    %513 = vector.broadcast %3 : vector<1x1xf32> to vector<4x1xf32>
    %514 = arith.addf %512, %513 : vector<4x1xf32>
    %cst_159 = arith.constant 0.000000e+00 : f32
    %515 = vector.broadcast %cst_159 : f32 to vector<4x1xf32>
    %516 = arith.maximumf %514, %515 : vector<4x1xf32>
    %517 = vector.broadcast %508 : vector<4x1xf32> to vector<4x128xf32>
    %518 = vector.broadcast %4 : vector<1x128xf32> to vector<4x128xf32>
    %519 = arith.mulf %517, %518 : vector<4x128xf32>
    %520 = vector.broadcast %516 : vector<4x1xf32> to vector<4x128xf32>
    %521 = vector.broadcast %5 : vector<1x128xf32> to vector<4x128xf32>
    %522 = arith.mulf %520, %521 : vector<4x128xf32>
    %523 = arith.addf %519, %522 : vector<4x128xf32>
    %524 = vector.broadcast %6 : vector<1x128xf32> to vector<4x128xf32>
    %525 = arith.addf %523, %524 : vector<4x128xf32>
    %526 = math.tanh %525 : vector<4x128xf32>
    %527 = arith.mulf %526, %428 : vector<4x128xf32>
    %c64_i32_160 = arith.constant 64 : i32
    %528 = tpu.dynamic_rotate %527 by %c64_i32_160 dim 1 : vector<4x128xf32>, i32 -> vector<4x128xf32>
    %529 = arith.addf %527, %528 : vector<4x128xf32>
    %c32_i32_161 = arith.constant 32 : i32
    %530 = tpu.dynamic_rotate %529 by %c32_i32_161 dim 1 : vector<4x128xf32>, i32 -> vector<4x128xf32>
    %531 = arith.addf %529, %530 : vector<4x128xf32>
    %532 = arith.subf %460, %494 : vector<4x128xf32>
    %533 = arith.addf %532, %531 : vector<4x128xf32>
    %cst_162 = arith.constant 1.000000e+00 : f32
    %534 = vector.broadcast %cst_162 : f32 to vector<4x128xf32>
    %535 = arith.mulf %534, %533 : vector<4x128xf32>
    %536 = arith.addf %424, %535 : vector<4x128xf32>
    %537 = vector.broadcast %0 : vector<1x128xf32> to vector<4x128xf32>
    %538 = arith.mulf %536, %537 : vector<4x128xf32>
    %cst_163 = arith.constant dense<0.000000e+00> : vector<4xf32>
    %539 = vector.multi_reduction <add>, %538, %cst_163 [1] : vector<4x128xf32> to vector<4xf32>
    %540 = vector.shape_cast %539 : vector<4xf32> to vector<4x1xf32>
    %541 = vector.broadcast %2 : vector<1x1xf32> to vector<4x1xf32>
    %542 = arith.addf %540, %541 : vector<4x1xf32>
    %cst_164 = arith.constant 0.000000e+00 : f32
    %543 = vector.broadcast %cst_164 : f32 to vector<4x1xf32>
    %544 = arith.maximumf %542, %543 : vector<4x1xf32>
    %545 = vector.broadcast %1 : vector<1x128xf32> to vector<4x128xf32>
    %546 = arith.mulf %536, %545 : vector<4x128xf32>
    %cst_165 = arith.constant dense<0.000000e+00> : vector<4xf32>
    %547 = vector.multi_reduction <add>, %546, %cst_165 [1] : vector<4x128xf32> to vector<4xf32>
    %548 = vector.shape_cast %547 : vector<4xf32> to vector<4x1xf32>
    %549 = vector.broadcast %3 : vector<1x1xf32> to vector<4x1xf32>
    %550 = arith.addf %548, %549 : vector<4x1xf32>
    %cst_166 = arith.constant 0.000000e+00 : f32
    %551 = vector.broadcast %cst_166 : f32 to vector<4x1xf32>
    %552 = arith.maximumf %550, %551 : vector<4x1xf32>
    %553 = vector.broadcast %544 : vector<4x1xf32> to vector<4x128xf32>
    %554 = vector.broadcast %4 : vector<1x128xf32> to vector<4x128xf32>
    %555 = arith.mulf %553, %554 : vector<4x128xf32>
    %556 = vector.broadcast %552 : vector<4x1xf32> to vector<4x128xf32>
    %557 = vector.broadcast %5 : vector<1x128xf32> to vector<4x128xf32>
    %558 = arith.mulf %556, %557 : vector<4x128xf32>
    %559 = arith.addf %555, %558 : vector<4x128xf32>
    %560 = vector.broadcast %6 : vector<1x128xf32> to vector<4x128xf32>
    %561 = arith.addf %559, %560 : vector<4x128xf32>
    %562 = math.tanh %561 : vector<4x128xf32>
    %563 = arith.mulf %562, %429 : vector<4x128xf32>
    %c64_i32_167 = arith.constant 64 : i32
    %564 = tpu.dynamic_rotate %563 by %c64_i32_167 dim 1 : vector<4x128xf32>, i32 -> vector<4x128xf32>
    %565 = arith.addf %563, %564 : vector<4x128xf32>
    %c32_i32_168 = arith.constant 32 : i32
    %566 = tpu.dynamic_rotate %565 by %c32_i32_168 dim 1 : vector<4x128xf32>, i32 -> vector<4x128xf32>
    %567 = arith.addf %565, %566 : vector<4x128xf32>
    %568 = arith.addf %494, %531 : vector<4x128xf32>
    %cst_169 = arith.constant 3.000000e+00 : f32
    %569 = vector.broadcast %cst_169 : f32 to vector<4x128xf32>
    %570 = arith.mulf %569, %568 : vector<4x128xf32>
    %571 = arith.addf %460, %570 : vector<4x128xf32>
    %572 = arith.addf %571, %567 : vector<4x128xf32>
    %cst_170 = arith.constant 1.250000e-01 : f32
    %573 = vector.broadcast %cst_170 : f32 to vector<4x128xf32>
    %574 = arith.mulf %572, %573 : vector<4x128xf32>
    %575 = arith.addf %424, %574 : vector<4x128xf32>
    %c8_171 = arith.constant 8 : index
    %c0_172 = arith.constant 0 : index
    %576 = vector.load %arg14[%c8_171, %c0_172] : memref<32x128xf32, #tpu.memory_space<vmem>>, vector<4x128xf32>
    tpu.vector_store %arg14[%c8_171, %c0_172], %575 {strides = array<i32>} : memref<32x128xf32, #tpu.memory_space<vmem>>, vector<4x128xf32>,
    %c32_173 = arith.constant 32 : index
    %c0_174 = arith.constant 0 : index
    %577 = vector.load %arg13[%c32_173, %c0_174] : memref<112x128xf32, #tpu.memory_space<vmem>>, vector<4x128xf32>
    %c36_175 = arith.constant 36 : index
    %c0_176 = arith.constant 0 : index
    %578 = vector.load %arg13[%c36_175, %c0_176] : memref<112x128xf32, #tpu.memory_space<vmem>>, vector<4x128xf32>
    %c40_177 = arith.constant 40 : index
    %c0_178 = arith.constant 0 : index
    %579 = vector.load %arg13[%c40_177, %c0_178] : memref<112x128xf32, #tpu.memory_space<vmem>>, vector<4x128xf32>
    %c44_179 = arith.constant 44 : index
    %c0_180 = arith.constant 0 : index
    %580 = vector.load %arg13[%c44_179, %c0_180] : memref<112x128xf32, #tpu.memory_space<vmem>>, vector<4x128xf32>
    %581 = vector.broadcast %0 : vector<1x128xf32> to vector<4x128xf32>
    %582 = arith.mulf %575, %581 : vector<4x128xf32>
    %cst_181 = arith.constant dense<0.000000e+00> : vector<4xf32>
    %583 = vector.multi_reduction <add>, %582, %cst_181 [1] : vector<4x128xf32> to vector<4xf32>
    %584 = vector.shape_cast %583 : vector<4xf32> to vector<4x1xf32>
    %585 = vector.broadcast %2 : vector<1x1xf32> to vector<4x1xf32>
    %586 = arith.addf %584, %585 : vector<4x1xf32>
    %cst_182 = arith.constant 0.000000e+00 : f32
    %587 = vector.broadcast %cst_182 : f32 to vector<4x1xf32>
    %588 = arith.maximumf %586, %587 : vector<4x1xf32>
    %589 = vector.broadcast %1 : vector<1x128xf32> to vector<4x128xf32>
    %590 = arith.mulf %575, %589 : vector<4x128xf32>
    %cst_183 = arith.constant dense<0.000000e+00> : vector<4xf32>
    %591 = vector.multi_reduction <add>, %590, %cst_183 [1] : vector<4x128xf32> to vector<4xf32>
    %592 = vector.shape_cast %591 : vector<4xf32> to vector<4x1xf32>
    %593 = vector.broadcast %3 : vector<1x1xf32> to vector<4x1xf32>
    %594 = arith.addf %592, %593 : vector<4x1xf32>
    %cst_184 = arith.constant 0.000000e+00 : f32
    %595 = vector.broadcast %cst_184 : f32 to vector<4x1xf32>
    %596 = arith.maximumf %594, %595 : vector<4x1xf32>
    %597 = vector.broadcast %588 : vector<4x1xf32> to vector<4x128xf32>
    %598 = vector.broadcast %4 : vector<1x128xf32> to vector<4x128xf32>
    %599 = arith.mulf %597, %598 : vector<4x128xf32>
    %600 = vector.broadcast %596 : vector<4x1xf32> to vector<4x128xf32>
    %601 = vector.broadcast %5 : vector<1x128xf32> to vector<4x128xf32>
    %602 = arith.mulf %600, %601 : vector<4x128xf32>
    %603 = arith.addf %599, %602 : vector<4x128xf32>
    %604 = vector.broadcast %6 : vector<1x128xf32> to vector<4x128xf32>
    %605 = arith.addf %603, %604 : vector<4x128xf32>
    %606 = math.tanh %605 : vector<4x128xf32>
    %607 = arith.mulf %606, %577 : vector<4x128xf32>
    %c64_i32_185 = arith.constant 64 : i32
    %608 = tpu.dynamic_rotate %607 by %c64_i32_185 dim 1 : vector<4x128xf32>, i32 -> vector<4x128xf32>
    %609 = arith.addf %607, %608 : vector<4x128xf32>
    %c32_i32_186 = arith.constant 32 : i32
    %610 = tpu.dynamic_rotate %609 by %c32_i32_186 dim 1 : vector<4x128xf32>, i32 -> vector<4x128xf32>
    %611 = arith.addf %609, %610 : vector<4x128xf32>
    %cst_187 = arith.constant 0.333333343 : f32
    %612 = vector.broadcast %cst_187 : f32 to vector<4x128xf32>
    %613 = arith.mulf %612, %611 : vector<4x128xf32>
    %614 = arith.addf %575, %613 : vector<4x128xf32>
    %615 = vector.broadcast %0 : vector<1x128xf32> to vector<4x128xf32>
    %616 = arith.mulf %614, %615 : vector<4x128xf32>
    %cst_188 = arith.constant dense<0.000000e+00> : vector<4xf32>
    %617 = vector.multi_reduction <add>, %616, %cst_188 [1] : vector<4x128xf32> to vector<4xf32>
    %618 = vector.shape_cast %617 : vector<4xf32> to vector<4x1xf32>
    %619 = vector.broadcast %2 : vector<1x1xf32> to vector<4x1xf32>
    %620 = arith.addf %618, %619 : vector<4x1xf32>
    %cst_189 = arith.constant 0.000000e+00 : f32
    %621 = vector.broadcast %cst_189 : f32 to vector<4x1xf32>
    %622 = arith.maximumf %620, %621 : vector<4x1xf32>
    %623 = vector.broadcast %1 : vector<1x128xf32> to vector<4x128xf32>
    %624 = arith.mulf %614, %623 : vector<4x128xf32>
    %cst_190 = arith.constant dense<0.000000e+00> : vector<4xf32>
    %625 = vector.multi_reduction <add>, %624, %cst_190 [1] : vector<4x128xf32> to vector<4xf32>
    %626 = vector.shape_cast %625 : vector<4xf32> to vector<4x1xf32>
    %627 = vector.broadcast %3 : vector<1x1xf32> to vector<4x1xf32>
    %628 = arith.addf %626, %627 : vector<4x1xf32>
    %cst_191 = arith.constant 0.000000e+00 : f32
    %629 = vector.broadcast %cst_191 : f32 to vector<4x1xf32>
    %630 = arith.maximumf %628, %629 : vector<4x1xf32>
    %631 = vector.broadcast %622 : vector<4x1xf32> to vector<4x128xf32>
    %632 = vector.broadcast %4 : vector<1x128xf32> to vector<4x128xf32>
    %633 = arith.mulf %631, %632 : vector<4x128xf32>
    %634 = vector.broadcast %630 : vector<4x1xf32> to vector<4x128xf32>
    %635 = vector.broadcast %5 : vector<1x128xf32> to vector<4x128xf32>
    %636 = arith.mulf %634, %635 : vector<4x128xf32>
    %637 = arith.addf %633, %636 : vector<4x128xf32>
    %638 = vector.broadcast %6 : vector<1x128xf32> to vector<4x128xf32>
    %639 = arith.addf %637, %638 : vector<4x128xf32>
    %640 = math.tanh %639 : vector<4x128xf32>
    %641 = arith.mulf %640, %578 : vector<4x128xf32>
    %c64_i32_192 = arith.constant 64 : i32
    %642 = tpu.dynamic_rotate %641 by %c64_i32_192 dim 1 : vector<4x128xf32>, i32 -> vector<4x128xf32>
    %643 = arith.addf %641, %642 : vector<4x128xf32>
    %c32_i32_193 = arith.constant 32 : i32
    %644 = tpu.dynamic_rotate %643 by %c32_i32_193 dim 1 : vector<4x128xf32>, i32 -> vector<4x128xf32>
    %645 = arith.addf %643, %644 : vector<4x128xf32>
    %cst_194 = arith.constant 0.333333343 : f32
    %646 = vector.broadcast %cst_194 : f32 to vector<4x128xf32>
    %647 = arith.mulf %646, %611 : vector<4x128xf32>
    %648 = arith.subf %645, %647 : vector<4x128xf32>
    %cst_195 = arith.constant 1.000000e+00 : f32
    %649 = vector.broadcast %cst_195 : f32 to vector<4x128xf32>
    %650 = arith.mulf %649, %648 : vector<4x128xf32>
    %651 = arith.addf %575, %650 : vector<4x128xf32>
    %652 = vector.broadcast %0 : vector<1x128xf32> to vector<4x128xf32>
    %653 = arith.mulf %651, %652 : vector<4x128xf32>
    %cst_196 = arith.constant dense<0.000000e+00> : vector<4xf32>
    %654 = vector.multi_reduction <add>, %653, %cst_196 [1] : vector<4x128xf32> to vector<4xf32>
    %655 = vector.shape_cast %654 : vector<4xf32> to vector<4x1xf32>
    %656 = vector.broadcast %2 : vector<1x1xf32> to vector<4x1xf32>
    %657 = arith.addf %655, %656 : vector<4x1xf32>
    %cst_197 = arith.constant 0.000000e+00 : f32
    %658 = vector.broadcast %cst_197 : f32 to vector<4x1xf32>
    %659 = arith.maximumf %657, %658 : vector<4x1xf32>
    %660 = vector.broadcast %1 : vector<1x128xf32> to vector<4x128xf32>
    %661 = arith.mulf %651, %660 : vector<4x128xf32>
    %cst_198 = arith.constant dense<0.000000e+00> : vector<4xf32>
    %662 = vector.multi_reduction <add>, %661, %cst_198 [1] : vector<4x128xf32> to vector<4xf32>
    %663 = vector.shape_cast %662 : vector<4xf32> to vector<4x1xf32>
    %664 = vector.broadcast %3 : vector<1x1xf32> to vector<4x1xf32>
    %665 = arith.addf %663, %664 : vector<4x1xf32>
    %cst_199 = arith.constant 0.000000e+00 : f32
    %666 = vector.broadcast %cst_199 : f32 to vector<4x1xf32>
    %667 = arith.maximumf %665, %666 : vector<4x1xf32>
    %668 = vector.broadcast %659 : vector<4x1xf32> to vector<4x128xf32>
    %669 = vector.broadcast %4 : vector<1x128xf32> to vector<4x128xf32>
    %670 = arith.mulf %668, %669 : vector<4x128xf32>
    %671 = vector.broadcast %667 : vector<4x1xf32> to vector<4x128xf32>
    %672 = vector.broadcast %5 : vector<1x128xf32> to vector<4x128xf32>
    %673 = arith.mulf %671, %672 : vector<4x128xf32>
    %674 = arith.addf %670, %673 : vector<4x128xf32>
    %675 = vector.broadcast %6 : vector<1x128xf32> to vector<4x128xf32>
    %676 = arith.addf %674, %675 : vector<4x128xf32>
    %677 = math.tanh %676 : vector<4x128xf32>
    %678 = arith.mulf %677, %579 : vector<4x128xf32>
    %c64_i32_200 = arith.constant 64 : i32
    %679 = tpu.dynamic_rotate %678 by %c64_i32_200 dim 1 : vector<4x128xf32>, i32 -> vector<4x128xf32>
    %680 = arith.addf %678, %679 : vector<4x128xf32>
    %c32_i32_201 = arith.constant 32 : i32
    %681 = tpu.dynamic_rotate %680 by %c32_i32_201 dim 1 : vector<4x128xf32>, i32 -> vector<4x128xf32>
    %682 = arith.addf %680, %681 : vector<4x128xf32>
    %683 = arith.subf %611, %645 : vector<4x128xf32>
    %684 = arith.addf %683, %682 : vector<4x128xf32>
    %cst_202 = arith.constant 1.000000e+00 : f32
    %685 = vector.broadcast %cst_202 : f32 to vector<4x128xf32>
    %686 = arith.mulf %685, %684 : vector<4x128xf32>
    %687 = arith.addf %575, %686 : vector<4x128xf32>
    %688 = vector.broadcast %0 : vector<1x128xf32> to vector<4x128xf32>
    %689 = arith.mulf %687, %688 : vector<4x128xf32>
    %cst_203 = arith.constant dense<0.000000e+00> : vector<4xf32>
    %690 = vector.multi_reduction <add>, %689, %cst_203 [1] : vector<4x128xf32> to vector<4xf32>
    %691 = vector.shape_cast %690 : vector<4xf32> to vector<4x1xf32>
    %692 = vector.broadcast %2 : vector<1x1xf32> to vector<4x1xf32>
    %693 = arith.addf %691, %692 : vector<4x1xf32>
    %cst_204 = arith.constant 0.000000e+00 : f32
    %694 = vector.broadcast %cst_204 : f32 to vector<4x1xf32>
    %695 = arith.maximumf %693, %694 : vector<4x1xf32>
    %696 = vector.broadcast %1 : vector<1x128xf32> to vector<4x128xf32>
    %697 = arith.mulf %687, %696 : vector<4x128xf32>
    %cst_205 = arith.constant dense<0.000000e+00> : vector<4xf32>
    %698 = vector.multi_reduction <add>, %697, %cst_205 [1] : vector<4x128xf32> to vector<4xf32>
    %699 = vector.shape_cast %698 : vector<4xf32> to vector<4x1xf32>
    %700 = vector.broadcast %3 : vector<1x1xf32> to vector<4x1xf32>
    %701 = arith.addf %699, %700 : vector<4x1xf32>
    %cst_206 = arith.constant 0.000000e+00 : f32
    %702 = vector.broadcast %cst_206 : f32 to vector<4x1xf32>
    %703 = arith.maximumf %701, %702 : vector<4x1xf32>
    %704 = vector.broadcast %695 : vector<4x1xf32> to vector<4x128xf32>
    %705 = vector.broadcast %4 : vector<1x128xf32> to vector<4x128xf32>
    %706 = arith.mulf %704, %705 : vector<4x128xf32>
    %707 = vector.broadcast %703 : vector<4x1xf32> to vector<4x128xf32>
    %708 = vector.broadcast %5 : vector<1x128xf32> to vector<4x128xf32>
    %709 = arith.mulf %707, %708 : vector<4x128xf32>
    %710 = arith.addf %706, %709 : vector<4x128xf32>
    %711 = vector.broadcast %6 : vector<1x128xf32> to vector<4x128xf32>
    %712 = arith.addf %710, %711 : vector<4x128xf32>
    %713 = math.tanh %712 : vector<4x128xf32>
    %714 = arith.mulf %713, %580 : vector<4x128xf32>
    %c64_i32_207 = arith.constant 64 : i32
    %715 = tpu.dynamic_rotate %714 by %c64_i32_207 dim 1 : vector<4x128xf32>, i32 -> vector<4x128xf32>
    %716 = arith.addf %714, %715 : vector<4x128xf32>
    %c32_i32_208 = arith.constant 32 : i32
    %717 = tpu.dynamic_rotate %716 by %c32_i32_208 dim 1 : vector<4x128xf32>, i32 -> vector<4x128xf32>
    %718 = arith.addf %716, %717 : vector<4x128xf32>
    %719 = arith.addf %645, %682 : vector<4x128xf32>
    %cst_209 = arith.constant 3.000000e+00 : f32
    %720 = vector.broadcast %cst_209 : f32 to vector<4x128xf32>
    %721 = arith.mulf %720, %719 : vector<4x128xf32>
    %722 = arith.addf %611, %721 : vector<4x128xf32>
    %723 = arith.addf %722, %718 : vector<4x128xf32>
    %cst_210 = arith.constant 1.250000e-01 : f32
    %724 = vector.broadcast %cst_210 : f32 to vector<4x128xf32>
    %725 = arith.mulf %723, %724 : vector<4x128xf32>
    %726 = arith.addf %575, %725 : vector<4x128xf32>
    %c12_211 = arith.constant 12 : index
    %c0_212 = arith.constant 0 : index
    %727 = vector.load %arg14[%c12_211, %c0_212] : memref<32x128xf32, #tpu.memory_space<vmem>>, vector<4x128xf32>
    tpu.vector_store %arg14[%c12_211, %c0_212], %726 {strides = array<i32>} : memref<32x128xf32, #tpu.memory_space<vmem>>, vector<4x128xf32>,
    %c48_213 = arith.constant 48 : index
    %c0_214 = arith.constant 0 : index
    %728 = vector.load %arg13[%c48_213, %c0_214] : memref<112x128xf32, #tpu.memory_space<vmem>>, vector<4x128xf32>
    %c52_215 = arith.constant 52 : index
    %c0_216 = arith.constant 0 : index
    %729 = vector.load %arg13[%c52_215, %c0_216] : memref<112x128xf32, #tpu.memory_space<vmem>>, vector<4x128xf32>
    %c56_217 = arith.constant 56 : index
    %c0_218 = arith.constant 0 : index
    %730 = vector.load %arg13[%c56_217, %c0_218] : memref<112x128xf32, #tpu.memory_space<vmem>>, vector<4x128xf32>
    %c60_219 = arith.constant 60 : index
    %c0_220 = arith.constant 0 : index
    %731 = vector.load %arg13[%c60_219, %c0_220] : memref<112x128xf32, #tpu.memory_space<vmem>>, vector<4x128xf32>
    %732 = vector.broadcast %0 : vector<1x128xf32> to vector<4x128xf32>
    %733 = arith.mulf %726, %732 : vector<4x128xf32>
    %cst_221 = arith.constant dense<0.000000e+00> : vector<4xf32>
    %734 = vector.multi_reduction <add>, %733, %cst_221 [1] : vector<4x128xf32> to vector<4xf32>
    %735 = vector.shape_cast %734 : vector<4xf32> to vector<4x1xf32>
    %736 = vector.broadcast %2 : vector<1x1xf32> to vector<4x1xf32>
    %737 = arith.addf %735, %736 : vector<4x1xf32>
    %cst_222 = arith.constant 0.000000e+00 : f32
    %738 = vector.broadcast %cst_222 : f32 to vector<4x1xf32>
    %739 = arith.maximumf %737, %738 : vector<4x1xf32>
    %740 = vector.broadcast %1 : vector<1x128xf32> to vector<4x128xf32>
    %741 = arith.mulf %726, %740 : vector<4x128xf32>
    %cst_223 = arith.constant dense<0.000000e+00> : vector<4xf32>
    %742 = vector.multi_reduction <add>, %741, %cst_223 [1] : vector<4x128xf32> to vector<4xf32>
    %743 = vector.shape_cast %742 : vector<4xf32> to vector<4x1xf32>
    %744 = vector.broadcast %3 : vector<1x1xf32> to vector<4x1xf32>
    %745 = arith.addf %743, %744 : vector<4x1xf32>
    %cst_224 = arith.constant 0.000000e+00 : f32
    %746 = vector.broadcast %cst_224 : f32 to vector<4x1xf32>
    %747 = arith.maximumf %745, %746 : vector<4x1xf32>
    %748 = vector.broadcast %739 : vector<4x1xf32> to vector<4x128xf32>
    %749 = vector.broadcast %4 : vector<1x128xf32> to vector<4x128xf32>
    %750 = arith.mulf %748, %749 : vector<4x128xf32>
    %751 = vector.broadcast %747 : vector<4x1xf32> to vector<4x128xf32>
    %752 = vector.broadcast %5 : vector<1x128xf32> to vector<4x128xf32>
    %753 = arith.mulf %751, %752 : vector<4x128xf32>
    %754 = arith.addf %750, %753 : vector<4x128xf32>
    %755 = vector.broadcast %6 : vector<1x128xf32> to vector<4x128xf32>
    %756 = arith.addf %754, %755 : vector<4x128xf32>
    %757 = math.tanh %756 : vector<4x128xf32>
    %758 = arith.mulf %757, %728 : vector<4x128xf32>
    %c64_i32_225 = arith.constant 64 : i32
    %759 = tpu.dynamic_rotate %758 by %c64_i32_225 dim 1 : vector<4x128xf32>, i32 -> vector<4x128xf32>
    %760 = arith.addf %758, %759 : vector<4x128xf32>
    %c32_i32_226 = arith.constant 32 : i32
    %761 = tpu.dynamic_rotate %760 by %c32_i32_226 dim 1 : vector<4x128xf32>, i32 -> vector<4x128xf32>
    %762 = arith.addf %760, %761 : vector<4x128xf32>
    %cst_227 = arith.constant 0.333333343 : f32
    %763 = vector.broadcast %cst_227 : f32 to vector<4x128xf32>
    %764 = arith.mulf %763, %762 : vector<4x128xf32>
    %765 = arith.addf %726, %764 : vector<4x128xf32>
    %766 = vector.broadcast %0 : vector<1x128xf32> to vector<4x128xf32>
    %767 = arith.mulf %765, %766 : vector<4x128xf32>
    %cst_228 = arith.constant dense<0.000000e+00> : vector<4xf32>
    %768 = vector.multi_reduction <add>, %767, %cst_228 [1] : vector<4x128xf32> to vector<4xf32>
    %769 = vector.shape_cast %768 : vector<4xf32> to vector<4x1xf32>
    %770 = vector.broadcast %2 : vector<1x1xf32> to vector<4x1xf32>
    %771 = arith.addf %769, %770 : vector<4x1xf32>
    %cst_229 = arith.constant 0.000000e+00 : f32
    %772 = vector.broadcast %cst_229 : f32 to vector<4x1xf32>
    %773 = arith.maximumf %771, %772 : vector<4x1xf32>
    %774 = vector.broadcast %1 : vector<1x128xf32> to vector<4x128xf32>
    %775 = arith.mulf %765, %774 : vector<4x128xf32>
    %cst_230 = arith.constant dense<0.000000e+00> : vector<4xf32>
    %776 = vector.multi_reduction <add>, %775, %cst_230 [1] : vector<4x128xf32> to vector<4xf32>
    %777 = vector.shape_cast %776 : vector<4xf32> to vector<4x1xf32>
    %778 = vector.broadcast %3 : vector<1x1xf32> to vector<4x1xf32>
    %779 = arith.addf %777, %778 : vector<4x1xf32>
    %cst_231 = arith.constant 0.000000e+00 : f32
    %780 = vector.broadcast %cst_231 : f32 to vector<4x1xf32>
    %781 = arith.maximumf %779, %780 : vector<4x1xf32>
    %782 = vector.broadcast %773 : vector<4x1xf32> to vector<4x128xf32>
    %783 = vector.broadcast %4 : vector<1x128xf32> to vector<4x128xf32>
    %784 = arith.mulf %782, %783 : vector<4x128xf32>
    %785 = vector.broadcast %781 : vector<4x1xf32> to vector<4x128xf32>
    %786 = vector.broadcast %5 : vector<1x128xf32> to vector<4x128xf32>
    %787 = arith.mulf %785, %786 : vector<4x128xf32>
    %788 = arith.addf %784, %787 : vector<4x128xf32>
    %789 = vector.broadcast %6 : vector<1x128xf32> to vector<4x128xf32>
    %790 = arith.addf %788, %789 : vector<4x128xf32>
    %791 = math.tanh %790 : vector<4x128xf32>
    %792 = arith.mulf %791, %729 : vector<4x128xf32>
    %c64_i32_232 = arith.constant 64 : i32
    %793 = tpu.dynamic_rotate %792 by %c64_i32_232 dim 1 : vector<4x128xf32>, i32 -> vector<4x128xf32>
    %794 = arith.addf %792, %793 : vector<4x128xf32>
    %c32_i32_233 = arith.constant 32 : i32
    %795 = tpu.dynamic_rotate %794 by %c32_i32_233 dim 1 : vector<4x128xf32>, i32 -> vector<4x128xf32>
    %796 = arith.addf %794, %795 : vector<4x128xf32>
    %cst_234 = arith.constant 0.333333343 : f32
    %797 = vector.broadcast %cst_234 : f32 to vector<4x128xf32>
    %798 = arith.mulf %797, %762 : vector<4x128xf32>
    %799 = arith.subf %796, %798 : vector<4x128xf32>
    %cst_235 = arith.constant 1.000000e+00 : f32
    %800 = vector.broadcast %cst_235 : f32 to vector<4x128xf32>
    %801 = arith.mulf %800, %799 : vector<4x128xf32>
    %802 = arith.addf %726, %801 : vector<4x128xf32>
    %803 = vector.broadcast %0 : vector<1x128xf32> to vector<4x128xf32>
    %804 = arith.mulf %802, %803 : vector<4x128xf32>
    %cst_236 = arith.constant dense<0.000000e+00> : vector<4xf32>
    %805 = vector.multi_reduction <add>, %804, %cst_236 [1] : vector<4x128xf32> to vector<4xf32>
    %806 = vector.shape_cast %805 : vector<4xf32> to vector<4x1xf32>
    %807 = vector.broadcast %2 : vector<1x1xf32> to vector<4x1xf32>
    %808 = arith.addf %806, %807 : vector<4x1xf32>
    %cst_237 = arith.constant 0.000000e+00 : f32
    %809 = vector.broadcast %cst_237 : f32 to vector<4x1xf32>
    %810 = arith.maximumf %808, %809 : vector<4x1xf32>
    %811 = vector.broadcast %1 : vector<1x128xf32> to vector<4x128xf32>
    %812 = arith.mulf %802, %811 : vector<4x128xf32>
    %cst_238 = arith.constant dense<0.000000e+00> : vector<4xf32>
    %813 = vector.multi_reduction <add>, %812, %cst_238 [1] : vector<4x128xf32> to vector<4xf32>
    %814 = vector.shape_cast %813 : vector<4xf32> to vector<4x1xf32>
    %815 = vector.broadcast %3 : vector<1x1xf32> to vector<4x1xf32>
    %816 = arith.addf %814, %815 : vector<4x1xf32>
    %cst_239 = arith.constant 0.000000e+00 : f32
    %817 = vector.broadcast %cst_239 : f32 to vector<4x1xf32>
    %818 = arith.maximumf %816, %817 : vector<4x1xf32>
    %819 = vector.broadcast %810 : vector<4x1xf32> to vector<4x128xf32>
    %820 = vector.broadcast %4 : vector<1x128xf32> to vector<4x128xf32>
    %821 = arith.mulf %819, %820 : vector<4x128xf32>
    %822 = vector.broadcast %818 : vector<4x1xf32> to vector<4x128xf32>
    %823 = vector.broadcast %5 : vector<1x128xf32> to vector<4x128xf32>
    %824 = arith.mulf %822, %823 : vector<4x128xf32>
    %825 = arith.addf %821, %824 : vector<4x128xf32>
    %826 = vector.broadcast %6 : vector<1x128xf32> to vector<4x128xf32>
    %827 = arith.addf %825, %826 : vector<4x128xf32>
    %828 = math.tanh %827 : vector<4x128xf32>
    %829 = arith.mulf %828, %730 : vector<4x128xf32>
    %c64_i32_240 = arith.constant 64 : i32
    %830 = tpu.dynamic_rotate %829 by %c64_i32_240 dim 1 : vector<4x128xf32>, i32 -> vector<4x128xf32>
    %831 = arith.addf %829, %830 : vector<4x128xf32>
    %c32_i32_241 = arith.constant 32 : i32
    %832 = tpu.dynamic_rotate %831 by %c32_i32_241 dim 1 : vector<4x128xf32>, i32 -> vector<4x128xf32>
    %833 = arith.addf %831, %832 : vector<4x128xf32>
    %834 = arith.subf %762, %796 : vector<4x128xf32>
    %835 = arith.addf %834, %833 : vector<4x128xf32>
    %cst_242 = arith.constant 1.000000e+00 : f32
    %836 = vector.broadcast %cst_242 : f32 to vector<4x128xf32>
    %837 = arith.mulf %836, %835 : vector<4x128xf32>
    %838 = arith.addf %726, %837 : vector<4x128xf32>
    %839 = vector.broadcast %0 : vector<1x128xf32> to vector<4x128xf32>
    %840 = arith.mulf %838, %839 : vector<4x128xf32>
    %cst_243 = arith.constant dense<0.000000e+00> : vector<4xf32>
    %841 = vector.multi_reduction <add>, %840, %cst_243 [1] : vector<4x128xf32> to vector<4xf32>
    %842 = vector.shape_cast %841 : vector<4xf32> to vector<4x1xf32>
    %843 = vector.broadcast %2 : vector<1x1xf32> to vector<4x1xf32>
    %844 = arith.addf %842, %843 : vector<4x1xf32>
    %cst_244 = arith.constant 0.000000e+00 : f32
    %845 = vector.broadcast %cst_244 : f32 to vector<4x1xf32>
    %846 = arith.maximumf %844, %845 : vector<4x1xf32>
    %847 = vector.broadcast %1 : vector<1x128xf32> to vector<4x128xf32>
    %848 = arith.mulf %838, %847 : vector<4x128xf32>
    %cst_245 = arith.constant dense<0.000000e+00> : vector<4xf32>
    %849 = vector.multi_reduction <add>, %848, %cst_245 [1] : vector<4x128xf32> to vector<4xf32>
    %850 = vector.shape_cast %849 : vector<4xf32> to vector<4x1xf32>
    %851 = vector.broadcast %3 : vector<1x1xf32> to vector<4x1xf32>
    %852 = arith.addf %850, %851 : vector<4x1xf32>
    %cst_246 = arith.constant 0.000000e+00 : f32
    %853 = vector.broadcast %cst_246 : f32 to vector<4x1xf32>
    %854 = arith.maximumf %852, %853 : vector<4x1xf32>
    %855 = vector.broadcast %846 : vector<4x1xf32> to vector<4x128xf32>
    %856 = vector.broadcast %4 : vector<1x128xf32> to vector<4x128xf32>
    %857 = arith.mulf %855, %856 : vector<4x128xf32>
    %858 = vector.broadcast %854 : vector<4x1xf32> to vector<4x128xf32>
    %859 = vector.broadcast %5 : vector<1x128xf32> to vector<4x128xf32>
    %860 = arith.mulf %858, %859 : vector<4x128xf32>
    %861 = arith.addf %857, %860 : vector<4x128xf32>
    %862 = vector.broadcast %6 : vector<1x128xf32> to vector<4x128xf32>
    %863 = arith.addf %861, %862 : vector<4x128xf32>
    %864 = math.tanh %863 : vector<4x128xf32>
    %865 = arith.mulf %864, %731 : vector<4x128xf32>
    %c64_i32_247 = arith.constant 64 : i32
    %866 = tpu.dynamic_rotate %865 by %c64_i32_247 dim 1 : vector<4x128xf32>, i32 -> vector<4x128xf32>
    %867 = arith.addf %865, %866 : vector<4x128xf32>
    %c32_i32_248 = arith.constant 32 : i32
    %868 = tpu.dynamic_rotate %867 by %c32_i32_248 dim 1 : vector<4x128xf32>, i32 -> vector<4x128xf32>
    %869 = arith.addf %867, %868 : vector<4x128xf32>
    %870 = arith.addf %796, %833 : vector<4x128xf32>
    %cst_249 = arith.constant 3.000000e+00 : f32
    %871 = vector.broadcast %cst_249 : f32 to vector<4x128xf32>
    %872 = arith.mulf %871, %870 : vector<4x128xf32>
    %873 = arith.addf %762, %872 : vector<4x128xf32>
    %874 = arith.addf %873, %869 : vector<4x128xf32>
    %cst_250 = arith.constant 1.250000e-01 : f32
    %875 = vector.broadcast %cst_250 : f32 to vector<4x128xf32>
    %876 = arith.mulf %874, %875 : vector<4x128xf32>
    %877 = arith.addf %726, %876 : vector<4x128xf32>
    %c16_251 = arith.constant 16 : index
    %c0_252 = arith.constant 0 : index
    %878 = vector.load %arg14[%c16_251, %c0_252] : memref<32x128xf32, #tpu.memory_space<vmem>>, vector<4x128xf32>
    tpu.vector_store %arg14[%c16_251, %c0_252], %877 {strides = array<i32>} : memref<32x128xf32, #tpu.memory_space<vmem>>, vector<4x128xf32>,
    %c64_253 = arith.constant 64 : index
    %c0_254 = arith.constant 0 : index
    %879 = vector.load %arg13[%c64_253, %c0_254] : memref<112x128xf32, #tpu.memory_space<vmem>>, vector<4x128xf32>
    %c68_255 = arith.constant 68 : index
    %c0_256 = arith.constant 0 : index
    %880 = vector.load %arg13[%c68_255, %c0_256] : memref<112x128xf32, #tpu.memory_space<vmem>>, vector<4x128xf32>
    %c72_257 = arith.constant 72 : index
    %c0_258 = arith.constant 0 : index
    %881 = vector.load %arg13[%c72_257, %c0_258] : memref<112x128xf32, #tpu.memory_space<vmem>>, vector<4x128xf32>
    %c76_259 = arith.constant 76 : index
    %c0_260 = arith.constant 0 : index
    %882 = vector.load %arg13[%c76_259, %c0_260] : memref<112x128xf32, #tpu.memory_space<vmem>>, vector<4x128xf32>
    %883 = vector.broadcast %0 : vector<1x128xf32> to vector<4x128xf32>
    %884 = arith.mulf %877, %883 : vector<4x128xf32>
    %cst_261 = arith.constant dense<0.000000e+00> : vector<4xf32>
    %885 = vector.multi_reduction <add>, %884, %cst_261 [1] : vector<4x128xf32> to vector<4xf32>
    %886 = vector.shape_cast %885 : vector<4xf32> to vector<4x1xf32>
    %887 = vector.broadcast %2 : vector<1x1xf32> to vector<4x1xf32>
    %888 = arith.addf %886, %887 : vector<4x1xf32>
    %cst_262 = arith.constant 0.000000e+00 : f32
    %889 = vector.broadcast %cst_262 : f32 to vector<4x1xf32>
    %890 = arith.maximumf %888, %889 : vector<4x1xf32>
    %891 = vector.broadcast %1 : vector<1x128xf32> to vector<4x128xf32>
    %892 = arith.mulf %877, %891 : vector<4x128xf32>
    %cst_263 = arith.constant dense<0.000000e+00> : vector<4xf32>
    %893 = vector.multi_reduction <add>, %892, %cst_263 [1] : vector<4x128xf32> to vector<4xf32>
    %894 = vector.shape_cast %893 : vector<4xf32> to vector<4x1xf32>
    %895 = vector.broadcast %3 : vector<1x1xf32> to vector<4x1xf32>
    %896 = arith.addf %894, %895 : vector<4x1xf32>
    %cst_264 = arith.constant 0.000000e+00 : f32
    %897 = vector.broadcast %cst_264 : f32 to vector<4x1xf32>
    %898 = arith.maximumf %896, %897 : vector<4x1xf32>
    %899 = vector.broadcast %890 : vector<4x1xf32> to vector<4x128xf32>
    %900 = vector.broadcast %4 : vector<1x128xf32> to vector<4x128xf32>
    %901 = arith.mulf %899, %900 : vector<4x128xf32>
    %902 = vector.broadcast %898 : vector<4x1xf32> to vector<4x128xf32>
    %903 = vector.broadcast %5 : vector<1x128xf32> to vector<4x128xf32>
    %904 = arith.mulf %902, %903 : vector<4x128xf32>
    %905 = arith.addf %901, %904 : vector<4x128xf32>
    %906 = vector.broadcast %6 : vector<1x128xf32> to vector<4x128xf32>
    %907 = arith.addf %905, %906 : vector<4x128xf32>
    %908 = math.tanh %907 : vector<4x128xf32>
    %909 = arith.mulf %908, %879 : vector<4x128xf32>
    %c64_i32_265 = arith.constant 64 : i32
    %910 = tpu.dynamic_rotate %909 by %c64_i32_265 dim 1 : vector<4x128xf32>, i32 -> vector<4x128xf32>
    %911 = arith.addf %909, %910 : vector<4x128xf32>
    %c32_i32_266 = arith.constant 32 : i32
    %912 = tpu.dynamic_rotate %911 by %c32_i32_266 dim 1 : vector<4x128xf32>, i32 -> vector<4x128xf32>
    %913 = arith.addf %911, %912 : vector<4x128xf32>
    %cst_267 = arith.constant 0.333333343 : f32
    %914 = vector.broadcast %cst_267 : f32 to vector<4x128xf32>
    %915 = arith.mulf %914, %913 : vector<4x128xf32>
    %916 = arith.addf %877, %915 : vector<4x128xf32>
    %917 = vector.broadcast %0 : vector<1x128xf32> to vector<4x128xf32>
    %918 = arith.mulf %916, %917 : vector<4x128xf32>
    %cst_268 = arith.constant dense<0.000000e+00> : vector<4xf32>
    %919 = vector.multi_reduction <add>, %918, %cst_268 [1] : vector<4x128xf32> to vector<4xf32>
    %920 = vector.shape_cast %919 : vector<4xf32> to vector<4x1xf32>
    %921 = vector.broadcast %2 : vector<1x1xf32> to vector<4x1xf32>
    %922 = arith.addf %920, %921 : vector<4x1xf32>
    %cst_269 = arith.constant 0.000000e+00 : f32
    %923 = vector.broadcast %cst_269 : f32 to vector<4x1xf32>
    %924 = arith.maximumf %922, %923 : vector<4x1xf32>
    %925 = vector.broadcast %1 : vector<1x128xf32> to vector<4x128xf32>
    %926 = arith.mulf %916, %925 : vector<4x128xf32>
    %cst_270 = arith.constant dense<0.000000e+00> : vector<4xf32>
    %927 = vector.multi_reduction <add>, %926, %cst_270 [1] : vector<4x128xf32> to vector<4xf32>
    %928 = vector.shape_cast %927 : vector<4xf32> to vector<4x1xf32>
    %929 = vector.broadcast %3 : vector<1x1xf32> to vector<4x1xf32>
    %930 = arith.addf %928, %929 : vector<4x1xf32>
    %cst_271 = arith.constant 0.000000e+00 : f32
    %931 = vector.broadcast %cst_271 : f32 to vector<4x1xf32>
    %932 = arith.maximumf %930, %931 : vector<4x1xf32>
    %933 = vector.broadcast %924 : vector<4x1xf32> to vector<4x128xf32>
    %934 = vector.broadcast %4 : vector<1x128xf32> to vector<4x128xf32>
    %935 = arith.mulf %933, %934 : vector<4x128xf32>
    %936 = vector.broadcast %932 : vector<4x1xf32> to vector<4x128xf32>
    %937 = vector.broadcast %5 : vector<1x128xf32> to vector<4x128xf32>
    %938 = arith.mulf %936, %937 : vector<4x128xf32>
    %939 = arith.addf %935, %938 : vector<4x128xf32>
    %940 = vector.broadcast %6 : vector<1x128xf32> to vector<4x128xf32>
    %941 = arith.addf %939, %940 : vector<4x128xf32>
    %942 = math.tanh %941 : vector<4x128xf32>
    %943 = arith.mulf %942, %880 : vector<4x128xf32>
    %c64_i32_272 = arith.constant 64 : i32
    %944 = tpu.dynamic_rotate %943 by %c64_i32_272 dim 1 : vector<4x128xf32>, i32 -> vector<4x128xf32>
    %945 = arith.addf %943, %944 : vector<4x128xf32>
    %c32_i32_273 = arith.constant 32 : i32
    %946 = tpu.dynamic_rotate %945 by %c32_i32_273 dim 1 : vector<4x128xf32>, i32 -> vector<4x128xf32>
    %947 = arith.addf %945, %946 : vector<4x128xf32>
    %cst_274 = arith.constant 0.333333343 : f32
    %948 = vector.broadcast %cst_274 : f32 to vector<4x128xf32>
    %949 = arith.mulf %948, %913 : vector<4x128xf32>
    %950 = arith.subf %947, %949 : vector<4x128xf32>
    %cst_275 = arith.constant 1.000000e+00 : f32
    %951 = vector.broadcast %cst_275 : f32 to vector<4x128xf32>
    %952 = arith.mulf %951, %950 : vector<4x128xf32>
    %953 = arith.addf %877, %952 : vector<4x128xf32>
    %954 = vector.broadcast %0 : vector<1x128xf32> to vector<4x128xf32>
    %955 = arith.mulf %953, %954 : vector<4x128xf32>
    %cst_276 = arith.constant dense<0.000000e+00> : vector<4xf32>
    %956 = vector.multi_reduction <add>, %955, %cst_276 [1] : vector<4x128xf32> to vector<4xf32>
    %957 = vector.shape_cast %956 : vector<4xf32> to vector<4x1xf32>
    %958 = vector.broadcast %2 : vector<1x1xf32> to vector<4x1xf32>
    %959 = arith.addf %957, %958 : vector<4x1xf32>
    %cst_277 = arith.constant 0.000000e+00 : f32
    %960 = vector.broadcast %cst_277 : f32 to vector<4x1xf32>
    %961 = arith.maximumf %959, %960 : vector<4x1xf32>
    %962 = vector.broadcast %1 : vector<1x128xf32> to vector<4x128xf32>
    %963 = arith.mulf %953, %962 : vector<4x128xf32>
    %cst_278 = arith.constant dense<0.000000e+00> : vector<4xf32>
    %964 = vector.multi_reduction <add>, %963, %cst_278 [1] : vector<4x128xf32> to vector<4xf32>
    %965 = vector.shape_cast %964 : vector<4xf32> to vector<4x1xf32>
    %966 = vector.broadcast %3 : vector<1x1xf32> to vector<4x1xf32>
    %967 = arith.addf %965, %966 : vector<4x1xf32>
    %cst_279 = arith.constant 0.000000e+00 : f32
    %968 = vector.broadcast %cst_279 : f32 to vector<4x1xf32>
    %969 = arith.maximumf %967, %968 : vector<4x1xf32>
    %970 = vector.broadcast %961 : vector<4x1xf32> to vector<4x128xf32>
    %971 = vector.broadcast %4 : vector<1x128xf32> to vector<4x128xf32>
    %972 = arith.mulf %970, %971 : vector<4x128xf32>
    %973 = vector.broadcast %969 : vector<4x1xf32> to vector<4x128xf32>
    %974 = vector.broadcast %5 : vector<1x128xf32> to vector<4x128xf32>
    %975 = arith.mulf %973, %974 : vector<4x128xf32>
    %976 = arith.addf %972, %975 : vector<4x128xf32>
    %977 = vector.broadcast %6 : vector<1x128xf32> to vector<4x128xf32>
    %978 = arith.addf %976, %977 : vector<4x128xf32>
    %979 = math.tanh %978 : vector<4x128xf32>
    %980 = arith.mulf %979, %881 : vector<4x128xf32>
    %c64_i32_280 = arith.constant 64 : i32
    %981 = tpu.dynamic_rotate %980 by %c64_i32_280 dim 1 : vector<4x128xf32>, i32 -> vector<4x128xf32>
    %982 = arith.addf %980, %981 : vector<4x128xf32>
    %c32_i32_281 = arith.constant 32 : i32
    %983 = tpu.dynamic_rotate %982 by %c32_i32_281 dim 1 : vector<4x128xf32>, i32 -> vector<4x128xf32>
    %984 = arith.addf %982, %983 : vector<4x128xf32>
    %985 = arith.subf %913, %947 : vector<4x128xf32>
    %986 = arith.addf %985, %984 : vector<4x128xf32>
    %cst_282 = arith.constant 1.000000e+00 : f32
    %987 = vector.broadcast %cst_282 : f32 to vector<4x128xf32>
    %988 = arith.mulf %987, %986 : vector<4x128xf32>
    %989 = arith.addf %877, %988 : vector<4x128xf32>
    %990 = vector.broadcast %0 : vector<1x128xf32> to vector<4x128xf32>
    %991 = arith.mulf %989, %990 : vector<4x128xf32>
    %cst_283 = arith.constant dense<0.000000e+00> : vector<4xf32>
    %992 = vector.multi_reduction <add>, %991, %cst_283 [1] : vector<4x128xf32> to vector<4xf32>
    %993 = vector.shape_cast %992 : vector<4xf32> to vector<4x1xf32>
    %994 = vector.broadcast %2 : vector<1x1xf32> to vector<4x1xf32>
    %995 = arith.addf %993, %994 : vector<4x1xf32>
    %cst_284 = arith.constant 0.000000e+00 : f32
    %996 = vector.broadcast %cst_284 : f32 to vector<4x1xf32>
    %997 = arith.maximumf %995, %996 : vector<4x1xf32>
    %998 = vector.broadcast %1 : vector<1x128xf32> to vector<4x128xf32>
    %999 = arith.mulf %989, %998 : vector<4x128xf32>
    %cst_285 = arith.constant dense<0.000000e+00> : vector<4xf32>
    %1000 = vector.multi_reduction <add>, %999, %cst_285 [1] : vector<4x128xf32> to vector<4xf32>
    %1001 = vector.shape_cast %1000 : vector<4xf32> to vector<4x1xf32>
    %1002 = vector.broadcast %3 : vector<1x1xf32> to vector<4x1xf32>
    %1003 = arith.addf %1001, %1002 : vector<4x1xf32>
    %cst_286 = arith.constant 0.000000e+00 : f32
    %1004 = vector.broadcast %cst_286 : f32 to vector<4x1xf32>
    %1005 = arith.maximumf %1003, %1004 : vector<4x1xf32>
    %1006 = vector.broadcast %997 : vector<4x1xf32> to vector<4x128xf32>
    %1007 = vector.broadcast %4 : vector<1x128xf32> to vector<4x128xf32>
    %1008 = arith.mulf %1006, %1007 : vector<4x128xf32>
    %1009 = vector.broadcast %1005 : vector<4x1xf32> to vector<4x128xf32>
    %1010 = vector.broadcast %5 : vector<1x128xf32> to vector<4x128xf32>
    %1011 = arith.mulf %1009, %1010 : vector<4x128xf32>
    %1012 = arith.addf %1008, %1011 : vector<4x128xf32>
    %1013 = vector.broadcast %6 : vector<1x128xf32> to vector<4x128xf32>
    %1014 = arith.addf %1012, %1013 : vector<4x128xf32>
    %1015 = math.tanh %1014 : vector<4x128xf32>
    %1016 = arith.mulf %1015, %882 : vector<4x128xf32>
    %c64_i32_287 = arith.constant 64 : i32
    %1017 = tpu.dynamic_rotate %1016 by %c64_i32_287 dim 1 : vector<4x128xf32>, i32 -> vector<4x128xf32>
    %1018 = arith.addf %1016, %1017 : vector<4x128xf32>
    %c32_i32_288 = arith.constant 32 : i32
    %1019 = tpu.dynamic_rotate %1018 by %c32_i32_288 dim 1 : vector<4x128xf32>, i32 -> vector<4x128xf32>
    %1020 = arith.addf %1018, %1019 : vector<4x128xf32>
    %1021 = arith.addf %947, %984 : vector<4x128xf32>
    %cst_289 = arith.constant 3.000000e+00 : f32
    %1022 = vector.broadcast %cst_289 : f32 to vector<4x128xf32>
    %1023 = arith.mulf %1022, %1021 : vector<4x128xf32>
    %1024 = arith.addf %913, %1023 : vector<4x128xf32>
    %1025 = arith.addf %1024, %1020 : vector<4x128xf32>
    %cst_290 = arith.constant 1.250000e-01 : f32
    %1026 = vector.broadcast %cst_290 : f32 to vector<4x128xf32>
    %1027 = arith.mulf %1025, %1026 : vector<4x128xf32>
    %1028 = arith.addf %877, %1027 : vector<4x128xf32>
    %c20_291 = arith.constant 20 : index
    %c0_292 = arith.constant 0 : index
    %1029 = vector.load %arg14[%c20_291, %c0_292] : memref<32x128xf32, #tpu.memory_space<vmem>>, vector<4x128xf32>
    tpu.vector_store %arg14[%c20_291, %c0_292], %1028 {strides = array<i32>} : memref<32x128xf32, #tpu.memory_space<vmem>>, vector<4x128xf32>,
    %c80_293 = arith.constant 80 : index
    %c0_294 = arith.constant 0 : index
    %1030 = vector.load %arg13[%c80_293, %c0_294] : memref<112x128xf32, #tpu.memory_space<vmem>>, vector<4x128xf32>
    %c84_295 = arith.constant 84 : index
    %c0_296 = arith.constant 0 : index
    %1031 = vector.load %arg13[%c84_295, %c0_296] : memref<112x128xf32, #tpu.memory_space<vmem>>, vector<4x128xf32>
    %c88_297 = arith.constant 88 : index
    %c0_298 = arith.constant 0 : index
    %1032 = vector.load %arg13[%c88_297, %c0_298] : memref<112x128xf32, #tpu.memory_space<vmem>>, vector<4x128xf32>
    %c92_299 = arith.constant 92 : index
    %c0_300 = arith.constant 0 : index
    %1033 = vector.load %arg13[%c92_299, %c0_300] : memref<112x128xf32, #tpu.memory_space<vmem>>, vector<4x128xf32>
    %1034 = vector.broadcast %0 : vector<1x128xf32> to vector<4x128xf32>
    %1035 = arith.mulf %1028, %1034 : vector<4x128xf32>
    %cst_301 = arith.constant dense<0.000000e+00> : vector<4xf32>
    %1036 = vector.multi_reduction <add>, %1035, %cst_301 [1] : vector<4x128xf32> to vector<4xf32>
    %1037 = vector.shape_cast %1036 : vector<4xf32> to vector<4x1xf32>
    %1038 = vector.broadcast %2 : vector<1x1xf32> to vector<4x1xf32>
    %1039 = arith.addf %1037, %1038 : vector<4x1xf32>
    %cst_302 = arith.constant 0.000000e+00 : f32
    %1040 = vector.broadcast %cst_302 : f32 to vector<4x1xf32>
    %1041 = arith.maximumf %1039, %1040 : vector<4x1xf32>
    %1042 = vector.broadcast %1 : vector<1x128xf32> to vector<4x128xf32>
    %1043 = arith.mulf %1028, %1042 : vector<4x128xf32>
    %cst_303 = arith.constant dense<0.000000e+00> : vector<4xf32>
    %1044 = vector.multi_reduction <add>, %1043, %cst_303 [1] : vector<4x128xf32> to vector<4xf32>
    %1045 = vector.shape_cast %1044 : vector<4xf32> to vector<4x1xf32>
    %1046 = vector.broadcast %3 : vector<1x1xf32> to vector<4x1xf32>
    %1047 = arith.addf %1045, %1046 : vector<4x1xf32>
    %cst_304 = arith.constant 0.000000e+00 : f32
    %1048 = vector.broadcast %cst_304 : f32 to vector<4x1xf32>
    %1049 = arith.maximumf %1047, %1048 : vector<4x1xf32>
    %1050 = vector.broadcast %1041 : vector<4x1xf32> to vector<4x128xf32>
    %1051 = vector.broadcast %4 : vector<1x128xf32> to vector<4x128xf32>
    %1052 = arith.mulf %1050, %1051 : vector<4x128xf32>
    %1053 = vector.broadcast %1049 : vector<4x1xf32> to vector<4x128xf32>
    %1054 = vector.broadcast %5 : vector<1x128xf32> to vector<4x128xf32>
    %1055 = arith.mulf %1053, %1054 : vector<4x128xf32>
    %1056 = arith.addf %1052, %1055 : vector<4x128xf32>
    %1057 = vector.broadcast %6 : vector<1x128xf32> to vector<4x128xf32>
    %1058 = arith.addf %1056, %1057 : vector<4x128xf32>
    %1059 = math.tanh %1058 : vector<4x128xf32>
    %1060 = arith.mulf %1059, %1030 : vector<4x128xf32>
    %c64_i32_305 = arith.constant 64 : i32
    %1061 = tpu.dynamic_rotate %1060 by %c64_i32_305 dim 1 : vector<4x128xf32>, i32 -> vector<4x128xf32>
    %1062 = arith.addf %1060, %1061 : vector<4x128xf32>
    %c32_i32_306 = arith.constant 32 : i32
    %1063 = tpu.dynamic_rotate %1062 by %c32_i32_306 dim 1 : vector<4x128xf32>, i32 -> vector<4x128xf32>
    %1064 = arith.addf %1062, %1063 : vector<4x128xf32>
    %cst_307 = arith.constant 0.333333343 : f32
    %1065 = vector.broadcast %cst_307 : f32 to vector<4x128xf32>
    %1066 = arith.mulf %1065, %1064 : vector<4x128xf32>
    %1067 = arith.addf %1028, %1066 : vector<4x128xf32>
    %1068 = vector.broadcast %0 : vector<1x128xf32> to vector<4x128xf32>
    %1069 = arith.mulf %1067, %1068 : vector<4x128xf32>
    %cst_308 = arith.constant dense<0.000000e+00> : vector<4xf32>
    %1070 = vector.multi_reduction <add>, %1069, %cst_308 [1] : vector<4x128xf32> to vector<4xf32>
    %1071 = vector.shape_cast %1070 : vector<4xf32> to vector<4x1xf32>
    %1072 = vector.broadcast %2 : vector<1x1xf32> to vector<4x1xf32>
    %1073 = arith.addf %1071, %1072 : vector<4x1xf32>
    %cst_309 = arith.constant 0.000000e+00 : f32
    %1074 = vector.broadcast %cst_309 : f32 to vector<4x1xf32>
    %1075 = arith.maximumf %1073, %1074 : vector<4x1xf32>
    %1076 = vector.broadcast %1 : vector<1x128xf32> to vector<4x128xf32>
    %1077 = arith.mulf %1067, %1076 : vector<4x128xf32>
    %cst_310 = arith.constant dense<0.000000e+00> : vector<4xf32>
    %1078 = vector.multi_reduction <add>, %1077, %cst_310 [1] : vector<4x128xf32> to vector<4xf32>
    %1079 = vector.shape_cast %1078 : vector<4xf32> to vector<4x1xf32>
    %1080 = vector.broadcast %3 : vector<1x1xf32> to vector<4x1xf32>
    %1081 = arith.addf %1079, %1080 : vector<4x1xf32>
    %cst_311 = arith.constant 0.000000e+00 : f32
    %1082 = vector.broadcast %cst_311 : f32 to vector<4x1xf32>
    %1083 = arith.maximumf %1081, %1082 : vector<4x1xf32>
    %1084 = vector.broadcast %1075 : vector<4x1xf32> to vector<4x128xf32>
    %1085 = vector.broadcast %4 : vector<1x128xf32> to vector<4x128xf32>
    %1086 = arith.mulf %1084, %1085 : vector<4x128xf32>
    %1087 = vector.broadcast %1083 : vector<4x1xf32> to vector<4x128xf32>
    %1088 = vector.broadcast %5 : vector<1x128xf32> to vector<4x128xf32>
    %1089 = arith.mulf %1087, %1088 : vector<4x128xf32>
    %1090 = arith.addf %1086, %1089 : vector<4x128xf32>
    %1091 = vector.broadcast %6 : vector<1x128xf32> to vector<4x128xf32>
    %1092 = arith.addf %1090, %1091 : vector<4x128xf32>
    %1093 = math.tanh %1092 : vector<4x128xf32>
    %1094 = arith.mulf %1093, %1031 : vector<4x128xf32>
    %c64_i32_312 = arith.constant 64 : i32
    %1095 = tpu.dynamic_rotate %1094 by %c64_i32_312 dim 1 : vector<4x128xf32>, i32 -> vector<4x128xf32>
    %1096 = arith.addf %1094, %1095 : vector<4x128xf32>
    %c32_i32_313 = arith.constant 32 : i32
    %1097 = tpu.dynamic_rotate %1096 by %c32_i32_313 dim 1 : vector<4x128xf32>, i32 -> vector<4x128xf32>
    %1098 = arith.addf %1096, %1097 : vector<4x128xf32>
    %cst_314 = arith.constant 0.333333343 : f32
    %1099 = vector.broadcast %cst_314 : f32 to vector<4x128xf32>
    %1100 = arith.mulf %1099, %1064 : vector<4x128xf32>
    %1101 = arith.subf %1098, %1100 : vector<4x128xf32>
    %cst_315 = arith.constant 1.000000e+00 : f32
    %1102 = vector.broadcast %cst_315 : f32 to vector<4x128xf32>
    %1103 = arith.mulf %1102, %1101 : vector<4x128xf32>
    %1104 = arith.addf %1028, %1103 : vector<4x128xf32>
    %1105 = vector.broadcast %0 : vector<1x128xf32> to vector<4x128xf32>
    %1106 = arith.mulf %1104, %1105 : vector<4x128xf32>
    %cst_316 = arith.constant dense<0.000000e+00> : vector<4xf32>
    %1107 = vector.multi_reduction <add>, %1106, %cst_316 [1] : vector<4x128xf32> to vector<4xf32>
    %1108 = vector.shape_cast %1107 : vector<4xf32> to vector<4x1xf32>
    %1109 = vector.broadcast %2 : vector<1x1xf32> to vector<4x1xf32>
    %1110 = arith.addf %1108, %1109 : vector<4x1xf32>
    %cst_317 = arith.constant 0.000000e+00 : f32
    %1111 = vector.broadcast %cst_317 : f32 to vector<4x1xf32>
    %1112 = arith.maximumf %1110, %1111 : vector<4x1xf32>
    %1113 = vector.broadcast %1 : vector<1x128xf32> to vector<4x128xf32>
    %1114 = arith.mulf %1104, %1113 : vector<4x128xf32>
    %cst_318 = arith.constant dense<0.000000e+00> : vector<4xf32>
    %1115 = vector.multi_reduction <add>, %1114, %cst_318 [1] : vector<4x128xf32> to vector<4xf32>
    %1116 = vector.shape_cast %1115 : vector<4xf32> to vector<4x1xf32>
    %1117 = vector.broadcast %3 : vector<1x1xf32> to vector<4x1xf32>
    %1118 = arith.addf %1116, %1117 : vector<4x1xf32>
    %cst_319 = arith.constant 0.000000e+00 : f32
    %1119 = vector.broadcast %cst_319 : f32 to vector<4x1xf32>
    %1120 = arith.maximumf %1118, %1119 : vector<4x1xf32>
    %1121 = vector.broadcast %1112 : vector<4x1xf32> to vector<4x128xf32>
    %1122 = vector.broadcast %4 : vector<1x128xf32> to vector<4x128xf32>
    %1123 = arith.mulf %1121, %1122 : vector<4x128xf32>
    %1124 = vector.broadcast %1120 : vector<4x1xf32> to vector<4x128xf32>
    %1125 = vector.broadcast %5 : vector<1x128xf32> to vector<4x128xf32>
    %1126 = arith.mulf %1124, %1125 : vector<4x128xf32>
    %1127 = arith.addf %1123, %1126 : vector<4x128xf32>
    %1128 = vector.broadcast %6 : vector<1x128xf32> to vector<4x128xf32>
    %1129 = arith.addf %1127, %1128 : vector<4x128xf32>
    %1130 = math.tanh %1129 : vector<4x128xf32>
    %1131 = arith.mulf %1130, %1032 : vector<4x128xf32>
    %c64_i32_320 = arith.constant 64 : i32
    %1132 = tpu.dynamic_rotate %1131 by %c64_i32_320 dim 1 : vector<4x128xf32>, i32 -> vector<4x128xf32>
    %1133 = arith.addf %1131, %1132 : vector<4x128xf32>
    %c32_i32_321 = arith.constant 32 : i32
    %1134 = tpu.dynamic_rotate %1133 by %c32_i32_321 dim 1 : vector<4x128xf32>, i32 -> vector<4x128xf32>
    %1135 = arith.addf %1133, %1134 : vector<4x128xf32>
    %1136 = arith.subf %1064, %1098 : vector<4x128xf32>
    %1137 = arith.addf %1136, %1135 : vector<4x128xf32>
    %cst_322 = arith.constant 1.000000e+00 : f32
    %1138 = vector.broadcast %cst_322 : f32 to vector<4x128xf32>
    %1139 = arith.mulf %1138, %1137 : vector<4x128xf32>
    %1140 = arith.addf %1028, %1139 : vector<4x128xf32>
    %1141 = vector.broadcast %0 : vector<1x128xf32> to vector<4x128xf32>
    %1142 = arith.mulf %1140, %1141 : vector<4x128xf32>
    %cst_323 = arith.constant dense<0.000000e+00> : vector<4xf32>
    %1143 = vector.multi_reduction <add>, %1142, %cst_323 [1] : vector<4x128xf32> to vector<4xf32>
    %1144 = vector.shape_cast %1143 : vector<4xf32> to vector<4x1xf32>
    %1145 = vector.broadcast %2 : vector<1x1xf32> to vector<4x1xf32>
    %1146 = arith.addf %1144, %1145 : vector<4x1xf32>
    %cst_324 = arith.constant 0.000000e+00 : f32
    %1147 = vector.broadcast %cst_324 : f32 to vector<4x1xf32>
    %1148 = arith.maximumf %1146, %1147 : vector<4x1xf32>
    %1149 = vector.broadcast %1 : vector<1x128xf32> to vector<4x128xf32>
    %1150 = arith.mulf %1140, %1149 : vector<4x128xf32>
    %cst_325 = arith.constant dense<0.000000e+00> : vector<4xf32>
    %1151 = vector.multi_reduction <add>, %1150, %cst_325 [1] : vector<4x128xf32> to vector<4xf32>
    %1152 = vector.shape_cast %1151 : vector<4xf32> to vector<4x1xf32>
    %1153 = vector.broadcast %3 : vector<1x1xf32> to vector<4x1xf32>
    %1154 = arith.addf %1152, %1153 : vector<4x1xf32>
    %cst_326 = arith.constant 0.000000e+00 : f32
    %1155 = vector.broadcast %cst_326 : f32 to vector<4x1xf32>
    %1156 = arith.maximumf %1154, %1155 : vector<4x1xf32>
    %1157 = vector.broadcast %1148 : vector<4x1xf32> to vector<4x128xf32>
    %1158 = vector.broadcast %4 : vector<1x128xf32> to vector<4x128xf32>
    %1159 = arith.mulf %1157, %1158 : vector<4x128xf32>
    %1160 = vector.broadcast %1156 : vector<4x1xf32> to vector<4x128xf32>
    %1161 = vector.broadcast %5 : vector<1x128xf32> to vector<4x128xf32>
    %1162 = arith.mulf %1160, %1161 : vector<4x128xf32>
    %1163 = arith.addf %1159, %1162 : vector<4x128xf32>
    %1164 = vector.broadcast %6 : vector<1x128xf32> to vector<4x128xf32>
    %1165 = arith.addf %1163, %1164 : vector<4x128xf32>
    %1166 = math.tanh %1165 : vector<4x128xf32>
    %1167 = arith.mulf %1166, %1033 : vector<4x128xf32>
    %c64_i32_327 = arith.constant 64 : i32
    %1168 = tpu.dynamic_rotate %1167 by %c64_i32_327 dim 1 : vector<4x128xf32>, i32 -> vector<4x128xf32>
    %1169 = arith.addf %1167, %1168 : vector<4x128xf32>
    %c32_i32_328 = arith.constant 32 : i32
    %1170 = tpu.dynamic_rotate %1169 by %c32_i32_328 dim 1 : vector<4x128xf32>, i32 -> vector<4x128xf32>
    %1171 = arith.addf %1169, %1170 : vector<4x128xf32>
    %1172 = arith.addf %1098, %1135 : vector<4x128xf32>
    %cst_329 = arith.constant 3.000000e+00 : f32
    %1173 = vector.broadcast %cst_329 : f32 to vector<4x128xf32>
    %1174 = arith.mulf %1173, %1172 : vector<4x128xf32>
    %1175 = arith.addf %1064, %1174 : vector<4x128xf32>
    %1176 = arith.addf %1175, %1171 : vector<4x128xf32>
    %cst_330 = arith.constant 1.250000e-01 : f32
    %1177 = vector.broadcast %cst_330 : f32 to vector<4x128xf32>
    %1178 = arith.mulf %1176, %1177 : vector<4x128xf32>
    %1179 = arith.addf %1028, %1178 : vector<4x128xf32>
    %c24_331 = arith.constant 24 : index
    %c0_332 = arith.constant 0 : index
    %1180 = vector.load %arg14[%c24_331, %c0_332] : memref<32x128xf32, #tpu.memory_space<vmem>>, vector<4x128xf32>
    tpu.vector_store %arg14[%c24_331, %c0_332], %1179 {strides = array<i32>} : memref<32x128xf32, #tpu.memory_space<vmem>>, vector<4x128xf32>,
    %c96_333 = arith.constant 96 : index
    %c0_334 = arith.constant 0 : index
    %1181 = vector.load %arg13[%c96_333, %c0_334] : memref<112x128xf32, #tpu.memory_space<vmem>>, vector<4x128xf32>
    %c100_335 = arith.constant 100 : index
    %c0_336 = arith.constant 0 : index
    %1182 = vector.load %arg13[%c100_335, %c0_336] : memref<112x128xf32, #tpu.memory_space<vmem>>, vector<4x128xf32>
    %c104_337 = arith.constant 104 : index
    %c0_338 = arith.constant 0 : index
    %1183 = vector.load %arg13[%c104_337, %c0_338] : memref<112x128xf32, #tpu.memory_space<vmem>>, vector<4x128xf32>
    %c108_339 = arith.constant 108 : index
    %c0_340 = arith.constant 0 : index
    %1184 = vector.load %arg13[%c108_339, %c0_340] : memref<112x128xf32, #tpu.memory_space<vmem>>, vector<4x128xf32>
    %1185 = vector.broadcast %0 : vector<1x128xf32> to vector<4x128xf32>
    %1186 = arith.mulf %1179, %1185 : vector<4x128xf32>
    %cst_341 = arith.constant dense<0.000000e+00> : vector<4xf32>
    %1187 = vector.multi_reduction <add>, %1186, %cst_341 [1] : vector<4x128xf32> to vector<4xf32>
    %1188 = vector.shape_cast %1187 : vector<4xf32> to vector<4x1xf32>
    %1189 = vector.broadcast %2 : vector<1x1xf32> to vector<4x1xf32>
    %1190 = arith.addf %1188, %1189 : vector<4x1xf32>
    %cst_342 = arith.constant 0.000000e+00 : f32
    %1191 = vector.broadcast %cst_342 : f32 to vector<4x1xf32>
    %1192 = arith.maximumf %1190, %1191 : vector<4x1xf32>
    %1193 = vector.broadcast %1 : vector<1x128xf32> to vector<4x128xf32>
    %1194 = arith.mulf %1179, %1193 : vector<4x128xf32>
    %cst_343 = arith.constant dense<0.000000e+00> : vector<4xf32>
    %1195 = vector.multi_reduction <add>, %1194, %cst_343 [1] : vector<4x128xf32> to vector<4xf32>
    %1196 = vector.shape_cast %1195 : vector<4xf32> to vector<4x1xf32>
    %1197 = vector.broadcast %3 : vector<1x1xf32> to vector<4x1xf32>
    %1198 = arith.addf %1196, %1197 : vector<4x1xf32>
    %cst_344 = arith.constant 0.000000e+00 : f32
    %1199 = vector.broadcast %cst_344 : f32 to vector<4x1xf32>
    %1200 = arith.maximumf %1198, %1199 : vector<4x1xf32>
    %1201 = vector.broadcast %1192 : vector<4x1xf32> to vector<4x128xf32>
    %1202 = vector.broadcast %4 : vector<1x128xf32> to vector<4x128xf32>
    %1203 = arith.mulf %1201, %1202 : vector<4x128xf32>
    %1204 = vector.broadcast %1200 : vector<4x1xf32> to vector<4x128xf32>
    %1205 = vector.broadcast %5 : vector<1x128xf32> to vector<4x128xf32>
    %1206 = arith.mulf %1204, %1205 : vector<4x128xf32>
    %1207 = arith.addf %1203, %1206 : vector<4x128xf32>
    %1208 = vector.broadcast %6 : vector<1x128xf32> to vector<4x128xf32>
    %1209 = arith.addf %1207, %1208 : vector<4x128xf32>
    %1210 = math.tanh %1209 : vector<4x128xf32>
    %1211 = arith.mulf %1210, %1181 : vector<4x128xf32>
    %c64_i32_345 = arith.constant 64 : i32
    %1212 = tpu.dynamic_rotate %1211 by %c64_i32_345 dim 1 : vector<4x128xf32>, i32 -> vector<4x128xf32>
    %1213 = arith.addf %1211, %1212 : vector<4x128xf32>
    %c32_i32_346 = arith.constant 32 : i32
    %1214 = tpu.dynamic_rotate %1213 by %c32_i32_346 dim 1 : vector<4x128xf32>, i32 -> vector<4x128xf32>
    %1215 = arith.addf %1213, %1214 : vector<4x128xf32>
    %cst_347 = arith.constant 0.333333343 : f32
    %1216 = vector.broadcast %cst_347 : f32 to vector<4x128xf32>
    %1217 = arith.mulf %1216, %1215 : vector<4x128xf32>
    %1218 = arith.addf %1179, %1217 : vector<4x128xf32>
    %1219 = vector.broadcast %0 : vector<1x128xf32> to vector<4x128xf32>
    %1220 = arith.mulf %1218, %1219 : vector<4x128xf32>
    %cst_348 = arith.constant dense<0.000000e+00> : vector<4xf32>
    %1221 = vector.multi_reduction <add>, %1220, %cst_348 [1] : vector<4x128xf32> to vector<4xf32>
    %1222 = vector.shape_cast %1221 : vector<4xf32> to vector<4x1xf32>
    %1223 = vector.broadcast %2 : vector<1x1xf32> to vector<4x1xf32>
    %1224 = arith.addf %1222, %1223 : vector<4x1xf32>
    %cst_349 = arith.constant 0.000000e+00 : f32
    %1225 = vector.broadcast %cst_349 : f32 to vector<4x1xf32>
    %1226 = arith.maximumf %1224, %1225 : vector<4x1xf32>
    %1227 = vector.broadcast %1 : vector<1x128xf32> to vector<4x128xf32>
    %1228 = arith.mulf %1218, %1227 : vector<4x128xf32>
    %cst_350 = arith.constant dense<0.000000e+00> : vector<4xf32>
    %1229 = vector.multi_reduction <add>, %1228, %cst_350 [1] : vector<4x128xf32> to vector<4xf32>
    %1230 = vector.shape_cast %1229 : vector<4xf32> to vector<4x1xf32>
    %1231 = vector.broadcast %3 : vector<1x1xf32> to vector<4x1xf32>
    %1232 = arith.addf %1230, %1231 : vector<4x1xf32>
    %cst_351 = arith.constant 0.000000e+00 : f32
    %1233 = vector.broadcast %cst_351 : f32 to vector<4x1xf32>
    %1234 = arith.maximumf %1232, %1233 : vector<4x1xf32>
    %1235 = vector.broadcast %1226 : vector<4x1xf32> to vector<4x128xf32>
    %1236 = vector.broadcast %4 : vector<1x128xf32> to vector<4x128xf32>
    %1237 = arith.mulf %1235, %1236 : vector<4x128xf32>
    %1238 = vector.broadcast %1234 : vector<4x1xf32> to vector<4x128xf32>
    %1239 = vector.broadcast %5 : vector<1x128xf32> to vector<4x128xf32>
    %1240 = arith.mulf %1238, %1239 : vector<4x128xf32>
    %1241 = arith.addf %1237, %1240 : vector<4x128xf32>
    %1242 = vector.broadcast %6 : vector<1x128xf32> to vector<4x128xf32>
    %1243 = arith.addf %1241, %1242 : vector<4x128xf32>
    %1244 = math.tanh %1243 : vector<4x128xf32>
    %1245 = arith.mulf %1244, %1182 : vector<4x128xf32>
    %c64_i32_352 = arith.constant 64 : i32
    %1246 = tpu.dynamic_rotate %1245 by %c64_i32_352 dim 1 : vector<4x128xf32>, i32 -> vector<4x128xf32>
    %1247 = arith.addf %1245, %1246 : vector<4x128xf32>
    %c32_i32_353 = arith.constant 32 : i32
    %1248 = tpu.dynamic_rotate %1247 by %c32_i32_353 dim 1 : vector<4x128xf32>, i32 -> vector<4x128xf32>
    %1249 = arith.addf %1247, %1248 : vector<4x128xf32>
    %cst_354 = arith.constant 0.333333343 : f32
    %1250 = vector.broadcast %cst_354 : f32 to vector<4x128xf32>
    %1251 = arith.mulf %1250, %1215 : vector<4x128xf32>
    %1252 = arith.subf %1249, %1251 : vector<4x128xf32>
    %cst_355 = arith.constant 1.000000e+00 : f32
    %1253 = vector.broadcast %cst_355 : f32 to vector<4x128xf32>
    %1254 = arith.mulf %1253, %1252 : vector<4x128xf32>
    %1255 = arith.addf %1179, %1254 : vector<4x128xf32>
    %1256 = vector.broadcast %0 : vector<1x128xf32> to vector<4x128xf32>
    %1257 = arith.mulf %1255, %1256 : vector<4x128xf32>
    %cst_356 = arith.constant dense<0.000000e+00> : vector<4xf32>
    %1258 = vector.multi_reduction <add>, %1257, %cst_356 [1] : vector<4x128xf32> to vector<4xf32>
    %1259 = vector.shape_cast %1258 : vector<4xf32> to vector<4x1xf32>
    %1260 = vector.broadcast %2 : vector<1x1xf32> to vector<4x1xf32>
    %1261 = arith.addf %1259, %1260 : vector<4x1xf32>
    %cst_357 = arith.constant 0.000000e+00 : f32
    %1262 = vector.broadcast %cst_357 : f32 to vector<4x1xf32>
    %1263 = arith.maximumf %1261, %1262 : vector<4x1xf32>
    %1264 = vector.broadcast %1 : vector<1x128xf32> to vector<4x128xf32>
    %1265 = arith.mulf %1255, %1264 : vector<4x128xf32>
    %cst_358 = arith.constant dense<0.000000e+00> : vector<4xf32>
    %1266 = vector.multi_reduction <add>, %1265, %cst_358 [1] : vector<4x128xf32> to vector<4xf32>
    %1267 = vector.shape_cast %1266 : vector<4xf32> to vector<4x1xf32>
    %1268 = vector.broadcast %3 : vector<1x1xf32> to vector<4x1xf32>
    %1269 = arith.addf %1267, %1268 : vector<4x1xf32>
    %cst_359 = arith.constant 0.000000e+00 : f32
    %1270 = vector.broadcast %cst_359 : f32 to vector<4x1xf32>
    %1271 = arith.maximumf %1269, %1270 : vector<4x1xf32>
    %1272 = vector.broadcast %1263 : vector<4x1xf32> to vector<4x128xf32>
    %1273 = vector.broadcast %4 : vector<1x128xf32> to vector<4x128xf32>
    %1274 = arith.mulf %1272, %1273 : vector<4x128xf32>
    %1275 = vector.broadcast %1271 : vector<4x1xf32> to vector<4x128xf32>
    %1276 = vector.broadcast %5 : vector<1x128xf32> to vector<4x128xf32>
    %1277 = arith.mulf %1275, %1276 : vector<4x128xf32>
    %1278 = arith.addf %1274, %1277 : vector<4x128xf32>
    %1279 = vector.broadcast %6 : vector<1x128xf32> to vector<4x128xf32>
    %1280 = arith.addf %1278, %1279 : vector<4x128xf32>
    %1281 = math.tanh %1280 : vector<4x128xf32>
    %1282 = arith.mulf %1281, %1183 : vector<4x128xf32>
    %c64_i32_360 = arith.constant 64 : i32
    %1283 = tpu.dynamic_rotate %1282 by %c64_i32_360 dim 1 : vector<4x128xf32>, i32 -> vector<4x128xf32>
    %1284 = arith.addf %1282, %1283 : vector<4x128xf32>
    %c32_i32_361 = arith.constant 32 : i32
    %1285 = tpu.dynamic_rotate %1284 by %c32_i32_361 dim 1 : vector<4x128xf32>, i32 -> vector<4x128xf32>
    %1286 = arith.addf %1284, %1285 : vector<4x128xf32>
    %1287 = arith.subf %1215, %1249 : vector<4x128xf32>
    %1288 = arith.addf %1287, %1286 : vector<4x128xf32>
    %cst_362 = arith.constant 1.000000e+00 : f32
    %1289 = vector.broadcast %cst_362 : f32 to vector<4x128xf32>
    %1290 = arith.mulf %1289, %1288 : vector<4x128xf32>
    %1291 = arith.addf %1179, %1290 : vector<4x128xf32>
    %1292 = vector.broadcast %0 : vector<1x128xf32> to vector<4x128xf32>
    %1293 = arith.mulf %1291, %1292 : vector<4x128xf32>
    %cst_363 = arith.constant dense<0.000000e+00> : vector<4xf32>
    %1294 = vector.multi_reduction <add>, %1293, %cst_363 [1] : vector<4x128xf32> to vector<4xf32>
    %1295 = vector.shape_cast %1294 : vector<4xf32> to vector<4x1xf32>
    %1296 = vector.broadcast %2 : vector<1x1xf32> to vector<4x1xf32>
    %1297 = arith.addf %1295, %1296 : vector<4x1xf32>
    %cst_364 = arith.constant 0.000000e+00 : f32
    %1298 = vector.broadcast %cst_364 : f32 to vector<4x1xf32>
    %1299 = arith.maximumf %1297, %1298 : vector<4x1xf32>
    %1300 = vector.broadcast %1 : vector<1x128xf32> to vector<4x128xf32>
    %1301 = arith.mulf %1291, %1300 : vector<4x128xf32>
    %cst_365 = arith.constant dense<0.000000e+00> : vector<4xf32>
    %1302 = vector.multi_reduction <add>, %1301, %cst_365 [1] : vector<4x128xf32> to vector<4xf32>
    %1303 = vector.shape_cast %1302 : vector<4xf32> to vector<4x1xf32>
    %1304 = vector.broadcast %3 : vector<1x1xf32> to vector<4x1xf32>
    %1305 = arith.addf %1303, %1304 : vector<4x1xf32>
    %cst_366 = arith.constant 0.000000e+00 : f32
    %1306 = vector.broadcast %cst_366 : f32 to vector<4x1xf32>
    %1307 = arith.maximumf %1305, %1306 : vector<4x1xf32>
    %1308 = vector.broadcast %1299 : vector<4x1xf32> to vector<4x128xf32>
    %1309 = vector.broadcast %4 : vector<1x128xf32> to vector<4x128xf32>
    %1310 = arith.mulf %1308, %1309 : vector<4x128xf32>
    %1311 = vector.broadcast %1307 : vector<4x1xf32> to vector<4x128xf32>
    %1312 = vector.broadcast %5 : vector<1x128xf32> to vector<4x128xf32>
    %1313 = arith.mulf %1311, %1312 : vector<4x128xf32>
    %1314 = arith.addf %1310, %1313 : vector<4x128xf32>
    %1315 = vector.broadcast %6 : vector<1x128xf32> to vector<4x128xf32>
    %1316 = arith.addf %1314, %1315 : vector<4x128xf32>
    %1317 = math.tanh %1316 : vector<4x128xf32>
    %1318 = arith.mulf %1317, %1184 : vector<4x128xf32>
    %c64_i32_367 = arith.constant 64 : i32
    %1319 = tpu.dynamic_rotate %1318 by %c64_i32_367 dim 1 : vector<4x128xf32>, i32 -> vector<4x128xf32>
    %1320 = arith.addf %1318, %1319 : vector<4x128xf32>
    %c32_i32_368 = arith.constant 32 : i32
    %1321 = tpu.dynamic_rotate %1320 by %c32_i32_368 dim 1 : vector<4x128xf32>, i32 -> vector<4x128xf32>
    %1322 = arith.addf %1320, %1321 : vector<4x128xf32>
    %1323 = arith.addf %1249, %1286 : vector<4x128xf32>
    %cst_369 = arith.constant 3.000000e+00 : f32
    %1324 = vector.broadcast %cst_369 : f32 to vector<4x128xf32>
    %1325 = arith.mulf %1324, %1323 : vector<4x128xf32>
    %1326 = arith.addf %1215, %1325 : vector<4x128xf32>
    %1327 = arith.addf %1326, %1322 : vector<4x128xf32>
    %cst_370 = arith.constant 1.250000e-01 : f32
    %1328 = vector.broadcast %cst_370 : f32 to vector<4x128xf32>
    %1329 = arith.mulf %1327, %1328 : vector<4x128xf32>
    %1330 = arith.addf %1179, %1329 : vector<4x128xf32>
    %c28_371 = arith.constant 28 : index
    %c0_372 = arith.constant 0 : index
    %1331 = vector.load %arg14[%c28_371, %c0_372] : memref<32x128xf32, #tpu.memory_space<vmem>>, vector<4x128xf32>
    tpu.vector_store %arg14[%c28_371, %c0_372], %1330 {strides = array<i32>} : memref<32x128xf32, #tpu.memory_space<vmem>>, vector<4x128xf32>,
    %c0_373 = arith.constant 0 : index
    %c0_374 = arith.constant 0 : index
    %1332 = vector.load %arg14[%c0_373, %c0_374] : memref<32x128xf32, #tpu.memory_space<vmem>>, vector<32x128xf32>
    %1333 = math.tanh %1332 : vector<32x128xf32>
    %c0_375 = arith.constant 0 : index
    %c0_376 = arith.constant 0 : index
    %1334 = vector.load %arg8[%c0_375, %c0_376] : memref<128x4xf32, #tpu.memory_space<vmem>>, vector<128x4xf32>
    %cst_377 = arith.constant dense<0.000000e+00> : vector<32x4xf32>
    %1335 = tpu.matmul %1333, %1334, %cst_377 {dimension_numbers = #tpu.dot_dimension_numbers<[1], [0], [0], [1], [0, 0, 1, 1], [], []>} : vector<32x128xf32>, vector<128x4xf32>, vector<32x4xf32> -> vector<32x4xf32>
    %c0_378 = arith.constant 0 : index
    %c0_379 = arith.constant 0 : index
    %1336 = vector.load %arg9[%c0_378, %c0_379] : memref<1x4xf32, #tpu.memory_space<vmem>>, vector<1x4xf32>
    %1337 = vector.broadcast %1336 : vector<1x4xf32> to vector<32x4xf32>
    %1338 = arith.addf %1335, %1337 : vector<32x4xf32>
    %c0_380 = arith.constant 0 : index
    %c0_381 = arith.constant 0 : index
    %1339 = vector.load %arg11[%c0_380, %c0_381] : memref<32x4xf32, #tpu.memory_space<vmem>>, vector<32x4xf32>
    tpu.vector_store %arg11[%c0_380, %c0_381], %1338 {strides = array<i32>} : memref<32x4xf32, #tpu.memory_space<vmem>>, vector<32x4xf32>,
    %c0_382 = arith.constant 0 : index
    %c0_383 = arith.constant 0 : index
    %1340 = vector.load %arg10[%c0_382, %c0_383] : memref<28x4xf32, #tpu.memory_space<vmem>>, vector<28x4xf32>
    %1341 = vector.extract_strided_slice %1338 {offsets = [0, 0], sizes = [28, 4], strides = [1, 1]} : vector<32x4xf32> to vector<28x4xf32>
    %1342 = vector.extract_strided_slice %1338 {offsets = [4, 0], sizes = [28, 4], strides = [1, 1]} : vector<32x4xf32> to vector<28x4xf32>
    %1343 = arith.subf %1342, %1341 : vector<28x4xf32>
    %1344 = arith.mulf %1343, %1340 : vector<28x4xf32>
    %1345 = vector.extract_strided_slice %1344 {offsets = [0, 0], sizes = [4, 4], strides = [1, 1]} : vector<28x4xf32> to vector<4x4xf32>
    %1346 = vector.extract_strided_slice %1344 {offsets = [0, 0], sizes = [24, 4], strides = [1, 1]} : vector<28x4xf32> to vector<24x4xf32>
    %1347 = tpu.concatenate %1345, %1346 in 0 : vector<4x4xf32>, vector<24x4xf32> -> vector<28x4xf32>
    %1348 = arith.subf %1344, %1347 : vector<28x4xf32>
    %1349 = arith.subf %1344, %1347 : vector<28x4xf32>
    %cst_384 = arith.constant 3.000000e+00 : f32
    %1350 = vector.broadcast %cst_384 : f32 to vector<28x4xf32>
    %1351 = arith.mulf %1350, %1348 : vector<28x4xf32>
    %1352 = arith.subf %1351, %1349 : vector<28x4xf32>
    %cst_385 = arith.constant 2.000000e+00 : f32
    %1353 = vector.broadcast %cst_385 : f32 to vector<28x4xf32>
    %1354 = arith.mulf %1353, %1340 : vector<28x4xf32>
    %1355 = arith.mulf %1352, %1354 : vector<28x4xf32>
    %cst_386 = arith.constant 2.000000e+00 : f32
    %1356 = vector.broadcast %cst_386 : f32 to vector<28x4xf32>
    %1357 = arith.mulf %1356, %1348 : vector<28x4xf32>
    %1358 = arith.subf %1349, %1357 : vector<28x4xf32>
    %cst_387 = arith.constant 3.000000e+00 : f32
    %1359 = vector.broadcast %cst_387 : f32 to vector<28x4xf32>
    %1360 = arith.mulf %1359, %1340 : vector<28x4xf32>
    %1361 = arith.mulf %1360, %1340 : vector<28x4xf32>
    %1362 = arith.mulf %1358, %1361 : vector<28x4xf32>
    %1363 = tpu.concatenate %1341, %1347, %1355, %1362 in 1 : vector<28x4xf32>, vector<28x4xf32>, vector<28x4xf32>, vector<28x4xf32> -> vector<28x16xf32>
    %c0_388 = arith.constant 0 : index
    %c0_389 = arith.constant 0 : index
    %1364 = vector.load %arg12[%c0_388, %c0_389] : memref<28x16xf32, #tpu.memory_space<vmem>>, vector<28x16xf32>
    tpu.vector_store %arg12[%c0_388, %c0_389], %1363 {strides = array<i32>} : memref<28x16xf32, #tpu.memory_space<vmem>>, vector<28x16xf32>,
    return
  }
  func.func @transform_0(%arg0: i32) -> (i32, i32, i32) {
    %c0_i32 = arith.constant 0 : i32
    %c0_i32_0 = arith.constant 0 : i32
    %c0_i32_1 = arith.constant 0 : i32
    %c0_i32_2 = arith.constant 0 : i32
    return %c0_i32, %c0_i32_0, %c0_i32_1 : i32, i32, i32
  }
  func.func @transform_1(%arg0: i32) -> (i32, i32) {
    %c0_i32 = arith.constant 0 : i32
    %c0_i32_0 = arith.constant 0 : i32
    %c0_i32_1 = arith.constant 0 : i32
    return %c0_i32, %c0_i32_0 : i32, i32
  }
  func.func @transform_2(%arg0: i32) -> (i32, i32) {
    %c0_i32 = arith.constant 0 : i32
    %c0_i32_0 = arith.constant 0 : i32
    %c0_i32_1 = arith.constant 0 : i32
    return %c0_i32, %c0_i32_0 : i32, i32
  }
  func.func @transform_3(%arg0: i32) -> (i32, i32) {
    %c0_i32 = arith.constant 0 : i32
    %c0_i32_0 = arith.constant 0 : i32
    %c0_i32_1 = arith.constant 0 : i32
    return %c0_i32, %c0_i32_0 : i32, i32
  }
  func.func @transform_4(%arg0: i32) -> (i32, i32) {
    %c0_i32 = arith.constant 0 : i32
    %c0_i32_0 = arith.constant 0 : i32
    %c0_i32_1 = arith.constant 0 : i32
    return %c0_i32, %c0_i32_0 : i32, i32
  }
  func.func @transform_5(%arg0: i32) -> (i32, i32) {
    %c0_i32 = arith.constant 0 : i32
    %c0_i32_0 = arith.constant 0 : i32
    %c0_i32_1 = arith.constant 0 : i32
    return %c0_i32, %c0_i32_0 : i32, i32
  }
  func.func @transform_6(%arg0: i32) -> (i32, i32) {
    %c0_i32 = arith.constant 0 : i32
    %c0_i32_0 = arith.constant 0 : i32
    %c0_i32_1 = arith.constant 0 : i32
    return %c0_i32, %c0_i32_0 : i32, i32
  }
  func.func @transform_7(%arg0: i32) -> (i32, i32) {
    %c0_i32 = arith.constant 0 : i32
    %c0_i32_0 = arith.constant 0 : i32
    %c0_i32_1 = arith.constant 0 : i32
    return %c0_i32, %c0_i32_0 : i32, i32
  }
  func.func @transform_8(%arg0: i32) -> (i32, i32) {
    %c0_i32 = arith.constant 0 : i32
    %c0_i32_0 = arith.constant 0 : i32
    %c0_i32_1 = arith.constant 0 : i32
    return %c0_i32, %c0_i32_0 : i32, i32
  }
  func.func @transform_9(%arg0: i32) -> (i32, i32) {
    %c0_i32 = arith.constant 0 : i32
    %c0_i32_0 = arith.constant 0 : i32
    %c0_i32_1 = arith.constant 0 : i32
    return %c0_i32, %c0_i32_0 : i32, i32
  }
  func.func @transform_10(%arg0: i32) -> (i32, i32) {
    %c0_i32 = arith.constant 0 : i32
    %c0_i32_0 = arith.constant 0 : i32
    %c0_i32_1 = arith.constant 0 : i32
    return %c0_i32, %c0_i32_0 : i32, i32
  }
  func.func @transform_11(%arg0: i32) -> (i32, i32) {
    %c0_i32 = arith.constant 0 : i32
    %c0_i32_0 = arith.constant 0 : i32
    %c0_i32_1 = arith.constant 0 : i32
    return %c0_i32, %c0_i32_0 : i32, i32
  }
}

</mosaic_0001>

<bundles_post_ra>
// kernel: tpu_custom_call.1
= control target key start
LH: loop header
LB: loop body
LE: loop exit
PB: predicated region body
PF: predicated region fallthrough
CT: control target
= control target key end

     0   :  { %v2261_v0 = vmov 0   ;;  %v2262_v2 = vmov 2   ;;  %v2263_v3 = vmov 1   ;;  %v2264_v4 = vmov 3   ;;  %s2269_s20 = smov 64   ;;  %s2272_s21 = smov 32   ;;  %s3588_s0 = inlined_call_operand.vmem [shape: f32[7,4,16], index: 0, kind: input, shape index: {}]   ;;  %s3589_s1 = inlined_call_operand.vmem [shape: f32[4,128], index: 1, kind: input, shape index: {}]   ;;  %s3590_s2 = inlined_call_operand.vmem [shape: f32[1,128], index: 2, kind: input, shape index: {}]   ;;  %s3591_s3 = inlined_call_operand.vmem [shape: f32[2,128], index: 3, kind: input, shape index: {}]   ;;  %s3592_s4 = inlined_call_operand.vmem [shape: f32[1,2], index: 4, kind: input, shape index: {}]   ;;  %s3593_s5 = inlined_call_operand.vmem [shape: f32[2,128], index: 5, kind: input, shape index: {}]   ;;  %s3594_s6 = inlined_call_operand.vmem [shape: f32[1,128], index: 6, kind: input, shape index: {}]   ;;  %s3595_s7 = inlined_call_operand.vmem [shape: f32[128,4], index: 7, kind: input, shape index: {}]   ;;  %s3596_s8 = inlined_call_operand.vmem [shape: f32[1,4], index: 8, kind: input, shape index: {}]   ;;  %s3597_s9 = inlined_call_operand.vmem [shape: f32[28,4], index: 9, kind: input, shape index: {}]   ;;  %s3598_s10 = inlined_call_operand.vmem [shape: f32[32,4], index: 10, kind: output, shape index: {0}]   ;;  %s3599_s11 = inlined_call_operand.vmem [shape: f32[28,16], index: 11, kind: output, shape index: {1}]  }
   0x1   :  { %2031 = vset.pattern.permute.xlu0 %v2261_v0  ;;  %v2346_v1 = vld [vmem:[%s3588_s0] sm:$0xf]  ;;  %2033 = vset.pattern.permute.xlu1 %v2262_v2  ;;  %vm600_vm0 = vcmask 1043456   ;;  %v2265_v28 = vmov 4   ;;  %v2266_v29 = vmov 7   ;;  %v2267_v37 = vmov 5  }
   0x2   :  { %560 = vperm.xlu0 %2031, %v2346_v1   ;;  %579 = vperm.xlu1 %2033, %v2346_v1   ;;  %v2170_v7 = vld [vmem:[%s3589_s1] ss:$0 sm:$0xff]  ;;  %v2173_v10 = vld [vmem:[%s3589_s1 + $0x1] ss:$0 sm:$0xff]  ;;  %v2172_v11 = vld [vmem:[%s3589_s1 + $0x2] ss:$0 sm:$0xff] }
   0x3   :  { %2036 = vset.pattern.permute.xlu2 %v2263_v3  ;;  %v2171_v8 = vld [vmem:[%s3590_s2] ss:$0 sm:$0xff]  ;;  %v2174_v12 = vld [vmem:[%s3589_s1 + $0x3] ss:$0 sm:$0xff]  ;;  %v2384_v25 = vld [vmem:[%s3591_s3 + $0x1] ss:$0 sm:$0xff] }
   0x4   :  { %v2373_v21 = vld [vmem:[%s3591_s3] ss:$0 sm:$0xff]  ;;  %v2268_v38 = vmov 6   ;;  %v2412_v41 = vld [vmem:[%s3593_s5 + $0x1] ss:$0 sm:$0xff]  ;;  %vm169_vm1 = vcmask 261120  }
   0x5   :  { %v2396_v30 = vld [vmem:[%s3592_s4] ss:$0 sm:$0xff]  ;;  %vm177_vm2 = vcmask 523264   ;;  %vm185_vm3 = vcmask 785408   ;;  %v2270_v58 = vmov 9   ;;  %v2271_v59 = vmov 8  }
   0x6   :  { %v2407_v40 = vld [vmem:[%s3593_s5] ss:$0 sm:$0xff]  ;;  %v2273_v62 = vmov 12   ;;  %v2274_v63 = vmov 11   ;;  %v2275_v2 = vmov 13   ;;  %vm1740_vm4 = vcmask 31744  }
   0x7   :  { %v2419_v47 = vld [vmem:[%s3594_s6] ss:$0 sm:$0xff]  ;;  %s2279_s23 = smov 4   ;;  %s2280_s26 = smov 8   ;;  %vm1943_vm5 = vcmask 97280   ;;  %vm1938_vm6 = vcmask 64512  }
   0x8   :  { %vm1948_vm7 = vcmask 130048   ;;  %vm1952_vm8 = vcmask 125952  }
   0xa   :  { %2032 = vset.pattern.permute.xlu0 %v2263_v3  ;;  %2034 = vset.pattern.permute.xlu1 %v2264_v4  ;;  %v2276_v4 = vmov 14  }
   0xb   :  { %571 = vperm.xlu0 %2032, %v2346_v1   ;;  %587 = vperm.xlu1 %2034, %v2346_v1  }
  0x13   :  { %2035 = vset.pattern.permute.xlu1 %v2261_v0  ;;  %2037 = vset.pattern.permute.xlu0 %v2265_v28 }
  0x14   :  { %52 = vperm.xlu0 %2037, %v2346_v1  }
  0x1c   :  { %2040 = vset.pattern.permute.xlu0 %v2266_v29 }
  0x1d   :  { %142 = vperm.xlu0 %2040, %v2346_v1  }
  0x25   :  { %2041 = vset.pattern.permute.xlu0 %v2273_v62 }
  0x26   :  { %327 = vperm.xlu0 %2041, %v2346_v1  }
  0x2e   :  { %2042 = vset.pattern.permute.xlu0 %v2275_v2 }
  0x2f   :  { %355 = vperm.xlu0 %2042, %v2346_v1  }
  0x37   :  { %2043 = vset.pattern.permute.xlu0 %v2276_v4 }
  0x38   :  { %383 = vperm.xlu0 %2043, %v2346_v1  }
  0x74   :  { %v561_v5 = vpop.permute.xlu0 %560  ;;  %v580_v6 = vpop.permute.xlu1 %579 }
  0x75   :  { %v564_v9 = vmul.f32 %v2170_v7, %v561_v5  ;;  %v583_v17 = vmul.f32 %v2172_v11, %v580_v6  ;;  %v2277_v5 = vmov 15  }
  0x76   :  { %2046 = vset.pattern.permute.xlu0 %v2277_v5 }
  0x77   :  { %v568_v15 = vadd.f32 %v2171_v8, %v564_v9  ;;  %411 = vperm.xlu0 %2046, %v2346_v1   ;;  %v2278_v9 = vmov 10  }
  0x7d   :  { %v572_v13 = vpop.permute.xlu0 %571  ;;  %v588_v14 = vpop.permute.xlu1 %587 }
  0x7e   :  { %v575_v16 = vmul.f32 %v2173_v10, %v572_v13  ;;  %v591_v19 = vmul.f32 %v2174_v12, %v588_v14 }
  0x7f   :  { %2049 = vset.pattern.permute.xlu0 %v2261_v0 }
  0x80   :  { %v576_v18 = vadd.f32 %v575_v16, %v568_v15 }
  0x82   :  { %v584_v20 = vadd.f32 %v583_v17, %v576_v18 }
  0x84   :  { %v2375_v22 = vadd.f32 %v591_v19, %v584_v20 }
  0x86   :  { %593 = vst [vmem:[#allocation3] sm:$0xf] %v2375_v22  ;;  %v599_v23 = vmul.f32 %v2373_v21, %v2375_v22  ;;  %v610_v26 = vmul.f32 %v2384_v25, %v2375_v22  ;;  %v53_v42 = vpop.permute.xlu0 %52 }
  0x88   :  { %v601_v24 = vsel %vm600_vm0, %v599_v23, 0.0  ;;  %v611_v27 = vsel %vm600_vm0, %v610_v26, 0.0 }
  0x89   :  { %602 = vadd.xlane.f32.xlu2 %v601_v24 }
  0x8f   :  { %v143_v49 = vpop.permute.xlu0 %142 }
  0x91   :  { %612 = vadd.xlane.f32.xlu2 %v611_v27 }
  0x98   :  { %v328_v15 = vpop.permute.xlu0 %327 }
  0xa1   :  { %v356_v18 = vpop.permute.xlu0 %355 }
  0xfc   :  { %v603_v31 = vpop.xlane.xlu2 %602 }
  0xfd   :  { %v607_v32 = vadd.f32 %v2396_v30, %v603_v31  ;;  %v384_v31 = vpop.permute.xlu0 %383 }
  0xff   :  { %v608_v33 = vmax.f32 %v607_v32, 0.0 }
 0x101   :  { %618 = vperm.xlu1 %2035, %v608_v33  }
 0x104   :  { %v613_v34 = vpop.xlane.xlu2 %612 }
 0x105   :  { %v614_v35 = vadd.f32 %v2396_v30, %v613_v34  ;;  %v412_v33 = vpop.permute.xlu0 %411 }
 0x107   :  { %v615_v36 = vmax.f32 %v614_v35, 0.0 }
 0x109   :  { %2038 = vset.pattern.permute.xlu1 %v2267_v37  ;;  %625 = vperm.xlu2 %2036, %v615_v36  }
 0x10a   :  { %86 = vperm.xlu1 %2038, %v2346_v1  }
 0x111   :  { %2044 = vset.pattern.permute.xlu2 %v2271_v59 }
 0x112   :  { %2039 = vset.pattern.permute.xlu1 %v2268_v38 }
 0x113   :  { %114 = vperm.xlu1 %2039, %v2346_v1  }
 0x11b   :  { %2045 = vset.pattern.permute.xlu1 %v2270_v58 }
 0x163   :  { %v626_v43 = vpop.permute.xlu2 %625 }
 0x164   :  { %v629_v46 = vmul.f32 %v2412_v41, %v626_v43 }
 0x173   :  { %v619_v39 = vpop.permute.xlu1 %618 }
 0x174   :  { %v622_v45 = vmul.f32 %v2407_v40, %v619_v39 }
 0x176   :  { %v630_v48 = vadd.f32 %v629_v46, %v622_v45 }
 0x178   :  { %v634_v50 = vadd.f32 %v2419_v47, %v630_v48 }
 0x17a   :  { %2182 = vtanh.f32 %v634_v50 }
 0x17c   :  { %v87_v44 = vpop.permute.xlu1 %86 }
 0x17d   :  { %v170_v51 = vsel %vm169_vm1, %v53_v42, %v87_v44 }
 0x180   :  { %v2183_v55 = vpop.eup %2182 }
 0x185   :  { %v115_v52 = vpop.permute.xlu1 %114 }
 0x186   :  { %v178_v53 = vsel %vm177_vm2, %v170_v51, %v115_v52 }
 0x187   :  { %v2425_v54 = vsel %vm185_vm3, %v178_v53, %v143_v49 }
 0x188   :  { %459 = vst [vmem:[#allocation2] sm:$0xf] %v2425_v54 }
 0x18f   :  { %v594_v56 = vld [vmem:[#allocation2] sm:$0xf] }
 0x190   :  { %v636_v57 = vmul.f32 %v2183_v55, %v594_v56 }
 0x192   :  { %637 = vrot.lane.b32.xlu1 %v636_v57, %s2269_s20 }
 0x19a   :  { %222 = vperm.xlu1 %2045, %v2346_v1  }
 0x1a2   :  { %2048 = vset.pattern.permute.xlu1 %v2274_v63 }
 0x204   :  { %v638_v60 = vpop.permute.xlu1 %637 }
 0x205   :  { %v639_v61 = vadd.f32 %v638_v60, %v636_v57 }
 0x207   :  { %640 = vrot.lane.b32.xlu2 %v639_v61, %s2272_s21 }
 0x20c   :  { %v223_v17 = vpop.permute.xlu1 %222 }
 0x20f   :  { %194 = vperm.xlu2 %2044, %v2346_v1  }
 0x217   :  { %2047 = vset.pattern.permute.xlu2 %v2278_v9 }
 0x261   :  { %v641_v6 = vpop.permute.xlu2 %640 }
 0x262   :  { %v2443_v7 = vadd.f32 %v641_v6, %v639_v61 }
 0x264   :  { %v2446_v8 = vmul.f32 0.33333334, %v2443_v7 }
 0x266   :  { %v644_v10 = vadd.f32 %v2446_v8, %v2375_v22 }
 0x268   :  { %v651_v11 = vmul.f32 %v2384_v25, %v644_v10  ;;  %v645_v12 = vmul.f32 %v2373_v21, %v644_v10 }
 0x269   :  { %v195_v16 = vpop.permute.xlu2 %194 }
 0x26a   :  { %v652_v13 = vsel %vm600_vm0, %v651_v11, 0.0  ;;  %v646_v14 = vsel %vm600_vm0, %v645_v12, 0.0  ;;  %v305_v42 = vsel %vm169_vm1, %v195_v16, %v223_v17 }
 0x26b   :  { %653 = vadd.xlane.f32.xlu2 %v652_v13  ;;  %647 = vadd.xlane.f32.xlu1 %v646_v14 }
 0x283   :  { %250 = vperm.xlu2 %2047, %v2346_v1  }
 0x284   :  { %278 = vperm.xlu1 %2048, %v2346_v1   ;;  %v438_v1 = vsel %vm169_vm1, %v328_v15, %v356_v18 }
 0x285   :  { %v445_v32 = vsel %vm177_vm2, %v438_v1, %v384_v31 }
 0x286   :  { %v452_v34 = vsel %vm185_vm3, %v445_v32, %v412_v33 }
 0x287   :  { %v460_v36 = vmul.f32 0.33333334, %v452_v34  ;;  %v465_v39 = vmul.f32 0.6666667, %v452_v34 }
 0x28b   :  { %2050 = vset.pattern.permute.xlu2 %v2263_v3 }
 0x28c   :  { %2053 = vset.pattern.permute.xlu1 %v2263_v3 }
 0x2de   :  { %v654_v19 = vpop.xlane.xlu2 %653  ;;  %v648_v20 = vpop.xlane.xlu1 %647 }
 0x2df   :  { %v655_v23 = vadd.f32 %v2396_v30, %v654_v19  ;;  %v649_v24 = vadd.f32 %v2396_v30, %v648_v20 }
 0x2e1   :  { %v656_v26 = vmax.f32 %v655_v23, 0.0  ;;  %v650_v27 = vmax.f32 %v649_v24, 0.0 }
 0x2e3   :  { %665 = vperm.xlu2 %2050, %v656_v26   ;;  %659 = vperm.xlu0 %2049, %v650_v27  }
 0x2e6   :  { %v251_v35 = vpop.permute.xlu2 %250 }
 0x2e7   :  { %v312_v43 = vsel %vm177_vm2, %v305_v42, %v251_v35 }
 0x2eb   :  { %2051 = vset.pattern.permute.xlu2 %v2261_v0 }
 0x2f6   :  { %v279_v44 = vpop.permute.xlu1 %278 }
 0x2f7   :  { %v319_v45 = vsel %vm185_vm3, %v312_v43, %v279_v44 }
 0x2f8   :  { %v461_v46 = vadd.f32 %v460_v36, %v319_v45  ;;  %v466_v48 = vadd.f32 %v465_v39, %v319_v45  ;;  %v470_v49 = vadd.f32 %v452_v34, %v319_v45 }
 0x2fa   :  { %v462_v50 = vmul.f32 0.33333334, %v461_v46  ;;  %v467_v51 = vmul.f32 0.6666667, %v466_v48  ;;  %v471_v52 = vadd.f32 %v470_v49, %v2425_v54 }
 0x2fc   :  { %v463_v53 = vadd.f32 %v462_v50, %v2425_v54  ;;  %v468_v55 = vadd.f32 %v467_v51, %v2425_v54  ;;  %472 = vst [vmem:[#allocation2 + $0xc] sm:$0xf] %v471_v52 }
 0x2fe   :  { %464 = vst [vmem:[#allocation2 + $0x4] sm:$0xf] %v463_v53 }
 0x2ff   :  { %469 = vst [vmem:[#allocation2 + $0x8] sm:$0xf] %v468_v55 }
 0x305   :  { %v595_v12 = vld [vmem:[#allocation2 + $0x4] sm:$0xf] }
 0x306   :  { %v596_v44 = vld [vmem:[#allocation2 + $0x8] sm:$0xf] }
 0x33d   :  { %v666_v56 = vpop.permute.xlu2 %665 }
 0x33e   :  { %v668_v60 = vmul.f32 %v2412_v41, %v666_v56 }
 0x355   :  { %v660_v57 = vpop.permute.xlu0 %659 }
 0x356   :  { %v662_v61 = vmul.f32 %v2407_v40, %v660_v57 }
 0x358   :  { %v669_v6 = vadd.f32 %v668_v60, %v662_v61 }
 0x35a   :  { %v670_v10 = vadd.f32 %v2419_v47, %v669_v6 }
 0x35c   :  { %2184 = vtanh.f32 %v670_v10 }
 0x362   :  { %v2185_v11 = vpop.eup %2184 }
 0x363   :  { %v672_v13 = vmul.f32 %v2185_v11, %v595_v12 }
 0x365   :  { %673 = vrot.lane.b32.xlu1 %v672_v13, %s2269_s20 }
 0x3d7   :  { %v674_v14 = vpop.permute.xlu1 %673 }
 0x3d8   :  { %v675_v54 = vadd.f32 %v674_v14, %v672_v13 }
 0x3da   :  { %676 = vrot.lane.b32.xlu2 %v675_v54, %s2272_s21 }
 0x434   :  { %v677_v15 = vpop.permute.xlu2 %676 }
 0x435   :  { %v2477_v16 = vadd.f32 %v677_v15, %v675_v54 }
 0x437   :  { %v679_v17 = vsub.f32 %v2477_v16, %v2446_v8  ;;  %v715_v50 = vsub.f32 %v2443_v7, %v2477_v16 }
 0x439   :  { %v680_v18 = vadd.f32 %v679_v17, %v2375_v22 }
 0x43b   :  { %v687_v19 = vmul.f32 %v2384_v25, %v680_v18  ;;  %v681_v20 = vmul.f32 %v2373_v21, %v680_v18 }
 0x43d   :  { %v688_v23 = vsel %vm600_vm0, %v687_v19, 0.0  ;;  %v682_v24 = vsel %vm600_vm0, %v681_v20, 0.0 }
 0x43e   :  { %689 = vadd.xlane.f32.xlu0 %v688_v23  ;;  %683 = vadd.xlane.f32.xlu1 %v682_v24  ;;  %v597_v23 = vld [vmem:[#allocation2 + $0xc] sm:$0xf] }
 0x4b1   :  { %v684_v26 = vpop.xlane.xlu1 %683  ;;  %v690_v1 = vpop.xlane.xlu0 %689 }
 0x4b2   :  { %v685_v27 = vadd.f32 %v2396_v30, %v684_v26  ;;  %v691_v8 = vadd.f32 %v2396_v30, %v690_v1  ;;  %v1706_v26 = vld [vmem:[%s3595_s7 + $0x78] sm:$0xff]  ;;  %v1703_v1 = vld [vmem:[%s3595_s7 + $0x60] sm:$0xff] }
 0x4b3   :  { %1711 = vmatpush.msra.mxu0 %v1706_v26  ;;  %1962 = vmatpush.msra.mxu1 %v1706_v26 }
 0x4b4   :  { %v686_v31 = vmax.f32 %v685_v27, 0.0  ;;  %v692_v32 = vmax.f32 %v691_v8, 0.0  ;;  %v1705_v27 = vld [vmem:[%s3595_s7 + $0x70] sm:$0xff]  ;;  %1963 = vmatpush.msra.mxu2 %v1706_v26  ;;  %1964 = vmatpush.msra.mxu3 %v1706_v26 }
 0x4b5   :  { %1712 = vmatpush.msra.mxu0 %v1705_v27  ;;  %1965 = vmatpush.msra.mxu1 %v1705_v27 }
 0x4b6   :  { %695 = vperm.xlu2 %2051, %v686_v31   ;;  %v1704_v31 = vld [vmem:[%s3595_s7 + $0x68] sm:$0xff]  ;;  %1966 = vmatpush.msra.mxu2 %v1705_v27 }
 0x4b7   :  { %1967 = vmatpush.msra.mxu3 %v1705_v27  ;;  %1713 = vmatpush.msra.mxu0 %v1704_v31 }
 0x4b8   :  { %1968 = vmatpush.msra.mxu1 %v1704_v31  ;;  %1969 = vmatpush.msra.mxu2 %v1704_v31 }
 0x4b9   :  { %1970 = vmatpush.msra.mxu3 %v1704_v31  ;;  %1714 = vmatpush.msra.mxu0 %v1703_v1 }
 0x4ba   :  { %1971 = vmatpush.msra.mxu1 %v1703_v1  ;;  %1972 = vmatpush.msra.mxu2 %v1703_v1 }
 0x4bb   :  { %1973 = vmatpush.msra.mxu3 %v1703_v1 }
 0x4be   :  { %2052 = vset.pattern.permute.xlu2 %v2263_v3 }
 0x4bf   :  { %701 = vperm.xlu2 %2052, %v692_v32  }
 0x510   :  { %v696_v33 = vpop.permute.xlu2 %695 }
 0x511   :  { %v698_v35 = vmul.f32 %v2407_v40, %v696_v33  ;;  %v1702_v33 = vld [vmem:[%s3595_s7 + $0x58] sm:$0xff] }
 0x512   :  { %1715 = vmatpush.msra.mxu0 %v1702_v33  ;;  %1974 = vmatpush.msra.mxu1 %v1702_v33 }
 0x513   :  { %1975 = vmatpush.msra.mxu2 %v1702_v33  ;;  %1976 = vmatpush.msra.mxu3 %v1702_v33 }
 0x519   :  { %v702_v34 = vpop.permute.xlu2 %701 }
 0x51a   :  { %v704_v36 = vmul.f32 %v2412_v41, %v702_v34  ;;  %v1701_v34 = vld [vmem:[%s3595_s7 + $0x50] sm:$0xff] }
 0x51b   :  { %1716 = vmatpush.msra.mxu0 %v1701_v34  ;;  %1977 = vmatpush.msra.mxu1 %v1701_v34 }
 0x51c   :  { %v705_v39 = vadd.f32 %v704_v36, %v698_v35  ;;  %v1700_v35 = vld [vmem:[%s3595_s7 + $0x48] sm:$0xff]  ;;  %1978 = vmatpush.msra.mxu2 %v1701_v34  ;;  %1979 = vmatpush.msra.mxu3 %v1701_v34  ;;  %v1699_v36 = vld [vmem:[%s3595_s7 + $0x40] sm:$0xff] }
 0x51d   :  { %1717 = vmatpush.msra.mxu0 %v1700_v35  ;;  %1980 = vmatpush.msra.mxu1 %v1700_v35 }
 0x51e   :  { %v706_v42 = vadd.f32 %v2419_v47, %v705_v39  ;;  %1981 = vmatpush.msra.mxu2 %v1700_v35  ;;  %1982 = vmatpush.msra.mxu3 %v1700_v35  ;;  %v1698_v39 = vld [vmem:[%s3595_s7 + $0x38] sm:$0xff] }
 0x51f   :  { %1718 = vmatpush.msra.mxu0 %v1699_v36  ;;  %1983 = vmatpush.msra.mxu1 %v1699_v36 }
 0x520   :  { %2186 = vtanh.f32 %v706_v42  ;;  %v1697_v42 = vld [vmem:[%s3595_s7 + $0x30] sm:$0xff]  ;;  %1984 = vmatpush.msra.mxu2 %v1699_v36  ;;  %1985 = vmatpush.msra.mxu3 %v1699_v36 }
 0x521   :  { %1719 = vmatpush.msra.mxu0 %v1698_v39  ;;  %1986 = vmatpush.msra.mxu1 %v1698_v39 }
 0x522   :  { %1987 = vmatpush.msra.mxu2 %v1698_v39  ;;  %1988 = vmatpush.msra.mxu3 %v1698_v39 }
 0x523   :  { %1720 = vmatpush.msra.mxu0 %v1697_v42  ;;  %1989 = vmatpush.msra.mxu1 %v1697_v42 }
 0x524   :  { %1990 = vmatpush.msra.mxu2 %v1697_v42  ;;  %1991 = vmatpush.msra.mxu3 %v1697_v42 }
 0x526   :  { %v2187_v43 = vpop.eup %2186 }
 0x527   :  { %v708_v45 = vmul.f32 %v2187_v43, %v596_v44  ;;  %v1696_v43 = vld [vmem:[%s3595_s7 + $0x28] sm:$0xff]  ;;  %v1695_v44 = vld [vmem:[%s3595_s7 + $0x20] sm:$0xff] }
 0x528   :  { %1721 = vmatpush.msra.mxu0 %v1696_v43  ;;  %1992 = vmatpush.msra.mxu1 %v1696_v43 }
 0x529   :  { %709 = vrot.lane.b32.xlu2 %v708_v45, %s2269_s20  ;;  %1993 = vmatpush.msra.mxu2 %v1696_v43 }
 0x52a   :  { %1994 = vmatpush.msra.mxu3 %v1696_v43  ;;  %1722 = vmatpush.msra.mxu0 %v1695_v44 }
 0x52b   :  { %1995 = vmatpush.msra.mxu1 %v1695_v44  ;;  %1996 = vmatpush.msra.mxu2 %v1695_v44 }
 0x52c   :  { %1997 = vmatpush.msra.mxu3 %v1695_v44 }
 0x583   :  { %v710_v46 = vpop.permute.xlu2 %709 }
 0x584   :  { %v711_v48 = vadd.f32 %v710_v46, %v708_v45  ;;  %v1694_v45 = vld [vmem:[%s3595_s7 + $0x18] sm:$0xff]  ;;  %v1693_v46 = vld [vmem:[%s3595_s7 + $0x10] sm:$0xff] }
 0x585   :  { %1723 = vmatpush.msra.mxu0 %v1694_v45  ;;  %1998 = vmatpush.msra.mxu1 %v1694_v45 }
 0x586   :  { %712 = vrot.lane.b32.xlu2 %v711_v48, %s2272_s21  ;;  %1999 = vmatpush.msra.mxu2 %v1694_v45 }
 0x587   :  { %2000 = vmatpush.msra.mxu3 %v1694_v45  ;;  %1724 = vmatpush.msra.mxu0 %v1693_v46 }
 0x588   :  { %2001 = vmatpush.msra.mxu1 %v1693_v46  ;;  %2002 = vmatpush.msra.mxu2 %v1693_v46 }
 0x589   :  { %2003 = vmatpush.msra.mxu3 %v1693_v46 }
 0x5e0   :  { %v713_v49 = vpop.permute.xlu2 %712 }
 0x5e1   :  { %v2496_v51 = vadd.f32 %v713_v49, %v711_v48  ;;  %v1692_v48 = vld [vmem:[%s3595_s7 + $0x8] sm:$0xff]  ;;  %v1691_v49 = vld [vmem:[%s3595_s7] sm:$0xff] }
 0x5e2   :  { %1725 = vmatpush.msra.mxu0 %v1692_v48  ;;  %2004 = vmatpush.msra.mxu1 %v1692_v48 }
 0x5e3   :  { %v716_v52 = vadd.f32 %v715_v50, %v2496_v51  ;;  %2005 = vmatpush.msra.mxu2 %v1692_v48  ;;  %2006 = vmatpush.msra.mxu3 %v1692_v48  ;;  %v2567_v50 = vld [vmem:[%s3588_s0 + $0x4] sm:$0xf] }
 0x5e4   :  { %1726 = vmatpush.msra.mxu0 %v1691_v49  ;;  %2007 = vmatpush.msra.mxu1 %v1691_v49 }
 0x5e5   :  { %v717_v53 = vadd.f32 %v716_v52, %v2375_v22  ;;  %v752_v52 = vadd.f32 %v2496_v51, %v2477_v16  ;;  %2008 = vmatpush.msra.mxu2 %v1691_v49  ;;  %2009 = vmatpush.msra.mxu3 %v1691_v49 }
 0x5e7   :  { %v724_v55 = vmul.f32 %v2384_v25, %v717_v53  ;;  %v718_v56 = vmul.f32 %v2373_v21, %v717_v53  ;;  %v753_v53 = vmul.f32 3.0, %v752_v52 }
 0x5e9   :  { %v725_v57 = vsel %vm600_vm0, %v724_v55, 0.0  ;;  %v719_v60 = vsel %vm600_vm0, %v718_v56, 0.0  ;;  %v754_v56 = vadd.f32 %v753_v53, %v2443_v7 }
 0x5ea   :  { %726 = vadd.xlane.f32.xlu1 %v725_v57  ;;  %720 = vadd.xlane.f32.xlu2 %v719_v60 }
 0x65d   :  { %v727_v61 = vpop.xlane.xlu1 %726  ;;  %v721_v6 = vpop.xlane.xlu2 %720 }
 0x65e   :  { %v728_v10 = vadd.f32 %v2396_v30, %v727_v61  ;;  %v722_v11 = vadd.f32 %v2396_v30, %v721_v6 }
 0x660   :  { %v729_v12 = vmax.f32 %v728_v10, 0.0  ;;  %v723_v13 = vmax.f32 %v722_v11, 0.0 }
 0x662   :  { %738 = vperm.xlu1 %2053, %v729_v12   ;;  %732 = vperm.xlu0 %2049, %v723_v13  }
 0x66a   :  { %2054 = vset.pattern.permute.xlu0 %v2265_v28  ;;  %2058 = vset.pattern.permute.xlu1 %v2266_v29 }
 0x6d4   :  { %v739_v14 = vpop.permute.xlu1 %738  ;;  %v733_v54 = vpop.permute.xlu0 %732 }
 0x6d5   :  { %v741_v15 = vmul.f32 %v2412_v41, %v739_v14  ;;  %v735_v17 = vmul.f32 %v2407_v40, %v733_v54 }
 0x6d7   :  { %v742_v18 = vadd.f32 %v741_v15, %v735_v17 }
 0x6d9   :  { %v743_v19 = vadd.f32 %v2419_v47, %v742_v18  ;;  %v2608_v18 = vld [vmem:[%s3596_s8] ss:$0 sm:$0xff] }
 0x6db   :  { %2188 = vtanh.f32 %v743_v19 }
 0x6e1   :  { %v2189_v20 = vpop.eup %2188 }
 0x6e2   :  { %v745_v24 = vmul.f32 %v2189_v20, %v597_v23  ;;  %v2615_v20 = vld [vmem:[%s3597_s9] sm:$0xff] }
 0x6e3   :  { %v1772_v26 = vrot.slane %v2615_v20, 4  ;;  %v1849_v1 = vmul.f32 3.0, %v2615_v20 }
 0x6e4   :  { %746 = vrot.lane.b32.xlu0 %v745_v24, %s2269_s20 }
 0x6e5   :  { %v2638_v34 = vmul.f32 %v1849_v1, %v2615_v20 }
 0x6e7   :  { %v1861_v39 = vrot.slane %v2638_v34, 4 }
 0x756   :  { %v747_v8 = vpop.permute.xlu0 %746 }
 0x757   :  { %v2524_v32 = vadd.f32 %v747_v8, %v745_v24 }
 0x759   :  { %749 = vrot.lane.b32.xlu0 %v2524_v32, %s2272_s21 }
 0x761   :  { %57 = vperm.xlu0 %2054, %v2567_v50  }
 0x769   :  { %2055 = vset.pattern.permute.xlu0 %v2261_v0 }
 0x7cb   :  { %v750_v55 = vpop.permute.xlu0 %749 }
 0x7cc   :  { %v751_v57 = vadd.f32 %v750_v55, %v2524_v32 }
 0x7ce   :  { %v755_v60 = vadd.f32 %v754_v56, %v751_v57 }
 0x7d0   :  { %v756_v61 = vmul.f32 0.125, %v755_v60 }
 0x7d2   :  { %v2576_v6 = vadd.f32 %v756_v61, %v2375_v22 }
 0x7d3   :  { %v58_v44 = vpop.permute.xlu0 %57 }
 0x7d4   :  { %758 = vst [vmem:[#allocation3 + $0x4] sm:$0xf] %v2576_v6  ;;  %v769_v16 = vmul.f32 %v2384_v25, %v2576_v6  ;;  %v763_v51 = vmul.f32 %v2373_v21, %v2576_v6 }
 0x7d6   :  { %v770_v10 = vsel %vm600_vm0, %v769_v16, 0.0  ;;  %v764_v7 = vsel %vm600_vm0, %v763_v51, 0.0 }
 0x7d7   :  { %771 = vadd.xlane.f32.xlu2 %v770_v10  ;;  %765 = vadd.xlane.f32.xlu1 %v764_v7 }
 0x7db   :  { %v1683_v11 = vld [vmem:[#allocation3] sm:$0xff] }
 0x7dc   :  { %2190 = vtanh.f32 %v1683_v11 }
 0x7e2   :  { %v2191_v12 = vpop.eup %2190 }
 0x7e3   :  { %1727 = vmatmul.f32.vlgmr.msra.gmra.mxu0 %v2191_v12 }
 0x7f0   :  { %146 = vperm.xlu1 %2058, %v2567_v50  }
 0x7f8   :  { %2059 = vset.pattern.permute.xlu1 %v2273_v62 }
 0x7f9   :  { %331 = vperm.xlu1 %2059, %v2567_v50  }
 0x801   :  { %2060 = vset.pattern.permute.xlu1 %v2275_v2 }
 0x802   :  { %359 = vperm.xlu1 %2060, %v2567_v50  }
 0x80a   :  { %2061 = vset.pattern.permute.xlu1 %v2276_v4 }
 0x80b   :  { %387 = vperm.xlu1 %2061, %v2567_v50  }
 0x813   :  { %2062 = vset.pattern.permute.xlu1 %v2271_v59 }
 0x814   :  { %198 = vperm.xlu1 %2062, %v2567_v50  }
 0x81c   :  { %2065 = vset.pattern.permute.xlu1 %v2278_v9 }
 0x81d   :  { %254 = vperm.xlu1 %2065, %v2567_v50  }
 0x825   :  { %2066 = vset.pattern.permute.xlu1 %v2274_v63 }
 0x826   :  { %282 = vperm.xlu1 %2066, %v2567_v50  }
 0x82e   :  { %2067 = vset.pattern.permute.xlu1 %v2261_v0 }
 0x84a   :  { %v772_v22 = vpop.xlane.xlu2 %771  ;;  %v766_v13 = vpop.xlane.xlu1 %765 }
 0x84b   :  { %v773_v14 = vadd.f32 %v2396_v30, %v772_v22  ;;  %v767_v54 = vadd.f32 %v2396_v30, %v766_v13 }
 0x84d   :  { %v774_v15 = vmax.f32 %v773_v14, 0.0  ;;  %v768_v17 = vmax.f32 %v767_v54, 0.0 }
 0x84f   :  { %783 = vperm.xlu2 %2052, %v774_v15   ;;  %777 = vperm.xlu0 %2055, %v768_v17  }
 0x857   :  { %2056 = vset.pattern.permute.xlu0 %v2267_v37  ;;  %2057 = vset.pattern.permute.xlu2 %v2268_v38 }
 0x858   :  { %90 = vperm.xlu0 %2056, %v2567_v50   ;;  %118 = vperm.xlu2 %2057, %v2567_v50  }
 0x860   :  { %v1728_v19 = vpop.f32.mrf.mxu0  ;;  %2064 = vset.pattern.permute.xlu0 %v2277_v5  ;;  %2063 = vset.pattern.permute.xlu2 %v2270_v58 }
 0x861   :  { %v2618_v23 = vadd.f32 %v2608_v18, %v1728_v19 }
 0x862   :  { %v147_v56 = vpop.permute.xlu1 %146 }
 0x863   :  { %1741 = vst.msk [vmem:[%s3598_s10] sm:$0xff] %vm1740_vm4, %v2618_v23  ;;  %v1753_v24 = vrot.slane %v2618_v23, 4 }
 0x865   :  { %v1764_v27 = vsub.f32 %v2618_v23, %v1753_v24 }
 0x867   :  { %v1783_v31 = vmul.f32 %v1772_v26, %v1764_v27 }
 0x869   :  { %v1788_v8 = vrot.slane %v1783_v31, 4 }
 0x86b   :  { %v2634_v32 = vsel %vm600_vm0, %v1788_v8, %v1783_v31 }
 0x86c   :  { %v1795_v33 = vrot.slane %v2634_v32, 4 }
 0x86e   :  { %v2642_v35 = vsub.f32 %v1783_v31, %v1795_v33  ;;  %v332_v31 = vpop.permute.xlu1 %331 }
 0x870   :  { %v1841_v36 = vmul.f32 2.0, %v2642_v35 }
 0x872   :  { %v1845_v42 = vsub.f32 %v2642_v35, %v1841_v36 }
 0x874   :  { %v2649_v43 = vmul.f32 %v1861_v39, %v1845_v42 }
 0x876   :  { %v360_v1 = vpop.permute.xlu1 %359 }
 0x87e   :  { %v388_v8 = vpop.permute.xlu1 %387 }
 0x886   :  { %v199_v36 = vpop.permute.xlu1 %198 }
 0x8a9   :  { %v784_v45 = vpop.permute.xlu2 %783 }
 0x8aa   :  { %v786_v49 = vmul.f32 %v2412_v41, %v784_v45 }
 0x8b2   :  { %v119_v53 = vpop.permute.xlu2 %118 }
 0x8c1   :  { %v778_v46 = vpop.permute.xlu0 %777 }
 0x8c2   :  { %v780_v48 = vmul.f32 %v2407_v40, %v778_v46 }
 0x8c4   :  { %v787_v52 = vadd.f32 %v786_v49, %v780_v48 }
 0x8c6   :  { %v788_v57 = vadd.f32 %v2419_v47, %v787_v52  ;;  %v255_v52 = vpop.permute.xlu1 %254 }
 0x8c8   :  { %2192 = vtanh.f32 %v788_v57 }
 0x8ca   :  { %v91_v55 = vpop.permute.xlu0 %90 }
 0x8cb   :  { %v171_v60 = vsel %vm169_vm1, %v58_v44, %v91_v55  ;;  %v439_v55 = vsel %vm169_vm1, %v332_v31, %v360_v1 }
 0x8cc   :  { %v179_v61 = vsel %vm177_vm2, %v171_v60, %v119_v53  ;;  %v446_v60 = vsel %vm177_vm2, %v439_v55, %v388_v8 }
 0x8cd   :  { %v187_v16 = vsel %vm185_vm3, %v179_v61, %v147_v56 }
 0x8ce   :  { %473 = vst [vmem:[#allocation2 + $0x10] sm:$0xf] %v187_v16  ;;  %v2193_v51 = vpop.eup %2192  ;;  %v283_v56 = vpop.permute.xlu1 %282 }
 0x8d5   :  { %v759_v10 = vld [vmem:[#allocation2 + $0x10] sm:$0xf] }
 0x8d6   :  { %v790_v7 = vmul.f32 %v2193_v51, %v759_v10 }
 0x8d8   :  { %791 = vrot.lane.b32.xlu2 %v790_v7, %s2269_s20 }
 0x932   :  { %v792_v11 = vpop.permute.xlu2 %791 }
 0x933   :  { %v793_v12 = vadd.f32 %v792_v11, %v790_v7 }
 0x935   :  { %794 = vrot.lane.b32.xlu0 %v793_v12, %s2272_s21 }
 0x9a7   :  { %v795_v22 = vpop.permute.xlu0 %794 }
 0x9a8   :  { %v2659_v13 = vadd.f32 %v795_v22, %v793_v12 }
 0x9aa   :  { %v2662_v14 = vmul.f32 0.33333334, %v2659_v13 }
 0x9ac   :  { %v798_v54 = vadd.f32 %v2662_v14, %v2576_v6 }
 0x9ae   :  { %v805_v15 = vmul.f32 %v2384_v25, %v798_v54  ;;  %v799_v17 = vmul.f32 %v2373_v21, %v798_v54 }
 0x9b0   :  { %v806_v19 = vsel %vm600_vm0, %v805_v15, 0.0  ;;  %v800_v27 = vsel %vm600_vm0, %v799_v17, 0.0 }
 0x9b1   :  { %807 = vadd.xlane.f32.xlu0 %v806_v19  ;;  %801 = vadd.xlane.f32.xlu2 %v800_v27 }
 0x9c5   :  { %415 = vperm.xlu0 %2064, %v2567_v50  }
 0x9c9   :  { %226 = vperm.xlu2 %2063, %v2567_v50  }
 0x9cd   :  { %2069 = vset.pattern.permute.xlu0 %v2261_v0 }
 0x9d1   :  { %2068 = vset.pattern.permute.xlu2 %v2263_v3 }
 0xa24   :  { %v808_v42 = vpop.xlane.xlu0 %807  ;;  %v802_v44 = vpop.xlane.xlu2 %801 }
 0xa25   :  { %v809_v45 = vadd.f32 %v2396_v30, %v808_v42  ;;  %v803_v46 = vadd.f32 %v2396_v30, %v802_v44 }
 0xa27   :  { %v810_v48 = vmax.f32 %v809_v45, 0.0  ;;  %v804_v49 = vmax.f32 %v803_v46, 0.0 }
 0xa29   :  { %819 = vperm.xlu2 %2068, %v810_v48   ;;  %813 = vperm.xlu1 %2067, %v804_v49  }
 0xa2c   :  { %v227_v50 = vpop.permute.xlu2 %226 }
 0xa2d   :  { %v306_v53 = vsel %vm169_vm1, %v199_v36, %v227_v50 }
 0xa2e   :  { %v313_v57 = vsel %vm177_vm2, %v306_v53, %v255_v52 }
 0xa2f   :  { %v320_v61 = vsel %vm185_vm3, %v313_v57, %v283_v56 }
 0xa31   :  { %2071 = vset.pattern.permute.xlu2 %v2261_v0  ;;  %2072 = vset.pattern.permute.xlu1 %v2263_v3 }
 0xa37   :  { %v416_v51 = vpop.permute.xlu0 %415 }
 0xa38   :  { %v453_v10 = vsel %vm185_vm3, %v446_v60, %v416_v51 }
 0xa39   :  { %v474_v7 = vmul.f32 0.33333334, %v453_v10  ;;  %v479_v11 = vmul.f32 0.6666667, %v453_v10  ;;  %v484_v12 = vadd.f32 %v453_v10, %v320_v61 }
 0xa3b   :  { %v475_v22 = vadd.f32 %v474_v7, %v320_v61  ;;  %v480_v54 = vadd.f32 %v479_v11, %v320_v61  ;;  %v485_v15 = vadd.f32 %v484_v12, %v187_v16 }
 0xa3d   :  { %v476_v17 = vmul.f32 0.33333334, %v475_v22  ;;  %v481_v19 = vmul.f32 0.6666667, %v480_v54  ;;  %486 = vst [vmem:[#allocation2 + $0x1c] sm:$0xf] %v485_v15 }
 0xa3f   :  { %v477_v27 = vadd.f32 %v476_v17, %v187_v16  ;;  %v482_v31 = vadd.f32 %v481_v19, %v187_v16 }
 0xa41   :  { %478 = vst [vmem:[#allocation2 + $0x14] sm:$0xf] %v477_v27 }
 0xa42   :  { %483 = vst [vmem:[#allocation2 + $0x18] sm:$0xf] %v482_v31 }
 0xa48   :  { %v760_v48 = vld [vmem:[#allocation2 + $0x14] sm:$0xf] }
 0xa83   :  { %v820_v1 = vpop.permute.xlu2 %819 }
 0xa84   :  { %v822_v36 = vmul.f32 %v2412_v41, %v820_v1 }
 0xa9b   :  { %v814_v8 = vpop.permute.xlu1 %813 }
 0xa9c   :  { %v816_v42 = vmul.f32 %v2407_v40, %v814_v8  ;;  %v761_v8 = vld [vmem:[#allocation2 + $0x18] sm:$0xf] }
 0xa9e   :  { %v823_v44 = vadd.f32 %v822_v36, %v816_v42 }
 0xaa0   :  { %v824_v45 = vadd.f32 %v2419_v47, %v823_v44 }
 0xaa2   :  { %2194 = vtanh.f32 %v824_v45 }
 0xaa8   :  { %v2195_v46 = vpop.eup %2194 }
 0xaa9   :  { %v826_v49 = vmul.f32 %v2195_v46, %v760_v48 }
 0xaab   :  { %827 = vrot.lane.b32.xlu1 %v826_v49, %s2269_s20 }
 0xb1d   :  { %v828_v52 = vpop.permute.xlu1 %827 }
 0xb1e   :  { %v829_v50 = vadd.f32 %v828_v52, %v826_v49 }
 0xb20   :  { %830 = vrot.lane.b32.xlu2 %v829_v50, %s2272_s21 }
 0xb7a   :  { %v831_v16 = vpop.permute.xlu2 %830 }
 0xb7b   :  { %v2689_v53 = vadd.f32 %v831_v16, %v829_v50 }
 0xb7d   :  { %v833_v55 = vsub.f32 %v2689_v53, %v2662_v14  ;;  %v869_v46 = vsub.f32 %v2659_v13, %v2689_v53 }
 0xb7f   :  { %v834_v56 = vadd.f32 %v833_v55, %v2576_v6 }
 0xb81   :  { %v841_v57 = vmul.f32 %v2384_v25, %v834_v56  ;;  %v835_v60 = vmul.f32 %v2373_v21, %v834_v56 }
 0xb83   :  { %v842_v61 = vsel %vm600_vm0, %v841_v57, 0.0  ;;  %v836_v51 = vsel %vm600_vm0, %v835_v60, 0.0 }
 0xb84   :  { %843 = vadd.xlane.f32.xlu2 %v842_v61  ;;  %837 = vadd.xlane.f32.xlu1 %v836_v51 }
 0xbf7   :  { %v838_v10 = vpop.xlane.xlu1 %837  ;;  %v844_v12 = vpop.xlane.xlu2 %843 }
 0xbf8   :  { %v839_v7 = vadd.f32 %v2396_v30, %v838_v10  ;;  %v845_v14 = vadd.f32 %v2396_v30, %v844_v12 }
 0xbfa   :  { %v840_v11 = vmax.f32 %v839_v7, 0.0  ;;  %v846_v22 = vmax.f32 %v845_v14, 0.0 }
 0xbfc   :  { %849 = vperm.xlu0 %2069, %v840_v11  }
 0xc04   :  { %2070 = vset.pattern.permute.xlu0 %v2263_v3 }
 0xc05   :  { %855 = vperm.xlu0 %2070, %v846_v22  }
 0xc0d   :  { %2074 = vset.pattern.permute.xlu0 %v2267_v37 }
 0xc6e   :  { %v850_v54 = vpop.permute.xlu0 %849 }
 0xc6f   :  { %v852_v17 = vmul.f32 %v2407_v40, %v850_v54 }
 0xc77   :  { %v856_v15 = vpop.permute.xlu0 %855 }
 0xc78   :  { %v858_v19 = vmul.f32 %v2412_v41, %v856_v15 }
 0xc7a   :  { %v859_v27 = vadd.f32 %v858_v19, %v852_v17 }
 0xc7c   :  { %v860_v31 = vadd.f32 %v2419_v47, %v859_v27  ;;  %v2726_v27 = vld [vmem:[%s3588_s0 + $0x8] sm:$0xf] }
 0xc7e   :  { %2196 = vtanh.f32 %v860_v31 }
 0xc84   :  { %v2197_v1 = vpop.eup %2196 }
 0xc85   :  { %v862_v36 = vmul.f32 %v2197_v1, %v761_v8 }
 0xc87   :  { %863 = vrot.lane.b32.xlu0 %v862_v36, %s2269_s20 }
 0xcf9   :  { %v864_v42 = vpop.permute.xlu0 %863 }
 0xcfa   :  { %v865_v44 = vadd.f32 %v864_v42, %v862_v36 }
 0xcfc   :  { %866 = vrot.lane.b32.xlu1 %v865_v44, %s2272_s21 }
 0xd6e   :  { %v867_v45 = vpop.permute.xlu1 %866 }
 0xd6f   :  { %v868_v48 = vadd.f32 %v867_v45, %v865_v44  ;;  %v2739_v44 = vld [vmem:[%s3591_s3 + $0x1] ss:$0 sm:$0xff] }
 0xd71   :  { %v870_v49 = vadd.f32 %v869_v46, %v868_v48 }
 0xd73   :  { %v871_v52 = vadd.f32 %v870_v49, %v2576_v6 }
 0xd75   :  { %v878_v50 = vmul.f32 %v2384_v25, %v871_v52  ;;  %v872_v16 = vmul.f32 %v2373_v21, %v871_v52  ;;  %v2757_v52 = vld [vmem:[%s3592_s4] ss:$0 sm:$0xff] }
 0xd77   :  { %v879_v55 = vsel %vm600_vm0, %v878_v50, 0.0  ;;  %v873_v56 = vsel %vm600_vm0, %v872_v16, 0.0 }
 0xd78   :  { %880 = vadd.xlane.f32.xlu0 %v879_v55  ;;  %874 = vadd.xlane.f32.xlu2 %v873_v56 }
 0xd8c   :  { %94 = vperm.xlu0 %2074, %v2726_v27  }
 0xd94   :  { %2075 = vset.pattern.permute.xlu0 %v2261_v0 }
 0xdeb   :  { %v881_v57 = vpop.xlane.xlu0 %880  ;;  %v875_v60 = vpop.xlane.xlu2 %874 }
 0xdec   :  { %v882_v61 = vadd.f32 %v2396_v30, %v881_v57  ;;  %v876_v51 = vadd.f32 %v2396_v30, %v875_v60  ;;  %v762_v30 = vld [vmem:[#allocation2 + $0x1c] sm:$0xf] }
 0xdee   :  { %v883_v10 = vmax.f32 %v882_v61, 0.0  ;;  %v877_v7 = vmax.f32 %v876_v51, 0.0  ;;  %v2770_v51 = vld [vmem:[%s3593_s5] ss:$0 sm:$0xff] }
 0xdf0   :  { %892 = vperm.xlu1 %2072, %v883_v10   ;;  %886 = vperm.xlu2 %2071, %v877_v7   ;;  %v2776_v7 = vld [vmem:[%s3593_s5 + $0x1] ss:$0 sm:$0xff] }
 0xdf8   :  { %2073 = vset.pattern.permute.xlu1 %v2265_v28  ;;  %2077 = vset.pattern.permute.xlu2 %v2263_v3 }
 0xdfe   :  { %v95_v57 = vpop.permute.xlu0 %94 }
 0xe4a   :  { %v887_v21 = vpop.permute.xlu2 %886 }
 0xe4b   :  { %v889_v11 = vmul.f32 %v2407_v40, %v887_v21  ;;  %v906_v40 = vadd.f32 %v868_v48, %v2689_v53 }
 0xe62   :  { %v893_v25 = vpop.permute.xlu1 %892 }
 0xe63   :  { %v895_v12 = vmul.f32 %v2412_v41, %v893_v25  ;;  %v907_v41 = vmul.f32 3.0, %v906_v40 }
 0xe65   :  { %v896_v14 = vadd.f32 %v895_v12, %v889_v11  ;;  %v908_v31 = vadd.f32 %v907_v41, %v2659_v13  ;;  %v2746_v13 = vld [vmem:[%s3591_s3] ss:$0 sm:$0xff] }
 0xe67   :  { %v897_v22 = vadd.f32 %v2419_v47, %v896_v14 }
 0xe69   :  { %2198 = vtanh.f32 %v897_v22  ;;  %v2783_v22 = vld [vmem:[%s3594_s6] ss:$0 sm:$0xff] }
 0xe6f   :  { %v2199_v54 = vpop.eup %2198 }
 0xe70   :  { %v899_v15 = vmul.f32 %v2199_v54, %v762_v30 }
 0xe72   :  { %900 = vrot.lane.b32.xlu1 %v899_v15, %s2269_s20 }
 0xee4   :  { %v901_v17 = vpop.permute.xlu1 %900 }
 0xee5   :  { %v902_v19 = vadd.f32 %v901_v17, %v899_v15 }
 0xee7   :  { %903 = vrot.lane.b32.xlu2 %v902_v19, %s2272_s21 }
 0xf41   :  { %v904_v47 = vpop.permute.xlu2 %903 }
 0xf42   :  { %v905_v1 = vadd.f32 %v904_v47, %v902_v19 }
 0xf44   :  { %v909_v8 = vadd.f32 %v908_v31, %v905_v1 }
 0xf46   :  { %v910_v36 = vmul.f32 0.125, %v909_v8 }
 0xf48   :  { %v2733_v42 = vadd.f32 %v910_v36, %v2576_v6 }
 0xf4a   :  { %912 = vst [vmem:[#allocation3 + $0x8] sm:$0xf] %v2733_v42  ;;  %v923_v53 = vmul.f32 %v2739_v44, %v2733_v42  ;;  %v917_v45 = vmul.f32 %v2746_v13, %v2733_v42 }
 0xf4c   :  { %v924_v6 = vsel %vm600_vm0, %v923_v53, 0.0  ;;  %v918_v46 = vsel %vm600_vm0, %v917_v45, 0.0 }
 0xf4d   :  { %925 = vadd.xlane.f32.xlu2 %v924_v6  ;;  %919 = vadd.xlane.f32.xlu1 %v918_v46 }
 0xf66   :  { %62 = vperm.xlu1 %2073, %v2726_v27  }
 0xf6e   :  { %2084 = vset.pattern.permute.xlu1 %v2277_v5 }
 0xfc0   :  { %v926_v48 = vpop.xlane.xlu2 %925  ;;  %v920_v49 = vpop.xlane.xlu1 %919 }
 0xfc1   :  { %v927_v50 = vadd.f32 %v2757_v52, %v926_v48  ;;  %v921_v16 = vadd.f32 %v2757_v52, %v920_v49 }
 0xfc3   :  { %v928_v55 = vmax.f32 %v927_v50, 0.0  ;;  %v922_v56 = vmax.f32 %v921_v16, 0.0 }
 0xfc5   :  { %937 = vperm.xlu2 %2077, %v928_v55   ;;  %931 = vperm.xlu0 %2075, %v922_v56  }
 0xfcd   :  { %2076 = vset.pattern.permute.xlu0 %v2268_v38  ;;  %2078 = vset.pattern.permute.xlu2 %v2266_v29 }
 0xfce   :  { %122 = vperm.xlu0 %2076, %v2726_v27   ;;  %150 = vperm.xlu2 %2078, %v2726_v27  }
 0xfd6   :  { %2079 = vset.pattern.permute.xlu2 %v2273_v62  ;;  %2085 = vset.pattern.permute.xlu0 %v2278_v9 }
 0xfd8   :  { %v63_v11 = vpop.permute.xlu1 %62 }
 0xfd9   :  { %v172_v14 = vsel %vm169_vm1, %v63_v11, %v95_v57 }
0x101f   :  { %v938_v60 = vpop.permute.xlu2 %937 }
0x1020   :  { %v940_v21 = vmul.f32 %v2776_v7, %v938_v60 }
0x1028   :  { %v151_v12 = vpop.permute.xlu2 %150 }
0x1037   :  { %v932_v61 = vpop.permute.xlu0 %931 }
0x1038   :  { %v934_v10 = vmul.f32 %v2770_v51, %v932_v61 }
0x103a   :  { %v941_v25 = vadd.f32 %v940_v21, %v934_v10 }
0x103c   :  { %v942_v54 = vadd.f32 %v2783_v22, %v941_v25 }
0x103e   :  { %2200 = vtanh.f32 %v942_v54 }
0x1040   :  { %v123_v30 = vpop.permute.xlu0 %122 }
0x1041   :  { %v180_v15 = vsel %vm177_vm2, %v172_v14, %v123_v30 }
0x1042   :  { %v2788_v17 = vsel %vm185_vm3, %v180_v15, %v151_v12 }
0x1043   :  { %487 = vst [vmem:[#allocation2 + $0x20] sm:$0xf] %v2788_v17 }
0x1044   :  { %v2201_v19 = vpop.eup %2200 }
0x104a   :  { %v913_v40 = vld [vmem:[#allocation2 + $0x20] sm:$0xf] }
0x104b   :  { %v944_v41 = vmul.f32 %v2201_v19, %v913_v40 }
0x104d   :  { %945 = vrot.lane.b32.xlu1 %v944_v41, %s2269_s20 }
0x10bf   :  { %v946_v47 = vpop.permute.xlu1 %945 }
0x10c0   :  { %v947_v31 = vadd.f32 %v946_v47, %v944_v41 }
0x10c2   :  { %948 = vrot.lane.b32.xlu2 %v947_v31, %s2272_s21 }
0x10ca   :  { %335 = vperm.xlu2 %2079, %v2726_v27  }
0x10d2   :  { %2080 = vset.pattern.permute.xlu2 %v2275_v2 }
0x10d3   :  { %363 = vperm.xlu2 %2080, %v2726_v27  }
0x10db   :  { %2081 = vset.pattern.permute.xlu2 %v2276_v4 }
0x10dc   :  { %391 = vperm.xlu2 %2081, %v2726_v27  }
0x10e4   :  { %2082 = vset.pattern.permute.xlu2 %v2271_v59 }
0x10e5   :  { %202 = vperm.xlu2 %2082, %v2726_v27  }
0x10ed   :  { %2083 = vset.pattern.permute.xlu2 %v2270_v58 }
0x10ee   :  { %230 = vperm.xlu2 %2083, %v2726_v27  }
0x10f6   :  { %2086 = vset.pattern.permute.xlu2 %v2274_v63 }
0x10f7   :  { %286 = vperm.xlu2 %2086, %v2726_v27  }
0x10ff   :  { %2087 = vset.pattern.permute.xlu2 %v2261_v0 }
0x111c   :  { %v949_v1 = vpop.permute.xlu2 %948 }
0x111d   :  { %v2805_v8 = vadd.f32 %v949_v1, %v947_v31 }
0x111f   :  { %v2808_v36 = vmul.f32 0.33333334, %v2805_v8 }
0x1121   :  { %v952_v53 = vadd.f32 %v2808_v36, %v2733_v42 }
0x1123   :  { %v959_v45 = vmul.f32 %v2739_v44, %v952_v53  ;;  %v953_v6 = vmul.f32 %v2746_v13, %v952_v53 }
0x1124   :  { %v336_v49 = vpop.permute.xlu2 %335 }
0x1125   :  { %v960_v46 = vsel %vm600_vm0, %v959_v45, 0.0  ;;  %v954_v48 = vsel %vm600_vm0, %v953_v6, 0.0 }
0x1126   :  { %961 = vadd.xlane.f32.xlu0 %v960_v46  ;;  %955 = vadd.xlane.f32.xlu1 %v954_v48 }
0x112d   :  { %v364_v50 = vpop.permute.xlu2 %363 }
0x112e   :  { %v440_v11 = vsel %vm169_vm1, %v336_v49, %v364_v50 }
0x1136   :  { %v392_v16 = vpop.permute.xlu2 %391 }
0x1137   :  { %v447_v30 = vsel %vm177_vm2, %v440_v11, %v392_v16 }
0x113a   :  { %258 = vperm.xlu0 %2085, %v2726_v27  }
0x113f   :  { %419 = vperm.xlu1 %2084, %v2726_v27   ;;  %v203_v56 = vpop.permute.xlu2 %202 }
0x1142   :  { %2089 = vset.pattern.permute.xlu0 %v2261_v0 }
0x1147   :  { %2092 = vset.pattern.permute.xlu1 %v2263_v3 }
0x1148   :  { %v231_v21 = vpop.permute.xlu2 %230 }
0x1149   :  { %v307_v27 = vsel %vm169_vm1, %v203_v56, %v231_v21 }
0x1151   :  { %v287_v54 = vpop.permute.xlu2 %286 }
0x1199   :  { %v956_v55 = vpop.xlane.xlu1 %955  ;;  %v962_v61 = vpop.xlane.xlu0 %961 }
0x119a   :  { %v957_v57 = vadd.f32 %v2757_v52, %v956_v55  ;;  %v963_v10 = vadd.f32 %v2757_v52, %v962_v61 }
0x119c   :  { %v958_v60 = vmax.f32 %v957_v57, 0.0  ;;  %v964_v25 = vmax.f32 %v963_v10, 0.0 }
0x119e   :  { %967 = vperm.xlu2 %2087, %v958_v60  }
0x11a6   :  { %2088 = vset.pattern.permute.xlu2 %v2263_v3 }
0x11a7   :  { %973 = vperm.xlu2 %2088, %v964_v25  }
0x11ac   :  { %v259_v12 = vpop.permute.xlu0 %258 }
0x11ad   :  { %v314_v14 = vsel %vm177_vm2, %v307_v27, %v259_v12 }
0x11ae   :  { %v321_v15 = vsel %vm185_vm3, %v314_v14, %v287_v54 }
0x11af   :  { %2091 = vset.pattern.permute.xlu2 %v2261_v0 }
0x11b1   :  { %v420_v19 = vpop.permute.xlu1 %419 }
0x11b2   :  { %v454_v40 = vsel %vm185_vm3, %v447_v30, %v420_v19 }
0x11b3   :  { %v488_v41 = vmul.f32 0.33333334, %v454_v40  ;;  %v493_v47 = vmul.f32 0.6666667, %v454_v40  ;;  %v498_v31 = vadd.f32 %v454_v40, %v321_v15 }
0x11b5   :  { %v489_v1 = vadd.f32 %v488_v41, %v321_v15  ;;  %v494_v53 = vadd.f32 %v493_v47, %v321_v15  ;;  %v499_v45 = vadd.f32 %v498_v31, %v2788_v17 }
0x11b7   :  { %v490_v6 = vmul.f32 0.33333334, %v489_v1  ;;  %v495_v46 = vmul.f32 0.6666667, %v494_v53  ;;  %500 = vst [vmem:[#allocation2 + $0x2c] sm:$0xf] %v499_v45 }
0x11b9   :  { %v491_v48 = vadd.f32 %v490_v6, %v2788_v17  ;;  %v496_v49 = vadd.f32 %v495_v46, %v2788_v17 }
0x11bb   :  { %492 = vst [vmem:[#allocation2 + $0x24] sm:$0xf] %v491_v48 }
0x11bc   :  { %497 = vst [vmem:[#allocation2 + $0x28] sm:$0xf] %v496_v49 }
0x11c2   :  { %v914_v10 = vld [vmem:[#allocation2 + $0x24] sm:$0xf] }
0x11f8   :  { %v968_v50 = vpop.permute.xlu2 %967 }
0x11f9   :  { %v970_v55 = vmul.f32 %v2770_v51, %v968_v50 }
0x1201   :  { %v974_v16 = vpop.permute.xlu2 %973 }
0x1202   :  { %v976_v56 = vmul.f32 %v2776_v7, %v974_v16  ;;  %v915_v16 = vld [vmem:[#allocation2 + $0x28] sm:$0xf] }
0x1204   :  { %v977_v57 = vadd.f32 %v976_v56, %v970_v55 }
0x1206   :  { %v978_v60 = vadd.f32 %v2783_v22, %v977_v57 }
0x1208   :  { %2202 = vtanh.f32 %v978_v60 }
0x120e   :  { %v2203_v61 = vpop.eup %2202 }
0x120f   :  { %v980_v21 = vmul.f32 %v2203_v61, %v914_v10 }
0x1211   :  { %981 = vrot.lane.b32.xlu1 %v980_v21, %s2269_s20 }
0x1283   :  { %v982_v25 = vpop.permute.xlu1 %981 }
0x1284   :  { %v983_v27 = vadd.f32 %v982_v25, %v980_v21 }
0x1286   :  { %984 = vrot.lane.b32.xlu2 %v983_v27, %s2272_s21 }
0x12e0   :  { %v985_v17 = vpop.permute.xlu2 %984 }
0x12e1   :  { %v2838_v11 = vadd.f32 %v985_v17, %v983_v27 }
0x12e3   :  { %v987_v12 = vsub.f32 %v2838_v11, %v2808_v36  ;;  %v1023_v61 = vsub.f32 %v2805_v8, %v2838_v11 }
0x12e5   :  { %v988_v14 = vadd.f32 %v987_v12, %v2733_v42 }
0x12e7   :  { %v995_v54 = vmul.f32 %v2739_v44, %v988_v14  ;;  %v989_v30 = vmul.f32 %v2746_v13, %v988_v14 }
0x12e9   :  { %v996_v15 = vsel %vm600_vm0, %v995_v54, 0.0  ;;  %v990_v19 = vsel %vm600_vm0, %v989_v30, 0.0 }
0x12ea   :  { %997 = vadd.xlane.f32.xlu2 %v996_v15  ;;  %991 = vadd.xlane.f32.xlu1 %v990_v19 }
0x135d   :  { %v992_v40 = vpop.xlane.xlu1 %991  ;;  %v998_v31 = vpop.xlane.xlu2 %997 }
0x135e   :  { %v993_v41 = vadd.f32 %v2757_v52, %v992_v40  ;;  %v999_v36 = vadd.f32 %v2757_v52, %v998_v31 }
0x1360   :  { %v994_v47 = vmax.f32 %v993_v41, 0.0  ;;  %v1000_v1 = vmax.f32 %v999_v36, 0.0 }
0x1362   :  { %1003 = vperm.xlu0 %2089, %v994_v47  }
0x136a   :  { %2090 = vset.pattern.permute.xlu0 %v2263_v3 }
0x136b   :  { %1009 = vperm.xlu0 %2090, %v1000_v1  }
0x1373   :  { %2093 = vset.pattern.permute.xlu0 %v2261_v0 }
0x13d4   :  { %v1004_v53 = vpop.permute.xlu0 %1003 }
0x13d5   :  { %v1006_v6 = vmul.f32 %v2770_v51, %v1004_v53 }
0x13dd   :  { %v1010_v45 = vpop.permute.xlu0 %1009 }
0x13de   :  { %v1012_v46 = vmul.f32 %v2776_v7, %v1010_v45 }
0x13e0   :  { %v1013_v48 = vadd.f32 %v1012_v46, %v1006_v6  ;;  %v916_v46 = vld [vmem:[#allocation2 + $0x2c] sm:$0xf] }
0x13e2   :  { %v1014_v49 = vadd.f32 %v2783_v22, %v1013_v48 }
0x13e4   :  { %2204 = vtanh.f32 %v1014_v49 }
0x13ea   :  { %v2205_v50 = vpop.eup %2204 }
0x13eb   :  { %v1016_v55 = vmul.f32 %v2205_v50, %v915_v16 }
0x13ed   :  { %1017 = vrot.lane.b32.xlu0 %v1016_v55, %s2269_s20 }
0x145f   :  { %v1018_v56 = vpop.permute.xlu0 %1017 }
0x1460   :  { %v1019_v57 = vadd.f32 %v1018_v56, %v1016_v55 }
0x1462   :  { %1020 = vrot.lane.b32.xlu1 %v1019_v57, %s2272_s21 }
0x14d4   :  { %v1021_v60 = vpop.permute.xlu1 %1020 }
0x14d5   :  { %v1022_v10 = vadd.f32 %v1021_v60, %v1019_v57 }
0x14d7   :  { %v1024_v21 = vadd.f32 %v1023_v61, %v1022_v10  ;;  %v1060_v16 = vadd.f32 %v1022_v10, %v2838_v11 }
0x14d9   :  { %v1025_v25 = vadd.f32 %v1024_v21, %v2733_v42  ;;  %v1061_v55 = vmul.f32 3.0, %v1060_v16 }
0x14db   :  { %v1032_v27 = vmul.f32 %v2739_v44, %v1025_v25  ;;  %v1026_v17 = vmul.f32 %v2746_v13, %v1025_v25  ;;  %v1062_v57 = vadd.f32 %v1061_v55, %v2805_v8 }
0x14dd   :  { %v1033_v12 = vsel %vm600_vm0, %v1032_v27, 0.0  ;;  %v1027_v14 = vsel %vm600_vm0, %v1026_v17, 0.0 }
0x14de   :  { %1034 = vadd.xlane.f32.xlu0 %v1033_v12  ;;  %1028 = vadd.xlane.f32.xlu2 %v1027_v14 }
0x1551   :  { %v1035_v54 = vpop.xlane.xlu0 %1034  ;;  %v1029_v30 = vpop.xlane.xlu2 %1028 }
0x1552   :  { %v1036_v15 = vadd.f32 %v2757_v52, %v1035_v54  ;;  %v1030_v19 = vadd.f32 %v2757_v52, %v1029_v30 }
0x1554   :  { %v1037_v40 = vmax.f32 %v1036_v15, 0.0  ;;  %v1031_v41 = vmax.f32 %v1030_v19, 0.0 }
0x1556   :  { %1046 = vperm.xlu1 %2092, %v1037_v40   ;;  %1040 = vperm.xlu2 %2091, %v1031_v41   ;;  %v2900_v41 = vld [vmem:[%s3597_s9 + $0x8] sm:$0xff] }
0x155e   :  { %2094 = vset.pattern.permute.xlu2 %v2265_v28 }
0x15b0   :  { %v1041_v47 = vpop.permute.xlu2 %1040 }
0x15b1   :  { %v1043_v36 = vmul.f32 %v2770_v51, %v1041_v47 }
0x15c8   :  { %v1047_v31 = vpop.permute.xlu1 %1046 }
0x15c9   :  { %v1049_v1 = vmul.f32 %v2776_v7, %v1047_v31 }
0x15cb   :  { %v1050_v53 = vadd.f32 %v1049_v1, %v1043_v36  ;;  %v1773_v36 = vrot.slane %v2900_v41, 4 }
0x15cd   :  { %v1051_v45 = vadd.f32 %v2783_v22, %v1050_v53  ;;  %v1850_v53 = vmul.f32 3.0, %v2900_v41 }
0x15cf   :  { %2206 = vtanh.f32 %v1051_v45  ;;  %v1774_v45 = vsel %vm600_vm0, %v1772_v26, %v1773_v36 }
0x15d5   :  { %v2207_v6 = vpop.eup %2206 }
0x15d6   :  { %v1053_v48 = vmul.f32 %v2207_v6, %v916_v46 }
0x15d8   :  { %1054 = vrot.lane.b32.xlu1 %v1053_v48, %s2269_s20 }
0x164a   :  { %v1055_v49 = vpop.permute.xlu1 %1054 }
0x164b   :  { %v1056_v50 = vadd.f32 %v1055_v49, %v1053_v48  ;;  %v2929_v48 = vmul.f32 %v1850_v53, %v2900_v41 }
0x164d   :  { %1057 = vrot.lane.b32.xlu2 %v1056_v50, %s2272_s21  ;;  %v1862_v20 = vrot.slane %v2929_v48, 4 }
0x164f   :  { %v1863_v16 = vsel %vm600_vm0, %v1861_v39, %v1862_v20 }
0x16a7   :  { %v1058_v56 = vpop.permute.xlu2 %1057 }
0x16a8   :  { %v1059_v60 = vadd.f32 %v1058_v56, %v1056_v50 }
0x16aa   :  { %v1063_v61 = vadd.f32 %v1062_v57, %v1059_v60 }
0x16ac   :  { %v1064_v21 = vmul.f32 0.125, %v1063_v61 }
0x16ae   :  { %v2874_v25 = vadd.f32 %v1064_v21, %v2733_v42  ;;  %v2886_v42 = vld [vmem:[%s3588_s0 + $0xc] sm:$0xf] }
0x16b0   :  { %1066 = vst [vmem:[#allocation3 + $0xc] sm:$0xf] %v2874_v25  ;;  %v1077_v27 = vmul.f32 %v2739_v44, %v2874_v25  ;;  %v1071_v17 = vmul.f32 %v2746_v13, %v2874_v25 }
0x16b2   :  { %v1078_v11 = vsel %vm600_vm0, %v1077_v27, 0.0  ;;  %v1072_v10 = vsel %vm600_vm0, %v1071_v17, 0.0 }
0x16b3   :  { %1079 = vadd.xlane.f32.xlu2 %v1078_v11  ;;  %1073 = vadd.xlane.f32.xlu1 %v1072_v10 }
0x16b7   :  { %v1684_v8 = vld [vmem:[#allocation3 + $0x8] sm:$0xff] }
0x16b8   :  { %2208 = vtanh.f32 %v1684_v8 }
0x16be   :  { %v2209_v12 = vpop.eup %2208 }
0x16bf   :  { %1730 = vmatmul.f32.vlgmr.msra.gmra.mxu1 %v2209_v12 }
0x16cb   :  { %67 = vperm.xlu2 %2094, %v2886_v42  }
0x16d3   :  { %2097 = vset.pattern.permute.xlu2 %v2266_v29 }
0x16d4   :  { %154 = vperm.xlu2 %2097, %v2886_v42  }
0x16dc   :  { %2098 = vset.pattern.permute.xlu2 %v2273_v62 }
0x1726   :  { %v1080_v14 = vpop.xlane.xlu2 %1079  ;;  %v1074_v54 = vpop.xlane.xlu1 %1073 }
0x1727   :  { %v1081_v30 = vadd.f32 %v2757_v52, %v1080_v14  ;;  %v1075_v15 = vadd.f32 %v2757_v52, %v1074_v54 }
0x1729   :  { %v1082_v19 = vmax.f32 %v1081_v30, 0.0  ;;  %v1076_v40 = vmax.f32 %v1075_v15, 0.0 }
0x172b   :  { %1091 = vperm.xlu1 %2092, %v1082_v19   ;;  %1085 = vperm.xlu0 %2093, %v1076_v40  }
0x1733   :  { %2095 = vset.pattern.permute.xlu0 %v2267_v37  ;;  %2103 = vset.pattern.permute.xlu1 %v2277_v5 }
0x1734   :  { %98 = vperm.xlu0 %2095, %v2886_v42  }
0x173c   :  { %2096 = vset.pattern.permute.xlu0 %v2268_v38  ;;  %v1731_v47 = vpop.f32.mrf.mxu1 }
0x173d   :  { %v2904_v31 = vadd.f32 %v2608_v18, %v1731_v47  ;;  %126 = vperm.xlu0 %2096, %v2886_v42  }
0x173f   :  { %1742 = vst.msk [vmem:[%s3598_s10 + $0x8] sm:$0xff] %vm1740_vm4, %v2904_v31  ;;  %v1754_v1 = vrot.slane %v2904_v31, 4 }
0x1741   :  { %v1755_v18 = vsel %vm600_vm0, %v1753_v24, %v1754_v1 }
0x1742   :  { %v1765_v6 = vsub.f32 %v2904_v31, %v1755_v18 }
0x1744   :  { %v2926_v46 = vmul.f32 %v1774_v45, %v1765_v6 }
0x1745   :  { %2105 = vset.pattern.permute.xlu0 %v2274_v63 }
0x1746   :  { %v1796_v49 = vrot.slane %v2926_v46, 4 }
0x1748   :  { %v1797_v24 = vsel %vm600_vm0, %v1795_v33, %v1796_v49  ;;  %v68_v33 = vpop.permute.xlu2 %67 }
0x1749   :  { %v2940_v26 = vsub.f32 %v2926_v46, %v1797_v24 }
0x174b   :  { %v1842_v50 = vmul.f32 2.0, %v2940_v26 }
0x174d   :  { %v1846_v55 = vsub.f32 %v2940_v26, %v1842_v50 }
0x174f   :  { %v2949_v56 = vmul.f32 %v1863_v16, %v1846_v55 }
0x1750   :  { %v155_v11 = vpop.permute.xlu2 %154 }
0x179d   :  { %v1086_v57 = vpop.permute.xlu0 %1085  ;;  %v1092_v60 = vpop.permute.xlu1 %1091 }
0x179e   :  { %v1088_v21 = vmul.f32 %v2770_v51, %v1086_v57  ;;  %v1094_v27 = vmul.f32 %v2776_v7, %v1092_v60 }
0x17a0   :  { %v1095_v17 = vadd.f32 %v1094_v27, %v1088_v21 }
0x17a2   :  { %v1096_v10 = vadd.f32 %v2783_v22, %v1095_v17 }
0x17a4   :  { %2210 = vtanh.f32 %v1096_v10 }
0x17a6   :  { %v99_v61 = vpop.permute.xlu0 %98 }
0x17a7   :  { %v173_v34 = vsel %vm169_vm1, %v68_v33, %v99_v61 }
0x17aa   :  { %v2211_v14 = vpop.eup %2210 }
0x17af   :  { %v127_v8 = vpop.permute.xlu0 %126 }
0x17b0   :  { %v181_v39 = vsel %vm177_vm2, %v173_v34, %v127_v8 }
0x17b1   :  { %v2957_v12 = vsel %vm185_vm3, %v181_v39, %v155_v11 }
0x17b2   :  { %501 = vst [vmem:[#allocation2 + $0x30] sm:$0xf] %v2957_v12 }
0x17b9   :  { %v1067_v54 = vld [vmem:[#allocation2 + $0x30] sm:$0xf] }
0x17ba   :  { %v1098_v30 = vmul.f32 %v2211_v14, %v1067_v54 }
0x17bc   :  { %1099 = vrot.lane.b32.xlu1 %v1098_v30, %s2269_s20 }
0x182e   :  { %v1100_v15 = vpop.permute.xlu1 %1099 }
0x182f   :  { %v1101_v19 = vadd.f32 %v1100_v15, %v1098_v30 }
0x1831   :  { %1102 = vrot.lane.b32.xlu2 %v1101_v19, %s2272_s21 }
0x1839   :  { %339 = vperm.xlu2 %2098, %v2886_v42  }
0x1841   :  { %2099 = vset.pattern.permute.xlu2 %v2275_v2 }
0x1842   :  { %367 = vperm.xlu2 %2099, %v2886_v42  }
0x184a   :  { %2100 = vset.pattern.permute.xlu2 %v2276_v4 }
0x184b   :  { %395 = vperm.xlu2 %2100, %v2886_v42  }
0x1853   :  { %2101 = vset.pattern.permute.xlu2 %v2271_v59 }
0x1854   :  { %206 = vperm.xlu2 %2101, %v2886_v42  }
0x185c   :  { %2102 = vset.pattern.permute.xlu2 %v2270_v58 }
0x185d   :  { %234 = vperm.xlu2 %2102, %v2886_v42  }
0x1865   :  { %2104 = vset.pattern.permute.xlu2 %v2278_v9 }
0x1866   :  { %262 = vperm.xlu2 %2104, %v2886_v42  }
0x186e   :  { %2106 = vset.pattern.permute.xlu2 %v2261_v0 }
0x188b   :  { %v1103_v40 = vpop.permute.xlu2 %1102 }
0x188c   :  { %v2974_v47 = vadd.f32 %v1103_v40, %v1101_v19 }
0x188e   :  { %v2977_v53 = vmul.f32 0.33333334, %v2974_v47 }
0x1890   :  { %v1106_v18 = vadd.f32 %v2977_v53, %v2874_v25 }
0x1892   :  { %v1113_v45 = vmul.f32 %v2739_v44, %v1106_v18  ;;  %v1107_v6 = vmul.f32 %v2746_v13, %v1106_v18 }
0x1893   :  { %v340_v16 = vpop.permute.xlu2 %339 }
0x1894   :  { %v1114_v24 = vsel %vm600_vm0, %v1113_v45, 0.0  ;;  %v1108_v50 = vsel %vm600_vm0, %v1107_v6, 0.0 }
0x1895   :  { %1115 = vadd.xlane.f32.xlu0 %v1114_v24  ;;  %1109 = vadd.xlane.f32.xlu1 %v1108_v50 }
0x189c   :  { %v368_v55 = vpop.permute.xlu2 %367 }
0x189d   :  { %v441_v8 = vsel %vm169_vm1, %v340_v16, %v368_v55 }
0x18a5   :  { %v396_v57 = vpop.permute.xlu2 %395 }
0x18a6   :  { %v448_v54 = vsel %vm177_vm2, %v441_v8, %v396_v57 }
0x18a9   :  { %290 = vperm.xlu0 %2105, %v2886_v42  }
0x18ae   :  { %423 = vperm.xlu1 %2103, %v2886_v42   ;;  %v207_v60 = vpop.permute.xlu2 %206 }
0x18b1   :  { %2108 = vset.pattern.permute.xlu0 %v2261_v0 }
0x18b6   :  { %2111 = vset.pattern.permute.xlu1 %v2263_v3 }
0x18b7   :  { %v235_v17 = vpop.permute.xlu2 %234 }
0x18b8   :  { %v308_v42 = vsel %vm169_vm1, %v207_v60, %v235_v17 }
0x18c0   :  { %v263_v34 = vpop.permute.xlu2 %262 }
0x18c1   :  { %v315_v39 = vsel %vm177_vm2, %v308_v42, %v263_v34 }
0x1908   :  { %v1110_v33 = vpop.xlane.xlu1 %1109  ;;  %v1116_v27 = vpop.xlane.xlu0 %1115 }
0x1909   :  { %v1111_v61 = vadd.f32 %v2757_v52, %v1110_v33  ;;  %v1117_v11 = vadd.f32 %v2757_v52, %v1116_v27 }
0x190b   :  { %v1112_v21 = vmax.f32 %v1111_v61, 0.0  ;;  %v1118_v10 = vmax.f32 %v1117_v11, 0.0 }
0x190d   :  { %1121 = vperm.xlu2 %2106, %v1112_v21  }
0x1915   :  { %2107 = vset.pattern.permute.xlu2 %v2263_v3 }
0x1916   :  { %1127 = vperm.xlu2 %2107, %v1118_v10  }
0x191b   :  { %v291_v14 = vpop.permute.xlu0 %290 }
0x191c   :  { %v322_v30 = vsel %vm185_vm3, %v315_v39, %v291_v14 }
0x191e   :  { %2110 = vset.pattern.permute.xlu2 %v2261_v0 }
0x1920   :  { %v424_v15 = vpop.permute.xlu1 %423 }
0x1921   :  { %v455_v19 = vsel %vm185_vm3, %v448_v54, %v424_v15 }
0x1922   :  { %v502_v40 = vmul.f32 0.33333334, %v455_v19  ;;  %v507_v18 = vmul.f32 0.6666667, %v455_v19  ;;  %v512_v45 = vadd.f32 %v455_v19, %v322_v30 }
0x1924   :  { %v503_v6 = vadd.f32 %v502_v40, %v322_v30  ;;  %v508_v24 = vadd.f32 %v507_v18, %v322_v30  ;;  %v513_v50 = vadd.f32 %v512_v45, %v2957_v12 }
0x1926   :  { %v504_v16 = vmul.f32 0.33333334, %v503_v6  ;;  %v509_v55 = vmul.f32 0.6666667, %v508_v24  ;;  %514 = vst [vmem:[#allocation2 + $0x3c] sm:$0xf] %v513_v50 }
0x1928   :  { %v505_v60 = vadd.f32 %v504_v16, %v2957_v12  ;;  %v510_v57 = vadd.f32 %v509_v55, %v2957_v12 }
0x192a   :  { %506 = vst [vmem:[#allocation2 + $0x34] sm:$0xf] %v505_v60 }
0x192b   :  { %511 = vst [vmem:[#allocation2 + $0x38] sm:$0xf] %v510_v57 }
0x1931   :  { %v1068_v42 = vld [vmem:[#allocation2 + $0x34] sm:$0xf] }
0x1967   :  { %v1122_v33 = vpop.permute.xlu2 %1121 }
0x1968   :  { %v1124_v21 = vmul.f32 %v2770_v51, %v1122_v33 }
0x1970   :  { %v1128_v61 = vpop.permute.xlu2 %1127 }
0x1971   :  { %v1130_v27 = vmul.f32 %v2776_v7, %v1128_v61 }
0x1973   :  { %v1131_v17 = vadd.f32 %v1130_v27, %v1124_v21 }
0x1975   :  { %v1132_v11 = vadd.f32 %v2783_v22, %v1131_v17  ;;  %v1069_v17 = vld [vmem:[#allocation2 + $0x38] sm:$0xf] }
0x1977   :  { %2212 = vtanh.f32 %v1132_v11 }
0x197d   :  { %v2213_v10 = vpop.eup %2212 }
0x197e   :  { %v1134_v34 = vmul.f32 %v2213_v10, %v1068_v42 }
0x1980   :  { %1135 = vrot.lane.b32.xlu1 %v1134_v34, %s2269_s20 }
0x19f2   :  { %v1136_v8 = vpop.permute.xlu1 %1135 }
0x19f3   :  { %v1137_v39 = vadd.f32 %v1136_v8, %v1134_v34 }
0x19f5   :  { %1138 = vrot.lane.b32.xlu2 %v1137_v39, %s2272_s21 }
0x1a4f   :  { %v1139_v12 = vpop.permute.xlu2 %1138 }
0x1a50   :  { %v3007_v14 = vadd.f32 %v1139_v12, %v1137_v39 }
0x1a52   :  { %v1141_v54 = vsub.f32 %v3007_v14, %v2977_v53  ;;  %v1177_v8 = vsub.f32 %v2974_v47, %v3007_v14 }
0x1a54   :  { %v1142_v30 = vadd.f32 %v1141_v54, %v2874_v25 }
0x1a56   :  { %v1149_v15 = vmul.f32 %v2739_v44, %v1142_v30  ;;  %v1143_v19 = vmul.f32 %v2746_v13, %v1142_v30 }
0x1a58   :  { %v1150_v40 = vsel %vm600_vm0, %v1149_v15, 0.0  ;;  %v1144_v18 = vsel %vm600_vm0, %v1143_v19, 0.0 }
0x1a59   :  { %1151 = vadd.xlane.f32.xlu2 %v1150_v40  ;;  %1145 = vadd.xlane.f32.xlu1 %v1144_v18 }
0x1acc   :  { %v1146_v45 = vpop.xlane.xlu1 %1145  ;;  %v1152_v50 = vpop.xlane.xlu2 %1151 }
0x1acd   :  { %v1147_v6 = vadd.f32 %v2757_v52, %v1146_v45  ;;  %v1153_v53 = vadd.f32 %v2757_v52, %v1152_v50 }
0x1acf   :  { %v1148_v24 = vmax.f32 %v1147_v6, 0.0  ;;  %v1154_v16 = vmax.f32 %v1153_v53, 0.0 }
0x1ad1   :  { %1157 = vperm.xlu0 %2108, %v1148_v24  }
0x1ad9   :  { %2109 = vset.pattern.permute.xlu0 %v2263_v3 }
0x1ada   :  { %1163 = vperm.xlu0 %2109, %v1154_v16  }
0x1ae2   :  { %2113 = vset.pattern.permute.xlu0 %v2261_v0 }
0x1b43   :  { %v1158_v55 = vpop.permute.xlu0 %1157 }
0x1b44   :  { %v1160_v57 = vmul.f32 %v2770_v51, %v1158_v55 }
0x1b4c   :  { %v1164_v60 = vpop.permute.xlu0 %1163 }
0x1b4d   :  { %v1166_v33 = vmul.f32 %v2776_v7, %v1164_v60 }
0x1b4f   :  { %v1167_v61 = vadd.f32 %v1166_v33, %v1160_v57 }
0x1b51   :  { %v1168_v21 = vadd.f32 %v2783_v22, %v1167_v61 }
0x1b53   :  { %2214 = vtanh.f32 %v1168_v21 }
0x1b59   :  { %v2215_v27 = vpop.eup %2214 }
0x1b5a   :  { %v1170_v11 = vmul.f32 %v2215_v27, %v1069_v17  ;;  %v1070_v27 = vld [vmem:[#allocation2 + $0x3c] sm:$0xf] }
0x1b5c   :  { %1171 = vrot.lane.b32.xlu1 %v1170_v11, %s2269_s20 }
0x1bce   :  { %v1172_v10 = vpop.permute.xlu1 %1171 }
0x1bcf   :  { %v1173_v42 = vadd.f32 %v1172_v10, %v1170_v11 }
0x1bd1   :  { %1174 = vrot.lane.b32.xlu0 %v1173_v42, %s2272_s21 }
0x1c43   :  { %v1175_v34 = vpop.permute.xlu0 %1174 }
0x1c44   :  { %v1176_v39 = vadd.f32 %v1175_v34, %v1173_v42 }
0x1c46   :  { %v1178_v12 = vadd.f32 %v1177_v8, %v1176_v39  ;;  %v1214_v42 = vadd.f32 %v1176_v39, %v3007_v14 }
0x1c48   :  { %v1179_v54 = vadd.f32 %v1178_v12, %v2874_v25  ;;  %v1215_v34 = vmul.f32 3.0, %v1214_v42 }
0x1c4a   :  { %v1186_v30 = vmul.f32 %v2739_v44, %v1179_v54  ;;  %v1180_v15 = vmul.f32 %v2746_v13, %v1179_v54  ;;  %v1216_v12 = vadd.f32 %v1215_v34, %v2974_v47  ;;  %v3055_v47 = vld [vmem:[%s3588_s0 + $0x10] sm:$0xf] }
0x1c4c   :  { %v1187_v19 = vsel %vm600_vm0, %v1186_v30, 0.0  ;;  %v1181_v40 = vsel %vm600_vm0, %v1180_v15, 0.0 }
0x1c4d   :  { %1188 = vadd.xlane.f32.xlu0 %v1187_v19  ;;  %1182 = vadd.xlane.f32.xlu2 %v1181_v40 }
0x1cc0   :  { %v1189_v18 = vpop.xlane.xlu0 %1188  ;;  %v1183_v45 = vpop.xlane.xlu2 %1182 }
0x1cc1   :  { %v1190_v6 = vadd.f32 %v2757_v52, %v1189_v18  ;;  %v1184_v24 = vadd.f32 %v2757_v52, %v1183_v45 }
0x1cc3   :  { %v1191_v50 = vmax.f32 %v1190_v6, 0.0  ;;  %v1185_v53 = vmax.f32 %v1184_v24, 0.0 }
0x1cc5   :  { %1200 = vperm.xlu1 %2111, %v1191_v50   ;;  %1194 = vperm.xlu2 %2110, %v1185_v53  }
0x1ccd   :  { %2112 = vset.pattern.permute.xlu2 %v2265_v28 }
0x1d1f   :  { %v1195_v16 = vpop.permute.xlu2 %1194 }
0x1d20   :  { %v1197_v60 = vmul.f32 %v2770_v51, %v1195_v16 }
0x1d37   :  { %v1201_v55 = vpop.permute.xlu1 %1200 }
0x1d38   :  { %v1203_v57 = vmul.f32 %v2776_v7, %v1201_v55 }
0x1d3a   :  { %v1204_v33 = vadd.f32 %v1203_v57, %v1197_v60 }
0x1d3c   :  { %v1205_v61 = vadd.f32 %v2783_v22, %v1204_v33 }
0x1d3e   :  { %2216 = vtanh.f32 %v1205_v61 }
0x1d44   :  { %v2217_v21 = vpop.eup %2216 }
0x1d45   :  { %v1207_v17 = vmul.f32 %v2217_v21, %v1070_v27 }
0x1d47   :  { %1208 = vrot.lane.b32.xlu1 %v1207_v17, %s2269_s20 }
0x1db9   :  { %v1209_v11 = vpop.permute.xlu1 %1208 }
0x1dba   :  { %v1210_v10 = vadd.f32 %v1209_v11, %v1207_v17 }
0x1dbc   :  { %1211 = vrot.lane.b32.xlu2 %v1210_v10, %s2272_s21 }
0x1e16   :  { %v1212_v8 = vpop.permute.xlu2 %1211 }
0x1e17   :  { %v1213_v54 = vadd.f32 %v1212_v8, %v1210_v10 }
0x1e19   :  { %v1217_v30 = vadd.f32 %v1216_v12, %v1213_v54 }
0x1e1b   :  { %v1218_v15 = vmul.f32 0.125, %v1217_v30 }
0x1e1d   :  { %v3043_v19 = vadd.f32 %v1218_v15, %v2874_v25 }
0x1e1f   :  { %1220 = vst [vmem:[#allocation3 + $0x10] sm:$0xf] %v3043_v19  ;;  %v1231_v40 = vmul.f32 %v2739_v44, %v3043_v19  ;;  %v1225_v18 = vmul.f32 %v2746_v13, %v3043_v19 }
0x1e21   :  { %v1232_v14 = vsel %vm600_vm0, %v1231_v40, 0.0  ;;  %v1226_v39 = vsel %vm600_vm0, %v1225_v18, 0.0 }
0x1e22   :  { %1233 = vadd.xlane.f32.xlu2 %v1232_v14  ;;  %1227 = vadd.xlane.f32.xlu1 %v1226_v39 }
0x1e3a   :  { %72 = vperm.xlu2 %2112, %v3055_v47  }
0x1e42   :  { %2116 = vset.pattern.permute.xlu2 %v2266_v29 }
0x1e43   :  { %158 = vperm.xlu2 %2116, %v3055_v47  }
0x1e4b   :  { %2122 = vset.pattern.permute.xlu2 %v2277_v5 }
0x1e95   :  { %v1234_v25 = vpop.xlane.xlu2 %1233  ;;  %v1228_v45 = vpop.xlane.xlu1 %1227 }
0x1e96   :  { %v1235_v6 = vadd.f32 %v2757_v52, %v1234_v25  ;;  %v1229_v24 = vadd.f32 %v2757_v52, %v1228_v45 }
0x1e98   :  { %v1236_v50 = vmax.f32 %v1235_v6, 0.0  ;;  %v1230_v53 = vmax.f32 %v1229_v24, 0.0 }
0x1e9a   :  { %1245 = vperm.xlu1 %2111, %v1236_v50   ;;  %1239 = vperm.xlu0 %2113, %v1230_v53  }
0x1e9d   :  { %v73_v16 = vpop.permute.xlu2 %72 }
0x1ea2   :  { %2114 = vset.pattern.permute.xlu0 %v2267_v37  ;;  %2115 = vset.pattern.permute.xlu1 %v2268_v38 }
0x1ea3   :  { %102 = vperm.xlu0 %2114, %v3055_v47   ;;  %130 = vperm.xlu1 %2115, %v3055_v47  }
0x1ea5   :  { %v159_v21 = vpop.permute.xlu2 %158 }
0x1eab   :  { %2117 = vset.pattern.permute.xlu1 %v2273_v62  ;;  %2123 = vset.pattern.permute.xlu0 %v2278_v9 }
0x1f0c   :  { %v1240_v55 = vpop.permute.xlu0 %1239  ;;  %v1246_v60 = vpop.permute.xlu1 %1245 }
0x1f0d   :  { %v1242_v57 = vmul.f32 %v2770_v51, %v1240_v55  ;;  %v1248_v33 = vmul.f32 %v2776_v7, %v1246_v60 }
0x1f0f   :  { %v1249_v61 = vadd.f32 %v1248_v33, %v1242_v57 }
0x1f11   :  { %v1250_v11 = vadd.f32 %v2783_v22, %v1249_v61 }
0x1f13   :  { %2218 = vtanh.f32 %v1250_v11 }
0x1f15   :  { %v103_v27 = vpop.permute.xlu0 %102  ;;  %v131_v17 = vpop.permute.xlu1 %130 }
0x1f16   :  { %v174_v10 = vsel %vm169_vm1, %v73_v16, %v103_v27 }
0x1f17   :  { %v182_v42 = vsel %vm177_vm2, %v174_v10, %v131_v17 }
0x1f18   :  { %v3075_v34 = vsel %vm185_vm3, %v182_v42, %v159_v21 }
0x1f19   :  { %515 = vst [vmem:[#allocation2 + $0x40] sm:$0xf] %v3075_v34  ;;  %v2219_v8 = vpop.eup %2218 }
0x1f20   :  { %v1221_v12 = vld [vmem:[#allocation2 + $0x40] sm:$0xf] }
0x1f21   :  { %v1252_v54 = vmul.f32 %v2219_v8, %v1221_v12 }
0x1f23   :  { %1253 = vrot.lane.b32.xlu0 %v1252_v54, %s2269_s20 }
0x1f95   :  { %v1254_v30 = vpop.permute.xlu0 %1253 }
0x1f96   :  { %v1255_v15 = vadd.f32 %v1254_v30, %v1252_v54 }
0x1f98   :  { %1256 = vrot.lane.b32.xlu1 %v1255_v15, %s2272_s21 }
0x1fa0   :  { %343 = vperm.xlu1 %2117, %v3055_v47  }
0x1fa8   :  { %2118 = vset.pattern.permute.xlu1 %v2275_v2 }
0x1fa9   :  { %371 = vperm.xlu1 %2118, %v3055_v47  }
0x1fb1   :  { %2119 = vset.pattern.permute.xlu1 %v2276_v4 }
0x1fb2   :  { %399 = vperm.xlu1 %2119, %v3055_v47  }
0x1fba   :  { %2120 = vset.pattern.permute.xlu1 %v2271_v59 }
0x1fbb   :  { %210 = vperm.xlu1 %2120, %v3055_v47  }
0x1fc3   :  { %2121 = vset.pattern.permute.xlu1 %v2270_v58 }
0x1fc4   :  { %238 = vperm.xlu1 %2121, %v3055_v47  }
0x1fcc   :  { %2124 = vset.pattern.permute.xlu1 %v2274_v63 }
0x1fcd   :  { %294 = vperm.xlu1 %2124, %v3055_v47  }
0x1fd5   :  { %2125 = vset.pattern.permute.xlu1 %v2261_v0 }
0x200a   :  { %v1257_v40 = vpop.permute.xlu1 %1256 }
0x200b   :  { %v3092_v18 = vadd.f32 %v1257_v40, %v1255_v15 }
0x200d   :  { %v3095_v14 = vmul.f32 0.33333334, %v3092_v18 }
0x200f   :  { %v1260_v39 = vadd.f32 %v3095_v14, %v3043_v19 }
0x2011   :  { %v1267_v25 = vmul.f32 %v2739_v44, %v1260_v39  ;;  %v1261_v45 = vmul.f32 %v2746_v13, %v1260_v39 }
0x2012   :  { %v344_v50 = vpop.permute.xlu1 %343 }
0x2013   :  { %v1268_v6 = vsel %vm600_vm0, %v1267_v25, 0.0  ;;  %v1262_v24 = vsel %vm600_vm0, %v1261_v45, 0.0 }
0x2014   :  { %1269 = vadd.xlane.f32.xlu0 %v1268_v6  ;;  %1263 = vadd.xlane.f32.xlu2 %v1262_v24 }
0x201b   :  { %v372_v53 = vpop.permute.xlu1 %371 }
0x201c   :  { %v442_v21 = vsel %vm169_vm1, %v344_v50, %v372_v53 }
0x2024   :  { %v400_v16 = vpop.permute.xlu1 %399 }
0x2028   :  { %266 = vperm.xlu0 %2123, %v3055_v47  }
0x202c   :  { %427 = vperm.xlu2 %2122, %v3055_v47   ;;  %v449_v47 = vsel %vm177_vm2, %v442_v21, %v400_v16 }
0x202d   :  { %v211_v44 = vpop.permute.xlu1 %210 }
0x2030   :  { %2127 = vset.pattern.permute.xlu0 %v2261_v0 }
0x2034   :  { %2130 = vset.pattern.permute.xlu2 %v2263_v3 }
0x2036   :  { %v239_v61 = vpop.permute.xlu1 %238 }
0x2037   :  { %v309_v10 = vsel %vm169_vm1, %v211_v44, %v239_v61 }
0x203f   :  { %v295_v12 = vpop.permute.xlu1 %294 }
0x2087   :  { %v1264_v55 = vpop.xlane.xlu2 %1263  ;;  %v1270_v57 = vpop.xlane.xlu0 %1269 }
0x2088   :  { %v1265_v13 = vadd.f32 %v2757_v52, %v1264_v55  ;;  %v1271_v33 = vadd.f32 %v2757_v52, %v1270_v57 }
0x208a   :  { %v1266_v60 = vmax.f32 %v1265_v13, 0.0  ;;  %v1272_v27 = vmax.f32 %v1271_v33, 0.0 }
0x208c   :  { %1275 = vperm.xlu1 %2125, %v1266_v60  }
0x208f   :  { %v428_v17 = vpop.permute.xlu2 %427 }
0x2090   :  { %v456_v11 = vsel %vm185_vm3, %v449_v47, %v428_v17 }
0x2091   :  { %v516_v42 = vmul.f32 0.33333334, %v456_v11  ;;  %v521_v8 = vmul.f32 0.6666667, %v456_v11 }
0x2094   :  { %2126 = vset.pattern.permute.xlu1 %v2263_v3 }
0x2095   :  { %1281 = vperm.xlu1 %2126, %v1272_v27  }
0x209a   :  { %v267_v54 = vpop.permute.xlu0 %266 }
0x209b   :  { %v316_v52 = vsel %vm177_vm2, %v309_v10, %v267_v54 }
0x209c   :  { %v323_v30 = vsel %vm185_vm3, %v316_v52, %v295_v12  ;;  %v3147_v12 = vld [vmem:[%s3592_s4] ss:$0 sm:$0xff] }
0x209d   :  { %v517_v15 = vadd.f32 %v516_v42, %v323_v30  ;;  %v522_v40 = vadd.f32 %v521_v8, %v323_v30  ;;  %v526_v39 = vadd.f32 %v456_v11, %v323_v30  ;;  %2129 = vset.pattern.permute.xlu1 %v2261_v0  ;;  %v3139_v11 = vld [vmem:[%s3591_s3] ss:$0 sm:$0xff] }
0x209f   :  { %v518_v25 = vmul.f32 0.33333334, %v517_v15  ;;  %v523_v45 = vmul.f32 0.6666667, %v522_v40  ;;  %v527_v6 = vadd.f32 %v526_v39, %v3075_v34 }
0x20a1   :  { %v519_v24 = vadd.f32 %v518_v25, %v3075_v34  ;;  %v524_v50 = vadd.f32 %v523_v45, %v3075_v34  ;;  %528 = vst [vmem:[#allocation2 + $0x4c] sm:$0xf] %v527_v6  ;;  %v3156_v45 = vld [vmem:[%s3593_s5] ss:$0 sm:$0xff] }
0x20a3   :  { %520 = vst [vmem:[#allocation2 + $0x44] sm:$0xf] %v519_v24  ;;  %v3162_v24 = vld [vmem:[%s3593_s5 + $0x1] ss:$0 sm:$0xff] }
0x20a4   :  { %525 = vst [vmem:[#allocation2 + $0x48] sm:$0xf] %v524_v50 }
0x20aa   :  { %v1222_v33 = vld [vmem:[#allocation2 + $0x44] sm:$0xf] }
0x20fe   :  { %v1276_v53 = vpop.permute.xlu1 %1275 }
0x20ff   :  { %v1278_v44 = vmul.f32 %v2770_v51, %v1276_v53 }
0x2107   :  { %v1282_v16 = vpop.permute.xlu1 %1281 }
0x2108   :  { %v1284_v55 = vmul.f32 %v2776_v7, %v1282_v16  ;;  %v3168_v16 = vld [vmem:[%s3594_s6] ss:$0 sm:$0xff] }
0x210a   :  { %v1285_v13 = vadd.f32 %v1284_v55, %v1278_v44 }
0x210c   :  { %v1286_v60 = vadd.f32 %v2783_v22, %v1285_v13  ;;  %v3133_v22 = vld [vmem:[%s3591_s3 + $0x1] ss:$0 sm:$0xff]  ;;  %v1223_v13 = vld [vmem:[#allocation2 + $0x48] sm:$0xf] }
0x210e   :  { %2220 = vtanh.f32 %v1286_v60 }
0x2114   :  { %v2221_v57 = vpop.eup %2220 }
0x2115   :  { %v1288_v61 = vmul.f32 %v2221_v57, %v1222_v33 }
0x2117   :  { %1289 = vrot.lane.b32.xlu2 %v1288_v61, %s2269_s20 }
0x2171   :  { %v1290_v21 = vpop.permute.xlu2 %1289 }
0x2172   :  { %v1291_v34 = vadd.f32 %v1290_v21, %v1288_v61 }
0x2174   :  { %1292 = vrot.lane.b32.xlu1 %v1291_v34, %s2272_s21 }
0x21e6   :  { %v1293_v47 = vpop.permute.xlu1 %1292 }
0x21e7   :  { %v3125_v27 = vadd.f32 %v1293_v47, %v1291_v34 }
0x21e9   :  { %v1295_v51 = vsub.f32 %v3125_v27, %v3095_v14  ;;  %v1331_v21 = vsub.f32 %v3092_v18, %v3125_v27 }
0x21eb   :  { %v1296_v7 = vadd.f32 %v1295_v51, %v3043_v19 }
0x21ed   :  { %v1303_v17 = vmul.f32 %v3133_v22, %v1296_v7  ;;  %v1297_v10 = vmul.f32 %v3139_v11, %v1296_v7 }
0x21ef   :  { %v1304_v42 = vsel %vm600_vm0, %v1303_v17, 0.0  ;;  %v1298_v14 = vsel %vm600_vm0, %v1297_v10, 0.0 }
0x21f0   :  { %1305 = vadd.xlane.f32.xlu1 %v1304_v42  ;;  %1299 = vadd.xlane.f32.xlu2 %v1298_v14 }
0x2263   :  { %v1300_v8 = vpop.xlane.xlu2 %1299  ;;  %v1306_v30 = vpop.xlane.xlu1 %1305 }
0x2264   :  { %v1301_v54 = vadd.f32 %v3147_v12, %v1300_v8  ;;  %v1307_v15 = vadd.f32 %v3147_v12, %v1306_v30 }
0x2266   :  { %v1302_v52 = vmax.f32 %v1301_v54, 0.0  ;;  %v1308_v40 = vmax.f32 %v1307_v15, 0.0 }
0x2268   :  { %1311 = vperm.xlu0 %2127, %v1302_v52  }
0x2270   :  { %2128 = vset.pattern.permute.xlu0 %v2263_v3 }
0x2271   :  { %1317 = vperm.xlu0 %2128, %v1308_v40  }
0x2279   :  { %2132 = vset.pattern.permute.xlu0 %v2267_v37 }
0x22da   :  { %v1312_v39 = vpop.permute.xlu0 %1311 }
0x22db   :  { %v1314_v6 = vmul.f32 %v3156_v45, %v1312_v39 }
0x22e3   :  { %v1318_v25 = vpop.permute.xlu0 %1317 }
0x22e4   :  { %v1320_v50 = vmul.f32 %v3162_v24, %v1318_v25 }
0x22e6   :  { %v1321_v53 = vadd.f32 %v1320_v50, %v1314_v6 }
0x22e8   :  { %v1322_v44 = vadd.f32 %v3168_v16, %v1321_v53 }
0x22ea   :  { %2222 = vtanh.f32 %v1322_v44 }
0x22f0   :  { %v2223_v55 = vpop.eup %2222 }
0x22f1   :  { %v1324_v60 = vmul.f32 %v2223_v55, %v1223_v13  ;;  %v1224_v55 = vld [vmem:[#allocation2 + $0x4c] sm:$0xf] }
0x22f3   :  { %1325 = vrot.lane.b32.xlu2 %v1324_v60, %s2269_s20 }
0x234d   :  { %v1326_v57 = vpop.permute.xlu2 %1325 }
0x234e   :  { %v1327_v33 = vadd.f32 %v1326_v57, %v1324_v60 }
0x2350   :  { %1328 = vrot.lane.b32.xlu0 %v1327_v33, %s2272_s21 }
0x23c2   :  { %v1329_v61 = vpop.permute.xlu0 %1328 }
0x23c3   :  { %v1330_v34 = vadd.f32 %v1329_v61, %v1327_v33  ;;  %v3192_v33 = vld [vmem:[%s3588_s0 + $0x14] sm:$0xf] }
0x23c5   :  { %v1332_v47 = vadd.f32 %v1331_v21, %v1330_v34  ;;  %v1368_v61 = vadd.f32 %v1330_v34, %v3125_v27 }
0x23c7   :  { %v1333_v51 = vadd.f32 %v1332_v47, %v3043_v19  ;;  %v1369_v21 = vmul.f32 3.0, %v1368_v61 }
0x23c9   :  { %v1340_v7 = vmul.f32 %v3133_v22, %v1333_v51  ;;  %v1334_v17 = vmul.f32 %v3139_v11, %v1333_v51  ;;  %v1370_v51 = vadd.f32 %v1369_v21, %v3092_v18 }
0x23cb   :  { %v1341_v10 = vsel %vm600_vm0, %v1340_v7, 0.0  ;;  %v1335_v42 = vsel %vm600_vm0, %v1334_v17, 0.0 }
0x23cc   :  { %1342 = vadd.xlane.f32.xlu0 %v1341_v10  ;;  %1336 = vadd.xlane.f32.xlu1 %v1335_v42 }
0x23e0   :  { %106 = vperm.xlu0 %2132, %v3192_v33  }
0x23e8   :  { %2133 = vset.pattern.permute.xlu0 %v2261_v0 }
0x243f   :  { %v1343_v14 = vpop.xlane.xlu0 %1342  ;;  %v1337_v8 = vpop.xlane.xlu1 %1336 }
0x2440   :  { %v1344_v54 = vadd.f32 %v3147_v12, %v1343_v14  ;;  %v1338_v52 = vadd.f32 %v3147_v12, %v1337_v8 }
0x2442   :  { %v1345_v30 = vmax.f32 %v1344_v54, 0.0  ;;  %v1339_v15 = vmax.f32 %v1338_v52, 0.0 }
0x2444   :  { %1354 = vperm.xlu2 %2130, %v1345_v30   ;;  %1348 = vperm.xlu1 %2129, %v1339_v15  }
0x244c   :  { %2135 = vset.pattern.permute.xlu1 %v2263_v3  ;;  %2131 = vset.pattern.permute.xlu2 %v2265_v28 }
0x249e   :  { %v1355_v40 = vpop.permute.xlu2 %1354 }
0x249f   :  { %v1357_v25 = vmul.f32 %v3162_v24, %v1355_v40 }
0x24b6   :  { %v1349_v39 = vpop.permute.xlu1 %1348 }
0x24b7   :  { %v1351_v6 = vmul.f32 %v3156_v45, %v1349_v39 }
0x24b9   :  { %v1358_v50 = vadd.f32 %v1357_v25, %v1351_v6  ;;  %v3221_v25 = vld [vmem:[%s3597_s9 + $0x10] sm:$0xff] }
0x24bb   :  { %v1359_v53 = vadd.f32 %v3168_v16, %v1358_v50  ;;  %v3226_v50 = vld [vmem:[%s3596_s8] ss:$0 sm:$0xff] }
0x24bd   :  { %2224 = vtanh.f32 %v1359_v53 }
0x24c3   :  { %v2225_v44 = vpop.eup %2224 }
0x24c4   :  { %v1361_v13 = vmul.f32 %v2225_v44, %v1224_v55  ;;  %v1775_v44 = vrot.slane %v3221_v25, 4 }
0x24c6   :  { %1362 = vrot.lane.b32.xlu2 %v1361_v13, %s2269_s20 }
0x2520   :  { %v1363_v60 = vpop.permute.xlu2 %1362 }
0x2521   :  { %v1364_v57 = vadd.f32 %v1363_v60, %v1361_v13  ;;  %v1851_v13 = vmul.f32 3.0, %v3221_v25 }
0x2523   :  { %1365 = vrot.lane.b32.xlu2 %v1364_v57, %s2272_s21 }
0x257d   :  { %v1366_v47 = vpop.permute.xlu2 %1365 }
0x257e   :  { %v1367_v7 = vadd.f32 %v1366_v47, %v1364_v57  ;;  %v1776_v57 = vsel %vm600_vm0, %v1773_v36, %v1775_v44  ;;  %v3253_v47 = vmul.f32 %v1851_v13, %v3221_v25 }
0x2580   :  { %v1371_v17 = vadd.f32 %v1370_v51, %v1367_v7  ;;  %v1864_v7 = vrot.slane %v3253_v47, 4 }
0x2582   :  { %v1372_v10 = vmul.f32 0.125, %v1371_v17  ;;  %v1865_v17 = vsel %vm600_vm0, %v1862_v20, %v1864_v7 }
0x2584   :  { %v3199_v42 = vadd.f32 %v1372_v10, %v3043_v19 }
0x2586   :  { %1374 = vst [vmem:[#allocation3 + $0x14] sm:$0xf] %v3199_v42  ;;  %v1385_v14 = vmul.f32 %v3133_v22, %v3199_v42  ;;  %v1379_v27 = vmul.f32 %v3139_v11, %v3199_v42 }
0x2588   :  { %v1386_v34 = vsel %vm600_vm0, %v1385_v14, 0.0  ;;  %v1380_v18 = vsel %vm600_vm0, %v1379_v27, 0.0  ;;  %v107_v27 = vpop.permute.xlu0 %106 }
0x2589   :  { %1387 = vadd.xlane.f32.xlu2 %v1386_v34  ;;  %1381 = vadd.xlane.f32.xlu1 %v1380_v18 }
0x258d   :  { %v1685_v8 = vld [vmem:[#allocation3 + $0x10] sm:$0xff] }
0x258e   :  { %2226 = vtanh.f32 %v1685_v8 }
0x2594   :  { %v2227_v54 = vpop.eup %2226 }
0x2595   :  { %1733 = vmatmul.f32.vlgmr.msra.gmra.mxu2 %v2227_v54 }
0x25a1   :  { %77 = vperm.xlu2 %2131, %v3192_v33  }
0x25a9   :  { %2142 = vset.pattern.permute.xlu2 %v2277_v5 }
0x25fc   :  { %v1388_v19 = vpop.xlane.xlu2 %1387  ;;  %v1382_v52 = vpop.xlane.xlu1 %1381 }
0x25fd   :  { %v1389_v30 = vadd.f32 %v3147_v12, %v1388_v19  ;;  %v1383_v15 = vadd.f32 %v3147_v12, %v1382_v52 }
0x25ff   :  { %v1390_v40 = vmax.f32 %v1389_v30, 0.0  ;;  %v1384_v39 = vmax.f32 %v1383_v15, 0.0 }
0x2601   :  { %1399 = vperm.xlu1 %2135, %v1390_v40   ;;  %1393 = vperm.xlu0 %2133, %v1384_v39  }
0x2604   :  { %v78_v19 = vpop.permute.xlu2 %77 }
0x2605   :  { %v175_v52 = vsel %vm169_vm1, %v78_v19, %v107_v27 }
0x2609   :  { %2134 = vset.pattern.permute.xlu0 %v2268_v38  ;;  %2136 = vset.pattern.permute.xlu1 %v2266_v29 }
0x260a   :  { %134 = vperm.xlu0 %2134, %v3192_v33   ;;  %162 = vperm.xlu1 %2136, %v3192_v33  }
0x2612   :  { %2137 = vset.pattern.permute.xlu1 %v2273_v62  ;;  %2144 = vset.pattern.permute.xlu0 %v2274_v63 }
0x2618   :  { %v1734_v6 = vpop.f32.mrf.mxu2 }
0x2619   :  { %v3229_v53 = vadd.f32 %v3226_v50, %v1734_v6 }
0x261b   :  { %1743 = vst.msk [vmem:[%s3598_s10 + $0x10] sm:$0xff] %vm1740_vm4, %v3229_v53  ;;  %v1756_v55 = vrot.slane %v3229_v53, 4 }
0x261d   :  { %v1757_v60 = vsel %vm600_vm0, %v1754_v1, %v1756_v55 }
0x261e   :  { %v1766_v61 = vsub.f32 %v3229_v53, %v1757_v60 }
0x2620   :  { %v3250_v21 = vmul.f32 %v1776_v57, %v1766_v61 }
0x2622   :  { %v1798_v51 = vrot.slane %v3250_v21, 4 }
0x2624   :  { %v1799_v1 = vsel %vm600_vm0, %v1796_v49, %v1798_v51 }
0x2625   :  { %v3263_v41 = vsub.f32 %v3250_v21, %v1799_v1 }
0x2627   :  { %v1843_v36 = vmul.f32 2.0, %v3263_v41 }
0x2629   :  { %v1847_v10 = vsub.f32 %v3263_v41, %v1843_v36 }
0x262b   :  { %v3272_v14 = vmul.f32 %v1865_v17, %v1847_v10 }
0x2673   :  { %v1394_v34 = vpop.permute.xlu0 %1393  ;;  %v1400_v49 = vpop.permute.xlu1 %1399 }
0x2674   :  { %v1396_v18 = vmul.f32 %v3156_v45, %v1394_v34  ;;  %v1402_v8 = vmul.f32 %v3162_v24, %v1400_v49 }
0x2676   :  { %v1403_v54 = vadd.f32 %v1402_v8, %v1396_v18 }
0x2678   :  { %v1404_v30 = vadd.f32 %v3168_v16, %v1403_v54 }
0x267a   :  { %2228 = vtanh.f32 %v1404_v30 }
0x267c   :  { %v135_v48 = vpop.permute.xlu0 %134  ;;  %v163_v15 = vpop.permute.xlu1 %162 }
0x267d   :  { %v183_v20 = vsel %vm177_vm2, %v175_v52, %v135_v48 }
0x267e   :  { %v3280_v40 = vsel %vm185_vm3, %v183_v20, %v163_v15 }
0x267f   :  { %529 = vst [vmem:[#allocation2 + $0x50] sm:$0xf] %v3280_v40 }
0x2680   :  { %v2229_v39 = vpop.eup %2228 }
0x2686   :  { %v1375_v6 = vld [vmem:[#allocation2 + $0x50] sm:$0xf] }
0x2687   :  { %v1406_v13 = vmul.f32 %v2229_v39, %v1375_v6 }
0x2689   :  { %1407 = vrot.lane.b32.xlu2 %v1406_v13, %s2269_s20 }
0x26e3   :  { %v1408_v60 = vpop.permute.xlu2 %1407 }
0x26e4   :  { %v1409_v57 = vadd.f32 %v1408_v60, %v1406_v13 }
0x26e6   :  { %1410 = vrot.lane.b32.xlu1 %v1409_v57, %s2272_s21 }
0x26ee   :  { %347 = vperm.xlu1 %2137, %v3192_v33  }
0x26f6   :  { %2138 = vset.pattern.permute.xlu1 %v2275_v2 }
0x26f7   :  { %375 = vperm.xlu1 %2138, %v3192_v33  }
0x26ff   :  { %2139 = vset.pattern.permute.xlu1 %v2276_v4 }
0x2700   :  { %403 = vperm.xlu1 %2139, %v3192_v33  }
0x2708   :  { %2140 = vset.pattern.permute.xlu1 %v2271_v59 }
0x2709   :  { %214 = vperm.xlu1 %2140, %v3192_v33  }
0x2711   :  { %2141 = vset.pattern.permute.xlu1 %v2270_v58 }
0x2712   :  { %242 = vperm.xlu1 %2141, %v3192_v33  }
0x271a   :  { %2143 = vset.pattern.permute.xlu1 %v2278_v9 }
0x271b   :  { %270 = vperm.xlu1 %2143, %v3192_v33  }
0x2723   :  { %2145 = vset.pattern.permute.xlu1 %v2261_v0 }
0x2758   :  { %v1411_v61 = vpop.permute.xlu1 %1410 }
0x2759   :  { %v3297_v1 = vadd.f32 %v1411_v61, %v1409_v57 }
0x275b   :  { %v3300_v36 = vmul.f32 0.33333334, %v3297_v1 }
0x275d   :  { %v1414_v17 = vadd.f32 %v3300_v36, %v3199_v42 }
0x275f   :  { %v1421_v10 = vmul.f32 %v3133_v22, %v1414_v17  ;;  %v1415_v27 = vmul.f32 %v3139_v11, %v1414_v17 }
0x2760   :  { %v348_v18 = vpop.permute.xlu1 %347 }
0x2761   :  { %v1422_v34 = vsel %vm600_vm0, %v1421_v10, 0.0  ;;  %v1416_v49 = vsel %vm600_vm0, %v1415_v27, 0.0 }
0x2762   :  { %1423 = vadd.xlane.f32.xlu0 %v1422_v34  ;;  %1417 = vadd.xlane.f32.xlu2 %v1416_v49 }
0x2769   :  { %v376_v8 = vpop.permute.xlu1 %375 }
0x276a   :  { %v443_v39 = vsel %vm169_vm1, %v348_v18, %v376_v8 }
0x2772   :  { %v404_v54 = vpop.permute.xlu1 %403 }
0x2776   :  { %298 = vperm.xlu0 %2144, %v3192_v33  }
0x277a   :  { %431 = vperm.xlu2 %2142, %v3192_v33   ;;  %v450_v33 = vsel %vm177_vm2, %v443_v39, %v404_v54 }
0x277b   :  { %v215_v19 = vpop.permute.xlu1 %214 }
0x277e   :  { %2147 = vset.pattern.permute.xlu0 %v2261_v0 }
0x2782   :  { %2150 = vset.pattern.permute.xlu2 %v2263_v3 }
0x2784   :  { %v243_v15 = vpop.permute.xlu1 %242 }
0x2785   :  { %v310_v57 = vsel %vm169_vm1, %v215_v19, %v243_v15 }
0x278d   :  { %v271_v17 = vpop.permute.xlu1 %270 }
0x278e   :  { %v317_v34 = vsel %vm177_vm2, %v310_v57, %v271_v17 }
0x27d5   :  { %v1418_v52 = vpop.xlane.xlu2 %1417  ;;  %v1424_v20 = vpop.xlane.xlu0 %1423 }
0x27d6   :  { %v1419_v30 = vadd.f32 %v3147_v12, %v1418_v52  ;;  %v1425_v6 = vadd.f32 %v3147_v12, %v1424_v20 }
0x27d8   :  { %v1420_v48 = vmax.f32 %v1419_v30, 0.0  ;;  %v1426_v60 = vmax.f32 %v1425_v6, 0.0 }
0x27da   :  { %1429 = vperm.xlu1 %2145, %v1420_v48  }
0x27dd   :  { %v432_v13 = vpop.permute.xlu2 %431 }
0x27de   :  { %v457_v61 = vsel %vm185_vm3, %v450_v33, %v432_v13 }
0x27df   :  { %v530_v10 = vmul.f32 0.33333334, %v457_v61  ;;  %v535_v27 = vmul.f32 0.6666667, %v457_v61 }
0x27e2   :  { %2146 = vset.pattern.permute.xlu1 %v2263_v3 }
0x27e3   :  { %1435 = vperm.xlu1 %2146, %v1426_v60  }
0x27e8   :  { %v299_v49 = vpop.permute.xlu0 %298 }
0x27e9   :  { %v324_v18 = vsel %vm185_vm3, %v317_v34, %v299_v49 }
0x27ea   :  { %v531_v8 = vadd.f32 %v530_v10, %v324_v18  ;;  %v536_v52 = vadd.f32 %v535_v27, %v324_v18  ;;  %v540_v54 = vadd.f32 %v457_v61, %v324_v18 }
0x27eb   :  { %2149 = vset.pattern.permute.xlu1 %v2261_v0 }
0x27ec   :  { %v532_v30 = vmul.f32 0.33333334, %v531_v8  ;;  %v537_v48 = vmul.f32 0.6666667, %v536_v52  ;;  %v541_v19 = vadd.f32 %v540_v54, %v3280_v40 }
0x27ee   :  { %v533_v15 = vadd.f32 %v532_v30, %v3280_v40  ;;  %v538_v20 = vadd.f32 %v537_v48, %v3280_v40  ;;  %542 = vst [vmem:[#allocation2 + $0x5c] sm:$0xf] %v541_v19 }
0x27f0   :  { %534 = vst [vmem:[#allocation2 + $0x54] sm:$0xf] %v533_v15 }
0x27f1   :  { %539 = vst [vmem:[#allocation2 + $0x58] sm:$0xf] %v538_v20 }
0x27f7   :  { %v1376_v17 = vld [vmem:[#allocation2 + $0x54] sm:$0xf] }
0x284c   :  { %v1430_v39 = vpop.permute.xlu1 %1429 }
0x284d   :  { %v1432_v33 = vmul.f32 %v3156_v45, %v1430_v39 }
0x2855   :  { %v1436_v6 = vpop.permute.xlu1 %1435 }
0x2856   :  { %v1438_v13 = vmul.f32 %v3162_v24, %v1436_v6 }
0x2858   :  { %v1439_v60 = vadd.f32 %v1438_v13, %v1432_v33 }
0x285a   :  { %v1440_v57 = vadd.f32 %v3168_v16, %v1439_v60 }
0x285c   :  { %2230 = vtanh.f32 %v1440_v57 }
0x2862   :  { %v2231_v61 = vpop.eup %2230 }
0x2863   :  { %v1442_v10 = vmul.f32 %v2231_v61, %v1376_v17 }
0x2865   :  { %1443 = vrot.lane.b32.xlu2 %v1442_v10, %s2269_s20 }
0x28bf   :  { %v1444_v27 = vpop.permute.xlu2 %1443 }
0x28c0   :  { %v1445_v40 = vadd.f32 %v1444_v27, %v1442_v10  ;;  %v1377_v27 = vld [vmem:[#allocation2 + $0x58] sm:$0xf] }
0x28c2   :  { %1446 = vrot.lane.b32.xlu1 %v1445_v40, %s2272_s21 }
0x2934   :  { %v1447_v34 = vpop.permute.xlu1 %1446 }
0x2935   :  { %v3330_v49 = vadd.f32 %v1447_v34, %v1445_v40 }
0x2937   :  { %v1449_v18 = vsub.f32 %v3330_v49, %v3300_v36 }
0x2939   :  { %v1450_v8 = vadd.f32 %v1449_v18, %v3199_v42 }
0x293b   :  { %v1457_v52 = vmul.f32 %v3133_v22, %v1450_v8  ;;  %v1451_v54 = vmul.f32 %v3139_v11, %v1450_v8  ;;  %v1485_v8 = vsub.f32 %v3297_v1, %v3330_v49 }
0x293d   :  { %v1458_v30 = vsel %vm600_vm0, %v1457_v52, 0.0  ;;  %v1452_v48 = vsel %vm600_vm0, %v1451_v54, 0.0 }
0x293e   :  { %1459 = vadd.xlane.f32.xlu1 %v1458_v30  ;;  %1453 = vadd.xlane.f32.xlu2 %v1452_v48 }
0x29b1   :  { %v1454_v19 = vpop.xlane.xlu2 %1453  ;;  %v1460_v39 = vpop.xlane.xlu1 %1459 }
0x29b2   :  { %v1455_v15 = vadd.f32 %v3147_v12, %v1454_v19  ;;  %v1461_v36 = vadd.f32 %v3147_v12, %v1460_v39 }
0x29b4   :  { %v1456_v20 = vmax.f32 %v1455_v15, 0.0  ;;  %v1462_v6 = vmax.f32 %v1461_v36, 0.0 }
0x29b6   :  { %1465 = vperm.xlu0 %2147, %v1456_v20  }
0x29be   :  { %2148 = vset.pattern.permute.xlu0 %v2263_v3 }
0x29bf   :  { %1471 = vperm.xlu0 %2148, %v1462_v6  }
0x29c7   :  { %2152 = vset.pattern.permute.xlu0 %v2267_v37 }
0x2a28   :  { %v1466_v33 = vpop.permute.xlu0 %1465 }
0x2a29   :  { %v1468_v60 = vmul.f32 %v3156_v45, %v1466_v33 }
0x2a31   :  { %v1472_v13 = vpop.permute.xlu0 %1471 }
0x2a32   :  { %v1474_v57 = vmul.f32 %v3162_v24, %v1472_v13 }
0x2a34   :  { %v1475_v61 = vadd.f32 %v1474_v57, %v1468_v60 }
0x2a36   :  { %v1476_v17 = vadd.f32 %v3168_v16, %v1475_v61 }
0x2a38   :  { %2232 = vtanh.f32 %v1476_v17 }
0x2a3e   :  { %v2233_v10 = vpop.eup %2232 }
0x2a3f   :  { %v1478_v40 = vmul.f32 %v2233_v10, %v1377_v27 }
0x2a41   :  { %1479 = vrot.lane.b32.xlu2 %v1478_v40, %s2269_s20 }
0x2a9b   :  { %v1480_v34 = vpop.permute.xlu2 %1479 }
0x2a9c   :  { %v1481_v18 = vadd.f32 %v1480_v34, %v1478_v40 }
0x2a9e   :  { %1482 = vrot.lane.b32.xlu0 %v1481_v18, %s2272_s21 }
0x2b10   :  { %v1483_v37 = vpop.permute.xlu0 %1482 }
0x2b11   :  { %v1484_v52 = vadd.f32 %v1483_v37, %v1481_v18  ;;  %v1378_v18 = vld [vmem:[#allocation2 + $0x5c] sm:$0xf] }
0x2b13   :  { %v1486_v54 = vadd.f32 %v1485_v8, %v1484_v52 }
0x2b15   :  { %v1487_v30 = vadd.f32 %v1486_v54, %v3199_v42 }
0x2b17   :  { %v1494_v48 = vmul.f32 %v3133_v22, %v1487_v30  ;;  %v1488_v19 = vmul.f32 %v3139_v11, %v1487_v30  ;;  %v1522_v30 = vadd.f32 %v1484_v52, %v3330_v49 }
0x2b19   :  { %v1495_v15 = vsel %vm600_vm0, %v1494_v48, 0.0  ;;  %v1489_v20 = vsel %vm600_vm0, %v1488_v19, 0.0  ;;  %v1523_v48 = vmul.f32 3.0, %v1522_v30 }
0x2b1a   :  { %1496 = vadd.xlane.f32.xlu0 %v1495_v15  ;;  %1490 = vadd.xlane.f32.xlu1 %v1489_v20 }
0x2b1b   :  { %v1524_v15 = vadd.f32 %v1523_v48, %v3297_v1 }
0x2b8d   :  { %v1497_v39 = vpop.xlane.xlu0 %1496  ;;  %v1491_v36 = vpop.xlane.xlu1 %1490 }
0x2b8e   :  { %v1498_v6 = vadd.f32 %v3147_v12, %v1497_v39  ;;  %v1492_v33 = vadd.f32 %v3147_v12, %v1491_v36 }
0x2b90   :  { %v1499_v13 = vmax.f32 %v1498_v6, 0.0  ;;  %v1493_v60 = vmax.f32 %v1492_v33, 0.0 }
0x2b92   :  { %1508 = vperm.xlu2 %2150, %v1499_v13   ;;  %1502 = vperm.xlu1 %2149, %v1493_v60  }
0x2b9a   :  { %2151 = vset.pattern.permute.xlu1 %v2265_v28  ;;  %v3366_v28 = vld [vmem:[%s3588_s0 + $0x18] sm:$0xf] }
0x2b9b   :  { %110 = vperm.xlu0 %2152, %v3366_v28  }
0x2ba3   :  { %2153 = vset.pattern.permute.xlu0 %v2261_v0 }
0x2bec   :  { %v1509_v57 = vpop.permute.xlu2 %1508 }
0x2bed   :  { %v1511_v17 = vmul.f32 %v3162_v24, %v1509_v57 }
0x2c04   :  { %v1503_v61 = vpop.permute.xlu1 %1502 }
0x2c05   :  { %v1505_v10 = vmul.f32 %v3156_v45, %v1503_v61 }
0x2c07   :  { %v1512_v27 = vadd.f32 %v1511_v17, %v1505_v10 }
0x2c09   :  { %v1513_v40 = vadd.f32 %v3168_v16, %v1512_v27 }
0x2c0b   :  { %2234 = vtanh.f32 %v1513_v40 }
0x2c11   :  { %v2235_v34 = vpop.eup %2234 }
0x2c12   :  { %v1515_v37 = vmul.f32 %v2235_v34, %v1378_v18 }
0x2c14   :  { %1516 = vrot.lane.b32.xlu2 %v1515_v37, %s2269_s20 }
0x2c6e   :  { %v1517_v8 = vpop.permute.xlu2 %1516 }
0x2c6f   :  { %v1518_v54 = vadd.f32 %v1517_v8, %v1515_v37 }
0x2c71   :  { %1519 = vrot.lane.b32.xlu1 %v1518_v54, %s2272_s21 }
0x2ce3   :  { %v1520_v19 = vpop.permute.xlu1 %1519 }
0x2ce4   :  { %v1521_v20 = vadd.f32 %v1520_v19, %v1518_v54 }
0x2ce6   :  { %v1525_v39 = vadd.f32 %v1524_v15, %v1521_v20 }
0x2ce8   :  { %v1526_v36 = vmul.f32 0.125, %v1525_v39 }
0x2cea   :  { %v3373_v6 = vadd.f32 %v1526_v36, %v3199_v42 }
0x2cec   :  { %1528 = vst [vmem:[#allocation3 + $0x18] sm:$0xf] %v3373_v6  ;;  %v1539_v33 = vmul.f32 %v3133_v22, %v3373_v6  ;;  %v1533_v13 = vmul.f32 %v3139_v11, %v3373_v6 }
0x2cee   :  { %v1540_v49 = vsel %vm600_vm0, %v1539_v33, 0.0  ;;  %v1534_v52 = vsel %vm600_vm0, %v1533_v13, 0.0 }
0x2cef   :  { %1541 = vadd.xlane.f32.xlu1 %v1540_v49  ;;  %1535 = vadd.xlane.f32.xlu2 %v1534_v52 }
0x2d08   :  { %82 = vperm.xlu1 %2151, %v3366_v28  }
0x2d10   :  { %2159 = vset.pattern.permute.xlu1 %v2271_v59 }
0x2d62   :  { %v1542_v42 = vpop.xlane.xlu1 %1541  ;;  %v1536_v1 = vpop.xlane.xlu2 %1535 }
0x2d63   :  { %v1543_v60 = vadd.f32 %v3147_v12, %v1542_v42  ;;  %v1537_v57 = vadd.f32 %v3147_v12, %v1536_v1 }
0x2d65   :  { %v1544_v61 = vmax.f32 %v1543_v60, 0.0  ;;  %v1538_v17 = vmax.f32 %v1537_v57, 0.0 }
0x2d67   :  { %1553 = vperm.xlu2 %2150, %v1544_v61   ;;  %1547 = vperm.xlu0 %2153, %v1538_v17  }
0x2d6f   :  { %2155 = vset.pattern.permute.xlu0 %v2266_v29  ;;  %2154 = vset.pattern.permute.xlu2 %v2268_v38  ;;  %v111_v29 = vpop.permute.xlu0 %110 }
0x2d70   :  { %166 = vperm.xlu0 %2155, %v3366_v28   ;;  %138 = vperm.xlu2 %2154, %v3366_v28  }
0x2d78   :  { %2156 = vset.pattern.permute.xlu0 %v2273_v62  ;;  %2160 = vset.pattern.permute.xlu2 %v2270_v58 }
0x2d79   :  { %351 = vperm.xlu0 %2156, %v3366_v28  }
0x2d81   :  { %2157 = vset.pattern.permute.xlu0 %v2275_v2  ;;  %v83_v2 = vpop.permute.xlu1 %82 }
0x2d82   :  { %379 = vperm.xlu0 %2157, %v3366_v28   ;;  %v176_v27 = vsel %vm169_vm1, %v83_v2, %v111_v29 }
0x2d8a   :  { %2158 = vset.pattern.permute.xlu0 %v2276_v4 }
0x2d8b   :  { %407 = vperm.xlu0 %2158, %v3366_v28  }
0x2d93   :  { %2161 = vset.pattern.permute.xlu0 %v2277_v5 }
0x2d94   :  { %435 = vperm.xlu0 %2161, %v3366_v28  }
0x2d9c   :  { %2164 = vset.pattern.permute.xlu0 %v2261_v0 }
0x2dc1   :  { %v1554_v38 = vpop.permute.xlu2 %1553 }
0x2dc2   :  { %v1556_v62 = vmul.f32 %v3162_v24, %v1554_v38 }
0x2dca   :  { %v139_v4 = vpop.permute.xlu2 %138 }
0x2dcb   :  { %v184_v5 = vsel %vm177_vm2, %v176_v27, %v139_v4 }
0x2dd9   :  { %v1548_v59 = vpop.permute.xlu0 %1547 }
0x2dda   :  { %v1550_v58 = vmul.f32 %v3156_v45, %v1548_v59 }
0x2ddc   :  { %v1557_v10 = vadd.f32 %v1556_v62, %v1550_v58 }
0x2dde   :  { %v1558_v40 = vadd.f32 %v3168_v16, %v1557_v10 }
0x2de0   :  { %2236 = vtanh.f32 %v1558_v40 }
0x2de2   :  { %v167_v34 = vpop.permute.xlu0 %166 }
0x2de3   :  { %v192_v18 = vsel %vm185_vm3, %v184_v5, %v167_v34 }
0x2de4   :  { %543 = vst [vmem:[#allocation2 + $0x60] sm:$0xf] %v192_v18 }
0x2de6   :  { %v2237_v37 = vpop.eup %2236 }
0x2deb   :  { %v1529_v8 = vld [vmem:[#allocation2 + $0x60] sm:$0xf]  ;;  %v352_v49 = vpop.permute.xlu0 %351 }
0x2dec   :  { %v1560_v54 = vmul.f32 %v2237_v37, %v1529_v8 }
0x2dee   :  { %1561 = vrot.lane.b32.xlu1 %v1560_v54, %s2269_s20 }
0x2df4   :  { %v380_v42 = vpop.permute.xlu0 %379 }
0x2df6   :  { %218 = vperm.xlu1 %2159, %v3366_v28  }
0x2dfe   :  { %2162 = vset.pattern.permute.xlu1 %v2278_v9 }
0x2e60   :  { %v1562_v30 = vpop.permute.xlu1 %1561 }
0x2e61   :  { %v1563_v48 = vadd.f32 %v1562_v30, %v1560_v54 }
0x2e63   :  { %1564 = vrot.lane.b32.xlu2 %v1563_v48, %s2272_s21 }
0x2e68   :  { %v219_v52 = vpop.permute.xlu1 %218 }
0x2ebd   :  { %v1565_v19 = vpop.permute.xlu2 %1564 }
0x2ebe   :  { %v3410_v15 = vadd.f32 %v1565_v19, %v1563_v48 }
0x2ec0   :  { %v3413_v20 = vmul.f32 0.33333334, %v3410_v15 }
0x2ec2   :  { %v1568_v39 = vadd.f32 %v3413_v20, %v3373_v6 }
0x2ec4   :  { %v1575_v36 = vmul.f32 %v3133_v22, %v1568_v39  ;;  %v1569_v33 = vmul.f32 %v3139_v11, %v1568_v39 }
0x2ec6   :  { %v1576_v13 = vsel %vm600_vm0, %v1575_v36, 0.0  ;;  %v1570_v9 = vsel %vm600_vm0, %v1569_v33, 0.0 }
0x2ec7   :  { %1577 = vadd.xlane.f32.xlu2 %v1576_v13  ;;  %1571 = vadd.xlane.f32.xlu1 %v1570_v9 }
0x2edf   :  { %246 = vperm.xlu2 %2160, %v3366_v28  }
0x2ee0   :  { %274 = vperm.xlu1 %2162, %v3366_v28  }
0x2ee7   :  { %2163 = vset.pattern.permute.xlu2 %v2274_v63  ;;  %v408_v63 = vpop.permute.xlu0 %407 }
0x2ee8   :  { %302 = vperm.xlu2 %2163, %v3366_v28   ;;  %2165 = vset.pattern.permute.xlu1 %v2263_v3  ;;  %v444_v28 = vsel %vm169_vm1, %v352_v49, %v380_v42 }
0x2ee9   :  { %v451_v59 = vsel %vm177_vm2, %v444_v28, %v408_v63 }
0x2eef   :  { %v436_v58 = vpop.permute.xlu0 %435 }
0x2ef0   :  { %2168 = vset.pattern.permute.xlu2 %v2263_v3  ;;  %v458_v62 = vsel %vm185_vm3, %v451_v59, %v436_v58 }
0x2ef1   :  { %v544_v2 = vmul.f32 0.33333334, %v458_v62  ;;  %v549_v10 = vmul.f32 0.6666667, %v458_v62 }
0x2f3a   :  { %v1578_v1 = vpop.xlane.xlu2 %1577  ;;  %v1572_v60 = vpop.xlane.xlu1 %1571 }
0x2f3b   :  { %v1579_v57 = vadd.f32 %v3147_v12, %v1578_v1  ;;  %v1573_v61 = vadd.f32 %v3147_v12, %v1572_v60 }
0x2f3d   :  { %v1580_v17 = vmax.f32 %v1579_v57, 0.0  ;;  %v1574_v29 = vmax.f32 %v1573_v61, 0.0 }
0x2f3f   :  { %1589 = vperm.xlu1 %2165, %v1580_v17   ;;  %1583 = vperm.xlu0 %2164, %v1574_v29  }
0x2f42   :  { %v247_v38 = vpop.permute.xlu2 %246 }
0x2f43   :  { %v311_v4 = vsel %vm169_vm1, %v219_v52, %v247_v38 }
0x2f47   :  { %2166 = vset.pattern.permute.xlu1 %v2261_v0 }
0x2f4a   :  { %v303_v27 = vpop.permute.xlu2 %302 }
0x2f52   :  { %v275_v40 = vpop.permute.xlu1 %274 }
0x2f53   :  { %v318_v5 = vsel %vm177_vm2, %v311_v4, %v275_v40 }
0x2f54   :  { %v325_v34 = vsel %vm185_vm3, %v318_v5, %v303_v27 }
0x2f55   :  { %v545_v37 = vadd.f32 %v544_v2, %v325_v34  ;;  %v550_v0 = vadd.f32 %v549_v10, %v325_v34  ;;  %v554_v8 = vadd.f32 %v458_v62, %v325_v34 }
0x2f57   :  { %v546_v54 = vmul.f32 0.33333334, %v545_v37  ;;  %v551_v30 = vmul.f32 0.6666667, %v550_v0  ;;  %v555_v48 = vadd.f32 %v554_v8, %v192_v18 }
0x2f59   :  { %v547_v19 = vadd.f32 %v546_v54, %v192_v18  ;;  %v552_v39 = vadd.f32 %v551_v30, %v192_v18  ;;  %556 = vst [vmem:[#allocation2 + $0x6c] sm:$0xf] %v555_v48 }
0x2f5b   :  { %548 = vst [vmem:[#allocation2 + $0x64] sm:$0xf] %v547_v19 }
0x2f5c   :  { %553 = vst [vmem:[#allocation2 + $0x68] sm:$0xf] %v552_v39 }
0x2f62   :  { %v1530_v1 = vld [vmem:[#allocation2 + $0x64] sm:$0xf] }
0x2f63   :  { %v1531_v30 = vld [vmem:[#allocation2 + $0x68] sm:$0xf] }
0x2fb1   :  { %v1584_v36 = vpop.permute.xlu0 %1583  ;;  %v1590_v33 = vpop.permute.xlu1 %1589 }
0x2fb2   :  { %v1586_v13 = vmul.f32 %v3156_v45, %v1584_v36  ;;  %v1592_v9 = vmul.f32 %v3162_v24, %v1590_v33 }
0x2fb4   :  { %v1593_v49 = vadd.f32 %v1592_v9, %v1586_v13 }
0x2fb6   :  { %v1594_v52 = vadd.f32 %v3168_v16, %v1593_v49 }
0x2fb8   :  { %2238 = vtanh.f32 %v1594_v52 }
0x2fbe   :  { %v2239_v42 = vpop.eup %2238 }
0x2fbf   :  { %v1596_v60 = vmul.f32 %v2239_v42, %v1530_v1 }
0x2fc1   :  { %1597 = vrot.lane.b32.xlu2 %v1596_v60, %s2269_s20 }
0x301b   :  { %v1598_v57 = vpop.permute.xlu2 %1597 }
0x301c   :  { %v1599_v18 = vadd.f32 %v1598_v57, %v1596_v60 }
0x301e   :  { %1600 = vrot.lane.b32.xlu1 %v1599_v18, %s2272_s21 }
0x3090   :  { %v1601_v61 = vpop.permute.xlu1 %1600 }
0x3091   :  { %v3441_v17 = vadd.f32 %v1601_v61, %v1599_v18 }
0x3093   :  { %v1603_v29 = vsub.f32 %v3441_v17, %v3413_v20  ;;  %v1639_v33 = vsub.f32 %v3410_v15, %v3441_v17 }
0x3095   :  { %v1604_v63 = vadd.f32 %v1603_v29, %v3373_v6 }
0x3097   :  { %v1611_v28 = vmul.f32 %v3133_v22, %v1604_v63  ;;  %v1605_v38 = vmul.f32 %v3139_v11, %v1604_v63 }
0x3099   :  { %v1612_v59 = vsel %vm600_vm0, %v1611_v28, 0.0  ;;  %v1606_v58 = vsel %vm600_vm0, %v1605_v38, 0.0 }
0x309a   :  { %1613 = vadd.xlane.f32.xlu0 %v1612_v59  ;;  %1607 = vadd.xlane.f32.xlu2 %v1606_v58  ;;  %v1812_v59 = vmul.f32 3.0, %v3263_v41 }
0x310d   :  { %v1608_v62 = vpop.xlane.xlu2 %1607  ;;  %v1614_v27 = vpop.xlane.xlu0 %1613 }
0x310e   :  { %v1609_v2 = vadd.f32 %v3147_v12, %v1608_v62  ;;  %v1615_v20 = vadd.f32 %v3147_v12, %v1614_v27  ;;  %v1816_v27 = vsub.f32 %v1812_v59, %v3263_v41 }
0x3110   :  { %v1610_v10 = vmax.f32 %v1609_v2, 0.0  ;;  %v1616_v4 = vmax.f32 %v1615_v20, 0.0  ;;  %v1811_v2 = vmul.f32 3.0, %v2940_v26 }
0x3112   :  { %1619 = vperm.xlu1 %2166, %v1610_v10  }
0x311a   :  { %2167 = vset.pattern.permute.xlu1 %v2263_v3 }
0x311b   :  { %1625 = vperm.xlu1 %2167, %v1616_v4  }
0x3184   :  { %v1620_v40 = vpop.permute.xlu1 %1619 }
0x3185   :  { %v1622_v34 = vmul.f32 %v3156_v45, %v1620_v40 }
0x318d   :  { %v1626_v5 = vpop.permute.xlu1 %1625 }
0x318e   :  { %v1628_v37 = vmul.f32 %v3162_v24, %v1626_v5 }
0x3190   :  { %v1629_v0 = vadd.f32 %v1628_v37, %v1622_v34 }
0x3192   :  { %v1630_v8 = vadd.f32 %v3168_v16, %v1629_v0 }
0x3194   :  { %2240 = vtanh.f32 %v1630_v8 }
0x319a   :  { %v2241_v54 = vpop.eup %2240 }
0x319b   :  { %v1632_v48 = vmul.f32 %v2241_v54, %v1531_v30 }
0x319d   :  { %1633 = vrot.lane.b32.xlu1 %v1632_v48, %s2269_s20 }
0x320f   :  { %v1634_v19 = vpop.permute.xlu1 %1633 }
0x3210   :  { %v1635_v39 = vadd.f32 %v1634_v19, %v1632_v48 }
0x3212   :  { %1636 = vrot.lane.b32.xlu1 %v1635_v39, %s2272_s21 }
0x3284   :  { %v1637_v36 = vpop.permute.xlu1 %1636 }
0x3285   :  { %v3460_v13 = vadd.f32 %v1637_v36, %v1635_v39  ;;  %v1532_v39 = vld [vmem:[#allocation2 + $0x6c] sm:$0xf] }
0x3287   :  { %v1640_v9 = vadd.f32 %v1639_v33, %v3460_v13 }
0x3289   :  { %v1641_v49 = vadd.f32 %v1640_v9, %v3373_v6 }
0x328b   :  { %v1648_v52 = vmul.f32 %v3133_v22, %v1641_v49  ;;  %v1642_v42 = vmul.f32 %v3139_v11, %v1641_v49  ;;  %v3471_v22 = vmul.f32 2.0, %v3221_v25  ;;  %v2259_v11 = vld [vmem:[%s3597_s9 + $0x8] sm:$0xff]  ;;  %v1810_v49 = vmul.f32 3.0, %v2642_v35 }
0x328c   :  { %v1819_v38 = vmul.f32 2.0, %v2259_v11 }
0x328d   :  { %v1649_v1 = vsel %vm600_vm0, %v1648_v52, 0.0  ;;  %v1643_v60 = vsel %vm600_vm0, %v1642_v42, 0.0  ;;  %v1829_v62 = vrot.slane %v3471_v22, 4  ;;  %v1814_v52 = vsub.f32 %v1810_v49, %v2642_v35 }
0x328e   :  { %1650 = vadd.xlane.f32.xlu2 %v1649_v1  ;;  %1644 = vadd.xlane.f32.xlu1 %v1643_v60  ;;  %v1827_v10 = vrot.slane %v1819_v38, 4  ;;  %v1916_v42 = vrot.slane %v2949_v56, 4  ;;  %v1915_v1 = vrot.slane %v2649_v43, 4  ;;  %v1676_v35 = vadd.f32 %v3460_v13, %v3441_v17 }
0x3290   :  { %v1830_v4 = vsel %vm600_vm0, %v1827_v10, %v1829_v62  ;;  %v1917_v60 = vsel %vm600_vm0, %v1915_v1, %v1916_v42 }
0x3291   :  { %v3491_v5 = vmul.f32 %v1830_v4, %v1816_v27 }
0x3293   :  { %v1895_v34 = vrot.slane %v3491_v5, 4 }
0x3301   :  { %v1651_v57 = vpop.xlane.xlu2 %1650  ;;  %v1645_v18 = vpop.xlane.xlu1 %1644 }
0x3302   :  { %v1652_v61 = vadd.f32 %v3147_v12, %v1651_v57  ;;  %v1646_v29 = vadd.f32 %v3147_v12, %v1645_v18  ;;  %v2260_v12 = vld [vmem:[%s3597_s9] sm:$0xff] }
0x3303   :  { %v1818_v58 = vmul.f32 2.0, %v2260_v12 }
0x3304   :  { %v1653_v63 = vmax.f32 %v1652_v61, 0.0  ;;  %v1647_v28 = vmax.f32 %v1646_v29, 0.0 }
0x3305   :  { %v1826_v20 = vrot.slane %v1818_v58, 4 }
0x3306   :  { %1662 = vperm.xlu2 %2168, %v1653_v63   ;;  %1656 = vperm.xlu0 %2164, %v1647_v28  }
0x3307   :  { %v1828_v40 = vsel %vm600_vm0, %v1826_v20, %v1827_v10 }
0x330e   :  { %1876 = vrot.lane.b32.xlu2 %v2634_v32, %s2279_s23  ;;  %2169 = vset.pattern.permute.xlu0 %v2263_v3  ;;  %v1815_v32 = vsub.f32 %v1811_v2, %v2940_v26 }
0x3310   :  { %v1838_v3 = vmul.f32 %v1828_v40, %v1815_v32 }
0x3312   :  { %v1893_v37 = vrot.slane %v1838_v3, 4 }
0x3314   :  { %v1896_v41 = vsel %vm600_vm0, %v1893_v37, %v1895_v34 }
0x3316   :  { %1880 = vrot.lane.b32.xlu2 %v3250_v21, %s2279_s23 }
0x331e   :  { %1901 = vrot.lane.b32.xlu2 %v1896_v41, %s2280_s26 }
0x3360   :  { %v1663_v0 = vpop.permute.xlu2 %1662 }
0x3361   :  { %v1665_v8 = vmul.f32 %v3162_v24, %v1663_v0 }
0x3368   :  { %v1877_v59 = vpop.permute.xlu2 %1876 }
0x3369   :  { %v1934_v17 = vsel %vm1740_vm4, %v2618_v23, %v1877_v59 }
0x3378   :  { %v1657_v26 = vpop.permute.xlu0 %1656 }
0x3379   :  { %v1659_v54 = vmul.f32 %v3156_v45, %v1657_v26  ;;  %v1837_v45 = vmul.f32 %v1826_v20, %v1814_v52 }
0x337b   :  { %v1666_v30 = vadd.f32 %v1665_v8, %v1659_v54  ;;  %v1892_v24 = vrot.slane %v1837_v45, 4 }
0x337d   :  { %v1667_v48 = vadd.f32 %v3168_v16, %v1666_v30  ;;  %v1894_v16 = vsel %vm600_vm0, %v1892_v24, %v1893_v37 }
0x337f   :  { %2242 = vtanh.f32 %v1667_v48 }
0x3385   :  { %v2243_v19 = vpop.eup %2242 }
0x3386   :  { %v1669_v36 = vmul.f32 %v2243_v19, %v1532_v39 }
0x3388   :  { %1670 = vrot.lane.b32.xlu0 %v1669_v36, %s2269_s20  ;;  %s2281_s20 = smov 12  }
0x33fa   :  { %v1671_v33 = vpop.permute.xlu0 %1670 }
0x33fb   :  { %v1672_v9 = vadd.f32 %v1671_v33, %v1669_v36 }
0x33fd   :  { %1673 = vrot.lane.b32.xlu0 %v1672_v9, %s2272_s21 }
0x3405   :  { %1878 = vrot.lane.b32.xlu0 %v2926_v46, %s2279_s23  ;;  %v1677_v46 = vmul.f32 3.0, %v1676_v35 }
0x3407   :  { %v1678_v18 = vadd.f32 %v1677_v46, %v3410_v15 }
0x340d   :  { %1899 = vrot.lane.b32.xlu0 %v1894_v16, %s2280_s26 }
0x3415   :  { %1922 = vrot.lane.b32.xlu0 %v1917_v60, %s2281_s20 }
0x346f   :  { %v1674_v57 = vpop.permute.xlu0 %1673 }
0x3470   :  { %v1675_v61 = vadd.f32 %v1674_v57, %v1672_v9 }
0x3472   :  { %v1679_v29 = vadd.f32 %v1678_v18, %v1675_v61 }
0x3474   :  { %v1680_v63 = vmul.f32 0.125, %v1679_v29 }
0x3476   :  { %v1681_v28 = vadd.f32 %v1680_v63, %v3373_v6  ;;  %v1748_v6 = vld [vmem:[%s3597_s9 + $0x18] sm:$0xf] }
0x3477   :  { %v1879_v43 = vpop.permute.xlu0 %1878  ;;  %v1777_v10 = vrot.slane %v1748_v6, 4  ;;  %v1852_v20 = vmul.f32 3.0, %v1748_v6  ;;  %v1821_v37 = vmul.f32 2.0, %v1748_v6 }
0x3478   :  { %1682 = vst [vmem:[#allocation3 + $0x1c] sm:$0xf] %v1681_v28  ;;  %v1935_v5 = vsel %vm1740_vm4, %v2904_v31, %v1879_v43 }
0x3479   :  { %v1778_v32 = vsel %vm600_vm0, %v1775_v44, %v1777_v10  ;;  %v1831_v26 = vrot.slane %v1821_v37, 4 }
0x347b   :  { %v1832_v25 = vsel %vm600_vm0, %v1829_v62, %v1831_v26 }
0x347f   :  { %v1900_v11 = vpop.permute.xlu0 %1899  ;;  %v1686_v38 = vld [vmem:[#allocation3 + $0x18] sm:$0xff] }
0x3480   :  { %2244 = vtanh.f32 %v1686_v38  ;;  %v1939_v15 = vsel %vm1938_vm6, %v1934_v17, %v1900_v11 }
0x3486   :  { %v2245_v12 = vpop.eup %2244 }
0x3487   :  { %1736 = vmatmul.f32.vlgmr.msra.gmra.mxu3 %v2245_v12  ;;  %v1923_v13 = vpop.permute.xlu0 %1922 }
0x3488   :  { %v1944_v58 = vsel %vm1943_vm5, %v1939_v15, %v1923_v13 }
0x3489   :  { %1949 = vst.msk [vmem:[%s3599_s11] sm:$0xff] %vm1948_vm7, %v1944_v58 }
0x350a   :  { %v1737_v2 = vpop.f32.mrf.mxu3 }
0x350b   :  { %v1738_v23 = vadd.f32 %v3226_v50, %v1737_v2  ;;  %v1856_v50 = vmul.f32 %v1852_v20, %v1748_v6 }
0x350d   :  { %1744 = vst.msk [vmem:[%s3598_s10 + $0x18] sm:$0xff] %vm1740_vm4, %v1738_v23  ;;  %v1758_v27 = vrot.slane %v1738_v23, 4  ;;  %v1866_v8 = vrot.slane %v1856_v50, 4 }
0x350f   :  { %v1759_v4 = vsel %vm600_vm0, %v1756_v55, %v1758_v27  ;;  %v1867_v44 = vsel %vm600_vm0, %v1864_v7, %v1866_v8  ;;  %v1881_v7 = vpop.permute.xlu2 %1880 }
0x3510   :  { %v1767_v40 = vsub.f32 %v1738_v23, %v1759_v4  ;;  %v1936_v45 = vsel %vm1740_vm4, %v3229_v53, %v1881_v7 }
0x3512   :  { %v1786_v3 = vmul.f32 %v1778_v32, %v1767_v40 }
0x3514   :  { %1882 = vrot.lane.b32.xlu1 %v1786_v3, %s2279_s23  ;;  %v1800_v41 = vrot.slane %v1786_v3, 4 }
0x3516   :  { %v1801_v0 = vsel %vm600_vm0, %v1798_v51, %v1800_v41  ;;  %v1918_v51 = vrot.slane %v3272_v14, 4 }
0x3517   :  { %v1809_v54 = vsub.f32 %v1786_v3, %v1801_v0  ;;  %v1902_v14 = vpop.permute.xlu2 %1901 }
0x3518   :  { %v1919_v47 = vsel %vm600_vm0, %v1916_v42, %v1918_v51 }
0x3519   :  { %v1813_v30 = vmul.f32 3.0, %v1809_v54  ;;  %v1844_v55 = vmul.f32 2.0, %v1809_v54 }
0x351b   :  { %v1817_v48 = vsub.f32 %v1813_v30, %v1809_v54  ;;  %v1848_v19 = vsub.f32 %v1809_v54, %v1844_v55 }
0x351d   :  { %v1840_v39 = vmul.f32 %v1832_v25, %v1817_v48  ;;  %v1875_v36 = vmul.f32 %v1867_v44, %v1848_v19 }
0x351f   :  { %v1897_v21 = vrot.slane %v1840_v39, 4  ;;  %v1920_v33 = vrot.slane %v1875_v36, 4 }
0x3521   :  { %1905 = vrot.lane.b32.xlu2 %v1897_v21, %s2280_s26  ;;  %v1921_v9 = vsel %vm600_vm0, %v1918_v51, %v1920_v33  ;;  %v1898_v22 = vsel %vm600_vm0, %v1895_v34, %v1897_v21  ;;  %v1940_v34 = vsel %vm1938_vm6, %v1935_v5, %v1902_v14 }
0x3522   :  { %1926 = vrot.lane.b32.xlu1 %v1921_v9, %s2281_s20  ;;  %1903 = vrot.lane.b32.xlu0 %v1898_v22, %s2280_s26 }
0x3529   :  { %1924 = vrot.lane.b32.xlu2 %v1919_v47, %s2281_s20 }
0x352a   :  { %1928 = vrot.lane.b32.xlu0 %v1920_v33, %s2281_s20 }
0x357b   :  { %v1906_v62 = vpop.permute.xlu2 %1905 }
0x3583   :  { %v1925_v49 = vpop.permute.xlu2 %1924 }
0x3584   :  { %v1945_v52 = vsel %vm1943_vm5, %v1940_v34, %v1925_v49 }
0x3585   :  { %1950 = vst.msk [vmem:[%s3599_s11 + $0x8] sm:$0xff] %vm1948_vm7, %v1945_v52 }
0x3586   :  { %v1883_v56 = vpop.permute.xlu1 %1882 }
0x3587   :  { %v1937_v1 = vsel %vm1740_vm4, %v1738_v23, %v1883_v56 }
0x3588   :  { %v1942_v60 = vsel %vm1938_vm6, %v1937_v1, %v1906_v62 }
0x3594   :  { %v1927_v24 = vpop.permute.xlu1 %1926  ;;  %v1904_v16 = vpop.permute.xlu0 %1903 }
0x3595   :  { %v1941_v42 = vsel %vm1938_vm6, %v1936_v45, %v1904_v16 }
0x3596   :  { %v1946_v31 = vsel %vm1943_vm5, %v1941_v42, %v1927_v24 }
0x3597   :  { %1951 = vst.msk [vmem:[%s3599_s11 + $0x10] sm:$0xff] %vm1948_vm7, %v1946_v31 }
0x359c   :  { %v1929_v35 = vpop.permute.xlu0 %1928 }
0x359d   :  { %v1947_v46 = vsel %vm1943_vm5, %v1942_v60, %v1929_v35 }
0x359e   :  { %1953 = vst.msk [vmem:[%s3599_s11 + $0x18] sm:$0xf] %vm1952_vm8, %v1947_v46 }

</bundles_post_ra>
